<compile_context>
chip_gen: v6e
topology: v6e:2x2x1
jax: 0.10.0
libtpu: 0.0.40
codegen_flags: <defaults>
</compile_context>

<pallas_src>
import functools

import jax
import jax.numpy as jnp
from jax.experimental import pallas as pl
from jax.experimental.pallas import tpu as pltpu

IN_F, H1, H2 = 3, 512, 256
K1_PAD = 8          # layer-1 K padded to one sublane tile
SLOPE = 0.2


def _leaky_relu(x, slope=SLOPE):
    # valid for 0 < slope < 1: max(x, slope*x) == leaky_relu(x)
    return jnp.maximum(x, slope * x)


def disc_kernel(xt_ref, w1_ref, b1_ref, w2_ref, b2_ref, w3_ref, b3_ref, o_ref,
                *, cast_to=None):
    xt = xt_ref[...]                                    # (8, TB), batch on lanes
    if cast_to is not None:
        xt = xt.astype(cast_to)

    # Layer 1 (K padded 3->8, zeros in the pad rows/cols): MXU matmul.
    h1 = jnp.dot(w1_ref[...], xt,
                 preferred_element_type=jnp.float32) + b1_ref[...]   # (512, TB)
    h1 = _leaky_relu(h1)
    if cast_to is not None:
        h1 = h1.astype(cast_to)

    # Layer 2 (512 -> 256): MXU matmul, f32 accumulation.
    h2 = jnp.dot(w2_ref[...], h1,
                 preferred_element_type=jnp.float32) + b2_ref[...]   # (256, TB)
    h2 = _leaky_relu(h2)
    if cast_to is not None:
        h2 = h2.astype(cast_to)

    # Layer 3 (256 -> 1): 1-row MXU matmul; output already lane-dense.
    logits = jnp.dot(w3_ref[...], h2,
                     preferred_element_type=jnp.float32) + b3_ref[0, 0]  # (1, TB)
    o_ref[...] = jax.nn.sigmoid(logits).astype(o_ref.dtype)


@functools.partial(jax.jit, static_argnames=("block_b", "matmul_in_bf16"))
def discriminator_forward(x, w1, b1, w2, b2, w3, b3, block_b=1024,
                          matmul_in_bf16=True):
    """x: (B, 3) float32; weights/biases in PyTorch nn.Linear layout."""
    B = x.shape[0]

    # Pick the effective batch tile: multiple of 128, no larger than the padded
    # batch, and (when the batch allows) at least 2 grid steps so v7x's two
    # TensorCores both get work on the "parallel" batch axis.
    bb = max(128, min(block_b, pl.cdiv(B, 128) * 128))
    if B >= 256 and pl.cdiv(B, bb) < 2:
        bb = max(128, pl.cdiv(B, 2 * 128) * 128)
    Bp = pl.cdiv(B, bb) * bb

    compute_dtype = jnp.bfloat16 if matmul_in_bf16 else jnp.float32
    cast_to = jnp.bfloat16 if matmul_in_bf16 else None

    # Single fused pad: features 3 -> 8 (zeros, so padded K contributes 0) and
    # batch B -> Bp, applied to x^T so batch lands on the lane axis.
    xt = jnp.pad(x.T, ((0, K1_PAD - IN_F), (0, Bp - B)))          # (8, Bp) f32

    # Weights cast once in the wrapper (resident in VMEM, DMA'd a single time).
    w1p = jnp.pad(w1, ((0, 0), (0, K1_PAD - IN_F))).astype(compute_dtype)  # (512, 8)
    w2c = w2.astype(compute_dtype)                                         # (256, 512)
    w3r = w3.reshape(1, H2).astype(compute_dtype)                          # (1, 256)
    b1c = b1.reshape(H1, 1)
    b2c = b2.reshape(H2, 1)
    b3s = b3.reshape(1, 1)                                                 # scalar -> SMEM

    kernel = functools.partial(disc_kernel, cast_to=cast_to)

    wsize = jnp.dtype(compute_dtype).itemsize
    weight_bytes = wsize * (H1 * K1_PAD + H2 * H1 + H2) + 4 * (H1 + H2 + 1)
    cost = pl.CostEstimate(
        flops=2 * Bp * (K1_PAD * H1 + H1 * H2 + H2),
        transcendentals=2 * Bp,                 # exp + recip per sigmoid output
        bytes_accessed=4 * K1_PAD * Bp + 4 * Bp + weight_bytes,
    )

    out = pl.pallas_call(
        kernel,
        out_shape=jax.ShapeDtypeStruct((1, Bp), jnp.float32),
        grid=(Bp // bb,),
        in_specs=[
            pl.BlockSpec((K1_PAD, bb), lambda i: (0, i)),   # x^T tile (streamed)
            pl.BlockSpec((H1, K1_PAD), lambda i: (0, 0)),   # W1 padded (resident)
            pl.BlockSpec((H1, 1), lambda i: (0, 0)),        # b1 (resident)
            pl.BlockSpec((H2, H1), lambda i: (0, 0)),       # W2 (resident)
            pl.BlockSpec((H2, 1), lambda i: (0, 0)),        # b2 (resident)
            pl.BlockSpec((1, H2), lambda i: (0, 0)),        # w3 row (resident)
            pl.BlockSpec(memory_space=pltpu.MemorySpace.SMEM),  # b3 scalar
        ],
        out_specs=pl.BlockSpec((1, bb), lambda i: (0, i)),  # lane-dense output
        compiler_params=pltpu.CompilerParams(
            dimension_semantics=("parallel",)),
        cost_estimate=cost,
    )(xt, w1p, b1c, w2c, b2c, w3r, b3s)

    return out[0, :B].reshape(B, 1)


def init_params(key):
    """Deterministic init mimicking torch.nn.Linear default: U(+-1/sqrt(fan_in)).

    Weights are kept in PyTorch layout: W [out, in], b [out]."""
    def linear(k, fan_in, fan_out):
        kw, kb = jax.random.split(k)
        bound = 1.0 / jnp.sqrt(fan_in)
        w = jax.random.uniform(kw, (fan_out, fan_in), jnp.float32, -bound, bound)
        b = jax.random.uniform(kb, (fan_out,), jnp.float32, -bound, bound)
        return w, b

    k1, k2, k3 = jax.random.split(key, 3)
    w1, b1 = linear(k1, IN_F, H1)
    w2, b2 = linear(k2, H1, H2)
    w3, b3 = linear(k3, H2, 1)
    return w1, b1, w2, b2, w3, b3


def reference_forward(x, w1, b1, w2, b2, w3, b3):
    h1 = _leaky_relu(x @ w1.T + b1)
    h2 = _leaky_relu(h1 @ w2.T + b2)
    return jax.nn.sigmoid(h2 @ w3.T + b3)


if __name__ == "__main__":
    key = jax.random.PRNGKey(0)
    kx, kp = jax.random.split(key)

    B = 512                       # small batch; wrapper clamps tile -> 2 grid steps
    x = jax.random.normal(kx, (B, IN_F), dtype=jnp.float32)
    params = init_params(kp)
    ref = reference_forward(x, *params)

    # Exact-f32 path: must match the reference tightly.
    out_f32 = discriminator_forward(x, *params, matmul_in_bf16=False)
    out_f32 = jax.block_until_ready(out_f32)
    assert out_f32.shape == (B, 1)
    assert jnp.allclose(out_f32, ref, atol=1e-5, rtol=1e-5), "f32 mismatch vs reference"

    # Default fast path (bf16 MXU operands, f32 accumulation): looser tolerance.
    out_bf16 = discriminator_forward(x, *params)
    out_bf16 = jax.block_until_ready(out_bf16)
    assert out_bf16.shape == (B, 1)
    assert jnp.allclose(out_bf16, ref, atol=5e-2, rtol=0), "bf16 mismatch vs reference"

    print("KERNEL_OK")
</pallas_src>

<mosaic_0001>
module attributes {stable_mosaic.version = 11 : i64} {
  func.func @disc_kernel(%arg0: i32, %arg1: memref<8x256xf32, #tpu.memory_space<vmem>>, %arg2: memref<512x8xf32, #tpu.memory_space<vmem>>, %arg3: memref<512x1xf32, #tpu.memory_space<vmem>>, %arg4: memref<256x512xf32, #tpu.memory_space<vmem>>, %arg5: memref<256x1xf32, #tpu.memory_space<vmem>>, %arg6: memref<1x256xf32, #tpu.memory_space<vmem>>, %arg7: memref<1x1xf32, #tpu.memory_space<smem>>, %arg8: memref<1x256xf32, #tpu.memory_space<vmem>>) attributes {dimension_semantics = [#tpu.dimension_semantics<parallel>], iteration_bounds = array<i64: 2>, scalar_prefetch = 0 : i64, scratch_operands = 0 : i64, tpu.core_type = #tpu.core_type<tc>, window_params = [{transform_indices = @transform_0, window_bounds = array<i64: 8, 256>}, {pipeline_mode = #tpu.pipeline_mode<synchronous>, transform_indices = @transform_1, window_bounds = array<i64: 512, 8>}, {pipeline_mode = #tpu.pipeline_mode<synchronous>, transform_indices = @transform_2, window_bounds = array<i64: 512, 1>}, {pipeline_mode = #tpu.pipeline_mode<synchronous>, transform_indices = @transform_3, window_bounds = array<i64: 256, 512>}, {pipeline_mode = #tpu.pipeline_mode<synchronous>, transform_indices = @transform_4, window_bounds = array<i64: 256, 1>}, {pipeline_mode = #tpu.pipeline_mode<synchronous>, transform_indices = @transform_5, window_bounds = array<i64: 1, 256>}, {transform_indices = @transform_6, window_bounds = array<i64: 1, 1>}, {transform_indices = @transform_7, window_bounds = array<i64: 1, 256>}]} {
    %c0 = arith.constant 0 : index
    %c0_0 = arith.constant 0 : index
    %0 = vector.load %arg1[%c0, %c0_0] : memref<8x256xf32, #tpu.memory_space<vmem>>, vector<8x256xf32>
    %c0_1 = arith.constant 0 : index
    %c0_2 = arith.constant 0 : index
    %1 = vector.load %arg2[%c0_1, %c0_2] : memref<512x8xf32, #tpu.memory_space<vmem>>, vector<512x8xf32>
    %cst = arith.constant dense<0.000000e+00> : vector<512x256xf32>
    %2 = tpu.matmul %1, %0, %cst {dimension_numbers = #tpu.dot_dimension_numbers<[1], [0], [0], [1], [0, 0, 1, 1], [], []>} : vector<512x8xf32>, vector<8x256xf32>, vector<512x256xf32> -> vector<512x256xf32>
    %c0_3 = arith.constant 0 : index
    %c0_4 = arith.constant 0 : index
    %3 = vector.load %arg3[%c0_3, %c0_4] : memref<512x1xf32, #tpu.memory_space<vmem>>, vector<512x1xf32>
    %4 = vector.broadcast %3 : vector<512x1xf32> to vector<512x256xf32>
    %5 = arith.addf %2, %4 : vector<512x256xf32>
    %cst_5 = arith.constant 2.000000e-01 : f32
    %6 = vector.broadcast %cst_5 : f32 to vector<512x256xf32>
    %7 = arith.mulf %6, %5 : vector<512x256xf32>
    %8 = arith.maximumf %5, %7 : vector<512x256xf32>
    %c0_6 = arith.constant 0 : index
    %c0_7 = arith.constant 0 : index
    %9 = vector.load %arg4[%c0_6, %c0_7] : memref<256x512xf32, #tpu.memory_space<vmem>>, vector<256x512xf32>
    %cst_8 = arith.constant dense<0.000000e+00> : vector<256x256xf32>
    %10 = tpu.matmul %9, %8, %cst_8 {dimension_numbers = #tpu.dot_dimension_numbers<[1], [0], [0], [1], [0, 0, 1, 1], [], []>} : vector<256x512xf32>, vector<512x256xf32>, vector<256x256xf32> -> vector<256x256xf32>
    %c0_9 = arith.constant 0 : index
    %c0_10 = arith.constant 0 : index
    %11 = vector.load %arg5[%c0_9, %c0_10] : memref<256x1xf32, #tpu.memory_space<vmem>>, vector<256x1xf32>
    %12 = vector.broadcast %11 : vector<256x1xf32> to vector<256x256xf32>
    %13 = arith.addf %10, %12 : vector<256x256xf32>
    %cst_11 = arith.constant 2.000000e-01 : f32
    %14 = vector.broadcast %cst_11 : f32 to vector<256x256xf32>
    %15 = arith.mulf %14, %13 : vector<256x256xf32>
    %16 = arith.maximumf %13, %15 : vector<256x256xf32>
    %c0_12 = arith.constant 0 : index
    %c0_13 = arith.constant 0 : index
    %17 = vector.load %arg6[%c0_12, %c0_13] : memref<1x256xf32, #tpu.memory_space<vmem>>, vector<1x256xf32>
    %cst_14 = arith.constant dense<0.000000e+00> : vector<1x256xf32>
    %18 = tpu.matmul %17, %16, %cst_14 {dimension_numbers = #tpu.dot_dimension_numbers<[1], [0], [0], [1], [0, 0, 1, 1], [], []>} : vector<1x256xf32>, vector<256x256xf32>, vector<1x256xf32> -> vector<1x256xf32>
    %c0_15 = arith.constant 0 : index
    %c0_16 = arith.constant 0 : index
    %19 = memref.load %arg7[%c0_15, %c0_16] : memref<1x1xf32, #tpu.memory_space<smem>>
    %20 = vector.broadcast %19 : f32 to vector<1x256xf32>
    %21 = arith.addf %18, %20 : vector<1x256xf32>
    %22 = arith.negf %21 : vector<1x256xf32>
    %23 = math.exp %22 : vector<1x256xf32>
    %cst_17 = arith.constant 1.000000e+00 : f32
    %24 = vector.broadcast %cst_17 : f32 to vector<1x256xf32>
    %25 = arith.addf %24, %23 : vector<1x256xf32>
    %26 = arith.divf %24, %25 : vector<1x256xf32>
    %c0_18 = arith.constant 0 : index
    %c0_19 = arith.constant 0 : index
    %27 = vector.load %arg8[%c0_18, %c0_19] : memref<1x256xf32, #tpu.memory_space<vmem>>, vector<1x256xf32>
    tpu.vector_store %arg8[%c0_18, %c0_19], %26 {strides = array<i32>} : memref<1x256xf32, #tpu.memory_space<vmem>>, vector<1x256xf32>,
    return
  }
  func.func @transform_0(%arg0: i32) -> (i32, i32) {
    %c0_i32 = arith.constant 0 : i32
    %c0_i32_0 = arith.constant 0 : i32
    return %c0_i32, %arg0 : i32, i32
  }
  func.func @transform_1(%arg0: i32) -> (i32, i32) {
    %c0_i32 = arith.constant 0 : i32
    %c0_i32_0 = arith.constant 0 : i32
    %c0_i32_1 = arith.constant 0 : i32
    return %c0_i32, %c0_i32_0 : i32, i32
  }
  func.func @transform_2(%arg0: i32) -> (i32, i32) {
    %c0_i32 = arith.constant 0 : i32
    %c0_i32_0 = arith.constant 0 : i32
    %c0_i32_1 = arith.constant 0 : i32
    return %c0_i32, %c0_i32_0 : i32, i32
  }
  func.func @transform_3(%arg0: i32) -> (i32, i32) {
    %c0_i32 = arith.constant 0 : i32
    %c0_i32_0 = arith.constant 0 : i32
    %c0_i32_1 = arith.constant 0 : i32
    return %c0_i32, %c0_i32_0 : i32, i32
  }
  func.func @transform_4(%arg0: i32) -> (i32, i32) {
    %c0_i32 = arith.constant 0 : i32
    %c0_i32_0 = arith.constant 0 : i32
    %c0_i32_1 = arith.constant 0 : i32
    return %c0_i32, %c0_i32_0 : i32, i32
  }
  func.func @transform_5(%arg0: i32) -> (i32, i32) {
    %c0_i32 = arith.constant 0 : i32
    %c0_i32_0 = arith.constant 0 : i32
    %c0_i32_1 = arith.constant 0 : i32
    return %c0_i32, %c0_i32_0 : i32, i32
  }
  func.func @transform_6(%arg0: i32) -> (i32, i32) {
    %c0_i32 = arith.constant 0 : i32
    %c0_i32_0 = arith.constant 0 : i32
    %c0_i32_1 = arith.constant 0 : i32
    return %c0_i32, %c0_i32_0 : i32, i32
  }
  func.func @transform_7(%arg0: i32) -> (i32, i32) {
    %c0_i32 = arith.constant 0 : i32
    %c0_i32_0 = arith.constant 0 : i32
    return %c0_i32, %arg0 : i32, i32
  }
}

</mosaic_0001>

<bundles_post_ra>
// kernel: discriminator_forward.1
= control target key start
LH: loop header
LB: loop body
LE: loop exit
PB: predicated region body
PF: predicated region fallthrough
CT: control target
= control target key end

     0   :  { %s4838_s0 = inlined_call_operand.vmem [shape: f32[8,512], index: 0, kind: input, shape index: {}]   ;;  %s4839_s1 = inlined_call_operand.vmem [shape: f32[512,8], index: 1, kind: input, shape index: {}]   ;;  %s4840_s2 = inlined_call_operand.vmem [shape: f32[512,1], index: 2, kind: input, shape index: {}]   ;;  %s4841_s3 = inlined_call_operand.vmem [shape: f32[256,512], index: 3, kind: input, shape index: {}]   ;;  %s4842_s4 = inlined_call_operand.vmem [shape: f32[256,1], index: 4, kind: input, shape index: {}]   ;;  %s4843_s5 = inlined_call_operand.vmem [shape: f32[1,256], index: 5, kind: input, shape index: {}]   ;;  %s4844_s6 = inlined_call_operand.<no memory space> [shape: f32[1,1], index: 6, kind: input, shape index: {}]   ;;  %s4845_s7 = inlined_call_operand.hbm [shape: f32[1,512], index: 7, kind: output, shape index: {}]  }
   0x1   :  { %12 = sst [smem:[#allocation2]] %s4844_s6 }
   0x2   :  { %13 = vsyncpa [#allocation4], 0 }
   0x3   :  { %15 = vsyncpa [#allocation4 + $0x1], 0  ;;  %s3025_s26 = smov 0   ;;  %s3027_s27 = smov 0  }
   0x4   :  { %s3029_s28 = smov 0   ;;  %s3031_s29 = smov 0  }
   0x5 LB: > { %s3046_s6 = sadd.s32 4294967295, %s2976_s29   ;;  %s2785_s30 = sadd.s32 4294967294, %s2976_s29   ;;  %s2976_s29 = sphi %s3031_s29, %s4983_s29   ;;  %s2972_s28 = sphi %s3029_s28, %s4982_s28   ;;  %s2968_s27 = sphi %s3027_s27, %s4981_s27   ;;  %s2964_s26 = sphi %s3025_s26, %s4980_s26  }
   0x6   : > { %s3050_s8 = sadd.s32 1, %s2976_s29   ;;  %s180_s9 = sadd.s32 1, %s2972_s28 }
   0x7   : > { %s177_s10 = ssub.s32 %s2976_s29, %s3050_s8  ;;  %p190_p0 = scmp.ne.s32.totalorder %s2972_s28, %s2968_s27 }
   0x8   : > { %p178_p1 = scmp.eq.s32.totalorder %s177_s10, 0  ;;  %p191_p2 = scmp.eq.s32.totalorder %s3046_s6, 1 }
   0x9   : > { %p196_p3 = scmp.ne.s32.totalorder %s2968_s27, %s2964_s26  ;;  %p197_p4 = scmp.eq.s32.totalorder %s2785_s30, 1 }
   0xa   : > { %s3061_s11 = scalar_select %p178_p1, %s2972_s28, %s180_s9  }
   0xb   : > { %p3063_p5 = por %p191_p2, %p190_p0  ;;  %p3067_p6 = por %p197_p4, %p196_p3 }
   0xc   : > { %p2788_p7 = scmp.ge.s32.totalorder %s2976_s29, 1  ;;  %p242_p8 = scmp.lt.s32.totalorder %s2976_s29, 3 }
   0xe   : > { %p243_p9 = pnand %p2788_p7, %p242_p8 }
  0x10   : > { %246 = sbr.rel (%p243_p9) target bundleno = 1120 (0x460), region = 48 }
  0x15   : > { %v362_v0 = vld [vmem:[%s4840_s2 + $0x78] sm:$0xff]  ;;  %v360_v1 = vld [vmem:[%s4840_s2 + $0x68] sm:$0xff]  ;;  %s2790_s18 = sshll.u32 %s3046_s6, 1  ;;  %v2978_v2 = vmov 0   ;;  %v361_v3 = vld [vmem:[%s4840_s2 + $0x70] sm:$0xff]  ;;  %v2979_v5 = vmov 0.0  }
  0x16   : > { %2907 = vset.pattern.permute.xlu1 %v2978_v2  ;;  %2906 = vset.pattern.permute.xlu0 %v2978_v2  ;;  %p275_p10 = scmp.lt.s32.totalorder %s2790_s18, 3  ;;  %v359_v4 = vld [vmem:[%s4840_s2 + $0x60] sm:$0xff]  ;;  %v358_v6 = vld [vmem:[%s4840_s2 + $0x58] sm:$0xff]  ;;  %v357_v9 = vld [vmem:[%s4840_s2 + $0x50] sm:$0xff]  ;;  %vm731_vm0 = vcmask 64512   ;;  %s2592_s9 = sld [smem:[#allocation2]] }
  0x17   : > { %488 = vperm.xlu0 %2906, %v362_v0   ;;  %478 = vperm.xlu1 %2907, %v360_v1   ;;  %v283_v10 = vld [vmem:[%s4839_s1] sm:$0xff]  ;;  %v356_v11 = vld [vmem:[%s4840_s2 + $0x48] sm:$0xff]  ;;  %v354_v14 = vld [vmem:[%s4840_s2 + $0x38] sm:$0xff]  ;;  %s271_s10 = sand.u32 1, %s2968_s27   ;;  %s2863_s15 = sshll.u32 %s3046_s6, 5 }
  0x18   : > { %s4985_s18 = smov (!%p275_p10, %s2790_s18), 3  ;;  %988 = vmatprep.mubr.f32.mxu0 %v2979_v5  ;;  %v355_v12 = vld [vmem:[%s4840_s2 + $0x40] sm:$0xff]  ;;  %v284_v13 = vld [vmem:[%s4839_s1 + $0x8] sm:$0xff]  ;;  %v353_v15 = vld [vmem:[%s4840_s2 + $0x30] sm:$0xff]  ;;  %s2789_s14 = sshll.u32 %s271_s10, 1 }
  0x19   : > { %s2791_s23 = sshll.u32 %s4985_s18, 3  ;;  %v285_v16 = vld [vmem:[%s4839_s1 + $0x10] sm:$0xff]  ;;  %v352_v17 = vld [vmem:[%s4840_s2 + $0x28] sm:$0xff]  ;;  %v351_v18 = vld [vmem:[%s4840_s2 + $0x20] sm:$0xff]  ;;  %s273_s16 = scalar_lea.vmem [#allocation3], %s2789_s14 }
  0x1a   : > { %s278_s30 = scalar_lea.vmem %s4838_s0, %s2791_s23  ;;  %v286_v19 = vld [vmem:[%s4839_s1 + $0x18] sm:$0xff]  ;;  %v349_v21 = vld [vmem:[%s4840_s2 + $0x10] sm:$0xff]  ;;  %v287_v22 = vld [vmem:[%s4839_s1 + $0x20] sm:$0xff]  ;;  %s2726_s17 = sshll.u32 %s273_s16, 4  ;;  %s2727_s17 = int_to_ptr.vmem [resolvable:$true] %s2726_s17 }
  0x1b   : > { %483 = vperm.xlu0 %2906, %v361_v3   ;;  %473 = vperm.xlu1 %2907, %v359_v4   ;;  %v282_v7 = vld [vmem:[%s278_s30 + $0x8] sm:$0xff]  ;;  %v281_v8 = vld [vmem:[%s278_s30] sm:$0xff]  ;;  %v350_v20 = vld [vmem:[%s4840_s2 + $0x18] sm:$0xff]  ;;  %s2724_s20 = scalar_lea.hbm %s4845_s7, %s2863_s15  ;;  %s2712_s21 = scalar_lea.sflag [#allocation4], %s271_s10 }
  0x1c   : > { %954 = vmatprep.subr.mxu0 %v282_v7  ;;  %v348_v23 = vld [vmem:[%s4840_s2 + $0x8] sm:$0xff]  ;;  %v347_v24 = vld [vmem:[%s4840_s2] sm:$0xff]  ;;  %v378_v26 = vld [vmem:[%s4840_s2 + $0xf8] sm:$0xff]  ;;  %s2916_s22 = scalar_lea.vmem %s2727_s17, 32  ;;  %s2981_s23 = smov [#allocation3]  }
  0x1d   : > { %955 = vmatpush1.msra.mxu0 %v281_v8  ;;  %v288_v25 = vld [vmem:[%s4839_s1 + $0x28] sm:$0xff]  ;;  %v377_v27 = vld [vmem:[%s4840_s2 + $0xf0] sm:$0xff]  ;;  %v375_v30 = vld [vmem:[%s4840_s2 + $0xe0] sm:$0xff]  ;;  %p2917_p11 = scmp.ne.s32.totalorder %s2727_s17, %s2916_s22  ;;  %s2920_s6 = sshll.u32 %s2981_s23, 4  ;;  %s2921_s6 = int_to_ptr.vmem [resolvable:$false] %s2920_s6 }
  0x1e   : > { %2792 = vmatmul.mubr.msk.f32.vlgmr.msra.gmra.mxu0 %vm731_vm0, %v283_v10  ;;  %v289_v28 = vld [vmem:[%s4839_s1 + $0x30] sm:$0xff]  ;;  %v376_v29 = vld [vmem:[%s4840_s2 + $0xe8] sm:$0xff]  ;;  %v290_v31 = vld [vmem:[%s4839_s1 + $0x38] sm:$0xff]  ;;  %s2922_s24 = scalar_lea.vmem %s2921_s6, 64  ;;  %p2923_p0 = scmp.lt.s32.totalorder %s2727_s17, %s2921_s6 }
  0x1f   : > { %468 = vperm.xlu0 %2906, %v358_v6   ;;  %463 = vperm.xlu1 %2907, %v357_v9   ;;  %v374_v32 = vld [vmem:[%s4840_s2 + $0xd8] sm:$0xff]  ;;  %v373_v33 = vld [vmem:[%s4840_s2 + $0xd0] sm:$0xff]  ;;  %v291_v34 = vld [vmem:[%s4839_s1 + $0x40] sm:$0xff]  ;;  %p2918_p12 = pnand %p2917_p11, %p3063_p5  ;;  %p2924_p1 = scmp.lt.s32.totalorder %s2922_s24, %s2916_s22 }
  0x20   : > { %994 = vmatprep.mubr.f32.mxu0 %v2979_v5  ;;  %v372_v35 = vld [vmem:[%s4840_s2 + $0xc8] sm:$0xff]  ;;  %v371_v36 = vld [vmem:[%s4840_s2 + $0xc0] sm:$0xff]  ;;  %v370_v38 = vld [vmem:[%s4840_s2 + $0xb8] sm:$0xff] }
  0x21   : > { %v292_v37 = vld [vmem:[%s4839_s1 + $0x48] sm:$0xff]  ;;  %v369_v39 = vld [vmem:[%s4840_s2 + $0xb0] sm:$0xff]  ;;  %v367_v42 = vld [vmem:[%s4840_s2 + $0xa0] sm:$0xff]  ;;  %p2919_p13 = pneg %p2918_p12  ;;  %p2925_p2 = por %p2924_p1, %p2923_p0 }
  0x22   : > { %2793 = vmatmul.mubr.msk.f32.gmra.mxu0 %vm731_vm0, %v284_v13  ;;  %v293_v40 = vld [vmem:[%s4839_s1 + $0x50] sm:$0xff]  ;;  %v368_v41 = vld [vmem:[%s4840_s2 + $0xa8] sm:$0xff]  ;;  %v294_v43 = vld [vmem:[%s4839_s1 + $0x58] sm:$0xff] }
  0x23   : > { %458 = vperm.xlu0 %2906, %v356_v11   ;;  %453 = vperm.xlu1 %2907, %v355_v12   ;;  %v366_v44 = vld [vmem:[%s4840_s2 + $0x98] sm:$0xff]  ;;  %v365_v45 = vld [vmem:[%s4840_s2 + $0x90] sm:$0xff]  ;;  %v295_v46 = vld [vmem:[%s4839_s1 + $0x60] sm:$0xff]  ;;  %p2926_p3 = pnand %p2925_p2, %p2919_p13 }
  0x24   : > { %1000 = vmatprep.mubr.f32.mxu0 %v2979_v5  ;;  %v364_v47 = vld [vmem:[%s4840_s2 + $0x88] sm:$0xff]  ;;  %v363_v48 = vld [vmem:[%s4840_s2 + $0x80] sm:$0xff]  ;;  %v394_v50 = vld [vmem:[%s4840_s2 + $0x178] sm:$0xff] }
  0x25   : > { %v296_v49 = vld [vmem:[%s4839_s1 + $0x68] sm:$0xff]  ;;  %v393_v51 = vld [vmem:[%s4840_s2 + $0x170] sm:$0xff]  ;;  %v391_v54 = vld [vmem:[%s4840_s2 + $0x160] sm:$0xff] }
  0x26   : > { %2794 = vmatmul.mubr.msk.f32.gmra.mxu0 %vm731_vm0, %v285_v16  ;;  %v297_v52 = vld [vmem:[%s4839_s1 + $0x70] sm:$0xff]  ;;  %v392_v53 = vld [vmem:[%s4840_s2 + $0x168] sm:$0xff]  ;;  %v298_v55 = vld [vmem:[%s4839_s1 + $0x78] sm:$0xff] }
  0x27   : > { %448 = vperm.xlu0 %2906, %v354_v14   ;;  %443 = vperm.xlu1 %2907, %v353_v15   ;;  %v390_v56 = vld [vmem:[%s4840_s2 + $0x158] sm:$0xff]  ;;  %v389_v57 = vld [vmem:[%s4840_s2 + $0x150] sm:$0xff]  ;;  %v299_v58 = vld [vmem:[%s4839_s1 + $0x80] sm:$0xff] }
  0x28   : > { %1006 = vmatprep.mubr.f32.mxu0 %v2979_v5  ;;  %v388_v59 = vld [vmem:[%s4840_s2 + $0x148] sm:$0xff]  ;;  %v387_v60 = vld [vmem:[%s4840_s2 + $0x140] sm:$0xff]  ;;  %v386_v62 = vld [vmem:[%s4840_s2 + $0x138] sm:$0xff] }
  0x29   : > { %v300_v61 = vld [vmem:[%s4839_s1 + $0x88] sm:$0xff]  ;;  %v385_v63 = vld [vmem:[%s4840_s2 + $0x130] sm:$0xff]  ;;  %v383_v2 = vld [vmem:[%s4840_s2 + $0x120] sm:$0xff] }
  0x2a   : > { %2795 = vmatmul.mubr.msk.f32.gmra.mxu0 %vm731_vm0, %v286_v19  ;;  %v301_v0 = vld [vmem:[%s4839_s1 + $0x90] sm:$0xff]  ;;  %v384_v1 = vld [vmem:[%s4840_s2 + $0x128] sm:$0xff]  ;;  %v302_v3 = vld [vmem:[%s4839_s1 + $0x98] sm:$0xff] }
  0x2b   : > { %438 = vperm.xlu0 %2906, %v352_v17   ;;  %433 = vperm.xlu1 %2907, %v351_v18   ;;  %v382_v4 = vld [vmem:[%s4840_s2 + $0x118] sm:$0xff]  ;;  %v381_v6 = vld [vmem:[%s4840_s2 + $0x110] sm:$0xff]  ;;  %v303_v7 = vld [vmem:[%s4839_s1 + $0xa0] sm:$0xff] }
  0x2c   : > { %1012 = vmatprep.mubr.f32.mxu0 %v2979_v5  ;;  %v380_v8 = vld [vmem:[%s4840_s2 + $0x108] sm:$0xff]  ;;  %v379_v9 = vld [vmem:[%s4840_s2 + $0x100] sm:$0xff]  ;;  %v410_v11 = vld [vmem:[%s4840_s2 + $0x1f8] sm:$0xff] }
  0x2d   : > { %v304_v10 = vld [vmem:[%s4839_s1 + $0xa8] sm:$0xff]  ;;  %v409_v12 = vld [vmem:[%s4840_s2 + $0x1f0] sm:$0xff]  ;;  %v407_v15 = vld [vmem:[%s4840_s2 + $0x1e0] sm:$0xff] }
  0x2e   : > { %2796 = vmatmul.mubr.msk.f32.gmra.mxu0 %vm731_vm0, %v287_v22  ;;  %v305_v13 = vld [vmem:[%s4839_s1 + $0xb0] sm:$0xff]  ;;  %v408_v14 = vld [vmem:[%s4840_s2 + $0x1e8] sm:$0xff]  ;;  %v306_v16 = vld [vmem:[%s4839_s1 + $0xb8] sm:$0xff] }
  0x2f   : > { %428 = vperm.xlu0 %2906, %v350_v20   ;;  %423 = vperm.xlu1 %2907, %v349_v21   ;;  %v406_v17 = vld [vmem:[%s4840_s2 + $0x1d8] sm:$0xff]  ;;  %v405_v18 = vld [vmem:[%s4840_s2 + $0x1d0] sm:$0xff]  ;;  %v307_v19 = vld [vmem:[%s4839_s1 + $0xc0] sm:$0xff] }
  0x30   : > { %1018 = vmatprep.mubr.f32.mxu0 %v2979_v5  ;;  %v404_v20 = vld [vmem:[%s4840_s2 + $0x1c8] sm:$0xff]  ;;  %v403_v21 = vld [vmem:[%s4840_s2 + $0x1c0] sm:$0xff] }
  0x31   : > { %v308_v22 = vld [vmem:[%s4839_s1 + $0xc8] sm:$0xff] }
  0x32   : > { %2797 = vmatmul.mubr.msk.f32.gmra.mxu0 %vm731_vm0, %v288_v25  ;;  %v309_v25 = vld [vmem:[%s4839_s1 + $0xd0] sm:$0xff] }
  0x33   : > { %418 = vperm.xlu0 %2906, %v348_v23   ;;  %413 = vperm.xlu1 %2907, %v347_v24   ;;  %v402_v23 = vld [vmem:[%s4840_s2 + $0x1b8] sm:$0xff]  ;;  %v401_v24 = vld [vmem:[%s4840_s2 + $0x1b0] sm:$0xff] }
  0x34   : > { %1024 = vmatprep.mubr.f32.mxu0 %v2979_v5 }
  0x36   : > { %2798 = vmatmul.mubr.msk.f32.gmra.mxu0 %vm731_vm0, %v289_v28  ;;  %v310_v28 = vld [vmem:[%s4839_s1 + $0xd8] sm:$0xff] }
  0x37   : > { %568 = vperm.xlu0 %2906, %v378_v26   ;;  %563 = vperm.xlu1 %2907, %v377_v27   ;;  %v400_v26 = vld [vmem:[%s4840_s2 + $0x1a8] sm:$0xff]  ;;  %v399_v27 = vld [vmem:[%s4840_s2 + $0x1a0] sm:$0xff] }
  0x38   : > { %1030 = vmatprep.mubr.f32.mxu0 %v2979_v5 }
  0x3a   : > { %2799 = vmatmul.mubr.msk.f32.gmra.mxu0 %vm731_vm0, %v290_v31  ;;  %v311_v31 = vld [vmem:[%s4839_s1 + $0xe0] sm:$0xff] }
  0x3b   : > { %558 = vperm.xlu0 %2906, %v376_v29   ;;  %553 = vperm.xlu1 %2907, %v375_v30   ;;  %v398_v29 = vld [vmem:[%s4840_s2 + $0x198] sm:$0xff]  ;;  %v397_v30 = vld [vmem:[%s4840_s2 + $0x190] sm:$0xff] }
  0x3c   : > { %1036 = vmatprep.mubr.f32.mxu0 %v2979_v5 }
  0x3e   : > { %2800 = vmatmul.mubr.msk.f32.gmra.mxu0 %vm731_vm0, %v291_v34  ;;  %v312_v34 = vld [vmem:[%s4839_s1 + $0xe8] sm:$0xff] }
  0x3f   : > { %548 = vperm.xlu0 %2906, %v374_v32   ;;  %543 = vperm.xlu1 %2907, %v373_v33   ;;  %v396_v32 = vld [vmem:[%s4840_s2 + $0x188] sm:$0xff]  ;;  %v395_v33 = vld [vmem:[%s4840_s2 + $0x180] sm:$0xff] }
  0x40   : > { %1042 = vmatprep.mubr.f32.mxu0 %v2979_v5 }
  0x42   : > { %2801 = vmatmul.mubr.msk.f32.gmra.mxu0 %vm731_vm0, %v292_v37  ;;  %v313_v37 = vld [vmem:[%s4839_s1 + $0xf0] sm:$0xff] }
  0x43   : > { %538 = vperm.xlu0 %2906, %v372_v35   ;;  %533 = vperm.xlu1 %2907, %v371_v36   ;;  %v1772_v35 = vld [vmem:[%s4842_s4 + $0x78] sm:$0xff]  ;;  %v1771_v36 = vld [vmem:[%s4842_s4 + $0x70] sm:$0xff] }
  0x44   : > { %1048 = vmatprep.mubr.f32.mxu0 %v2979_v5 }
  0x46   : > { %2802 = vmatmul.mubr.msk.f32.gmra.mxu0 %vm731_vm0, %v293_v40  ;;  %v314_v40 = vld [vmem:[%s4839_s1 + $0xf8] sm:$0xff] }
  0x47   : > { %528 = vperm.xlu0 %2906, %v370_v38   ;;  %523 = vperm.xlu1 %2907, %v369_v39   ;;  %v1770_v38 = vld [vmem:[%s4842_s4 + $0x68] sm:$0xff]  ;;  %v1769_v39 = vld [vmem:[%s4842_s4 + $0x60] sm:$0xff] }
  0x48   : > { %1054 = vmatprep.mubr.f32.mxu0 %v2979_v5 }
  0x4a   : > { %2803 = vmatmul.mubr.msk.f32.gmra.mxu0 %vm731_vm0, %v294_v43  ;;  %v315_v43 = vld [vmem:[%s4839_s1 + $0x100] sm:$0xff] }
  0x4b   : > { %518 = vperm.xlu0 %2906, %v368_v41   ;;  %513 = vperm.xlu1 %2907, %v367_v42   ;;  %v1768_v41 = vld [vmem:[%s4842_s4 + $0x58] sm:$0xff]  ;;  %v1767_v42 = vld [vmem:[%s4842_s4 + $0x50] sm:$0xff] }
  0x4c   : > { %1060 = vmatprep.mubr.f32.mxu0 %v2979_v5 }
  0x4e   : > { %2804 = vmatmul.mubr.msk.f32.gmra.mxu0 %vm731_vm0, %v295_v46  ;;  %v316_v46 = vld [vmem:[%s4839_s1 + $0x108] sm:$0xff] }
  0x4f   : > { %508 = vperm.xlu0 %2906, %v366_v44   ;;  %503 = vperm.xlu1 %2907, %v365_v45   ;;  %v1766_v44 = vld [vmem:[%s4842_s4 + $0x48] sm:$0xff]  ;;  %v1765_v45 = vld [vmem:[%s4842_s4 + $0x40] sm:$0xff] }
  0x50   : > { %1066 = vmatprep.mubr.f32.mxu0 %v2979_v5 }
  0x52   : > { %2805 = vmatmul.mubr.msk.f32.gmra.mxu0 %vm731_vm0, %v296_v49  ;;  %v317_v49 = vld [vmem:[%s4839_s1 + $0x110] sm:$0xff] }
  0x53   : > { %498 = vperm.xlu0 %2906, %v364_v47   ;;  %493 = vperm.xlu1 %2907, %v363_v48   ;;  %v1764_v47 = vld [vmem:[%s4842_s4 + $0x38] sm:$0xff]  ;;  %v1763_v48 = vld [vmem:[%s4842_s4 + $0x30] sm:$0xff] }
  0x54   : > { %1072 = vmatprep.mubr.f32.mxu0 %v2979_v5 }
  0x56   : > { %2806 = vmatmul.mubr.msk.f32.gmra.mxu0 %vm731_vm0, %v297_v52  ;;  %v318_v52 = vld [vmem:[%s4839_s1 + $0x118] sm:$0xff] }
  0x57   : > { %648 = vperm.xlu0 %2906, %v394_v50   ;;  %643 = vperm.xlu1 %2907, %v393_v51   ;;  %v1762_v50 = vld [vmem:[%s4842_s4 + $0x28] sm:$0xff]  ;;  %v1761_v51 = vld [vmem:[%s4842_s4 + $0x20] sm:$0xff] }
  0x58   : > { %1078 = vmatprep.mubr.f32.mxu0 %v2979_v5 }
  0x5a   : > { %2807 = vmatmul.mubr.msk.f32.gmra.mxu0 %vm731_vm0, %v298_v55  ;;  %v319_v55 = vld [vmem:[%s4839_s1 + $0x120] sm:$0xff] }
  0x5b   : > { %638 = vperm.xlu0 %2906, %v392_v53   ;;  %633 = vperm.xlu1 %2907, %v391_v54   ;;  %v1760_v53 = vld [vmem:[%s4842_s4 + $0x18] sm:$0xff]  ;;  %v1759_v54 = vld [vmem:[%s4842_s4 + $0x10] sm:$0xff] }
  0x5c   : > { %1084 = vmatprep.mubr.f32.mxu0 %v2979_v5 }
  0x5e   : > { %2808 = vmatmul.mubr.msk.f32.gmra.mxu0 %vm731_vm0, %v299_v58  ;;  %v320_v58 = vld [vmem:[%s4839_s1 + $0x128] sm:$0xff] }
  0x5f   : > { %628 = vperm.xlu0 %2906, %v390_v56   ;;  %623 = vperm.xlu1 %2907, %v389_v57   ;;  %v1758_v56 = vld [vmem:[%s4842_s4 + $0x8] sm:$0xff]  ;;  %v1757_v57 = vld [vmem:[%s4842_s4] sm:$0xff] }
  0x60   : > { %1090 = vmatprep.mubr.f32.mxu0 %v2979_v5 }
  0x62   : > { %2809 = vmatmul.mubr.msk.f32.gmra.mxu0 %vm731_vm0, %v300_v61  ;;  %v321_v61 = vld [vmem:[%s4839_s1 + $0x130] sm:$0xff] }
  0x63   : > { %618 = vperm.xlu0 %2906, %v388_v59   ;;  %613 = vperm.xlu1 %2907, %v387_v60   ;;  %v1788_v59 = vld [vmem:[%s4842_s4 + $0xf8] sm:$0xff]  ;;  %v1787_v60 = vld [vmem:[%s4842_s4 + $0xf0] sm:$0xff] }
  0x64   : > { %1096 = vmatprep.mubr.f32.mxu0 %v2979_v5 }
  0x66   : > { %2810 = vmatmul.mubr.msk.f32.gmra.mxu0 %vm731_vm0, %v301_v0  ;;  %v322_v0 = vld [vmem:[%s4839_s1 + $0x138] sm:$0xff] }
  0x67   : > { %608 = vperm.xlu0 %2906, %v386_v62   ;;  %603 = vperm.xlu1 %2907, %v385_v63   ;;  %v1786_v62 = vld [vmem:[%s4842_s4 + $0xe8] sm:$0xff]  ;;  %v1785_v63 = vld [vmem:[%s4842_s4 + $0xe0] sm:$0xff] }
  0x68   : > { %1102 = vmatprep.mubr.f32.mxu0 %v2979_v5 }
  0x6a   : > { %2811 = vmatmul.mubr.msk.f32.gmra.mxu0 %vm731_vm0, %v302_v3  ;;  %v323_v3 = vld [vmem:[%s4839_s1 + $0x140] sm:$0xff] }
  0x6b   : > { %598 = vperm.xlu0 %2906, %v384_v1   ;;  %593 = vperm.xlu1 %2907, %v383_v2   ;;  %v1784_v1 = vld [vmem:[%s4842_s4 + $0xd8] sm:$0xff]  ;;  %v1783_v2 = vld [vmem:[%s4842_s4 + $0xd0] sm:$0xff] }
  0x6c   : > { %1108 = vmatprep.mubr.f32.mxu0 %v2979_v5 }
  0x6e   : > { %2812 = vmatmul.mubr.msk.f32.gmra.mxu0 %vm731_vm0, %v303_v7  ;;  %v324_v7 = vld [vmem:[%s4839_s1 + $0x148] sm:$0xff] }
  0x6f   : > { %588 = vperm.xlu0 %2906, %v382_v4   ;;  %583 = vperm.xlu1 %2907, %v381_v6   ;;  %v1782_v4 = vld [vmem:[%s4842_s4 + $0xc8] sm:$0xff]  ;;  %v1781_v6 = vld [vmem:[%s4842_s4 + $0xc0] sm:$0xff] }
  0x70   : > { %1114 = vmatprep.mubr.f32.mxu0 %v2979_v5 }
  0x72   : > { %2813 = vmatmul.mubr.msk.f32.gmra.mxu0 %vm731_vm0, %v304_v10  ;;  %v325_v10 = vld [vmem:[%s4839_s1 + $0x150] sm:$0xff] }
  0x73   : > { %578 = vperm.xlu0 %2906, %v380_v8   ;;  %573 = vperm.xlu1 %2907, %v379_v9   ;;  %v1780_v8 = vld [vmem:[%s4842_s4 + $0xb8] sm:$0xff]  ;;  %v1779_v9 = vld [vmem:[%s4842_s4 + $0xb0] sm:$0xff] }
  0x74   : > { %1120 = vmatprep.mubr.f32.mxu0 %v2979_v5 }
  0x76   : > { %2814 = vmatmul.mubr.msk.f32.gmra.mxu0 %vm731_vm0, %v305_v13  ;;  %v326_v13 = vld [vmem:[%s4839_s1 + $0x158] sm:$0xff] }
  0x77   : > { %728 = vperm.xlu0 %2906, %v410_v11   ;;  %723 = vperm.xlu1 %2907, %v409_v12   ;;  %v1778_v11 = vld [vmem:[%s4842_s4 + $0xa8] sm:$0xff]  ;;  %v1777_v12 = vld [vmem:[%s4842_s4 + $0xa0] sm:$0xff] }
  0x78   : > { %1126 = vmatprep.mubr.f32.mxu0 %v2979_v5 }
  0x7a   : > { %2815 = vmatmul.mubr.msk.f32.gmra.mxu0 %vm731_vm0, %v306_v16  ;;  %v327_v16 = vld [vmem:[%s4839_s1 + $0x160] sm:$0xff] }
  0x7b   : > { %718 = vperm.xlu0 %2906, %v408_v14   ;;  %713 = vperm.xlu1 %2907, %v407_v15   ;;  %v1776_v14 = vld [vmem:[%s4842_s4 + $0x98] sm:$0xff]  ;;  %v1775_v15 = vld [vmem:[%s4842_s4 + $0x90] sm:$0xff] }
  0x7c   : > { %1132 = vmatprep.mubr.f32.mxu0 %v2979_v5 }
  0x7e   : > { %2816 = vmatmul.mubr.msk.f32.gmra.mxu0 %vm731_vm0, %v307_v19  ;;  %v328_v19 = vld [vmem:[%s4839_s1 + $0x168] sm:$0xff] }
  0x7f   : > { %708 = vperm.xlu0 %2906, %v406_v17   ;;  %703 = vperm.xlu1 %2907, %v405_v18   ;;  %v1774_v17 = vld [vmem:[%s4842_s4 + $0x88] sm:$0xff]  ;;  %v1773_v18 = vld [vmem:[%s4842_s4 + $0x80] sm:$0xff] }
  0x80   : > { %1138 = vmatprep.mubr.f32.mxu0 %v2979_v5 }
  0x82   : > { %2817 = vmatmul.mubr.msk.f32.gmra.mxu0 %vm731_vm0, %v308_v22  ;;  %v331_v22 = vld [vmem:[%s4839_s1 + $0x180] sm:$0xff] }
  0x83   : > { %698 = vperm.xlu0 %2906, %v404_v20   ;;  %693 = vperm.xlu1 %2907, %v403_v21   ;;  %v329_v20 = vld [vmem:[%s4839_s1 + $0x170] sm:$0xff]  ;;  %v330_v21 = vld [vmem:[%s4839_s1 + $0x178] sm:$0xff] }
  0x84   : > { %1144 = vmatprep.mubr.f32.mxu0 %v2979_v5 }
  0x86   : > { %2818 = vmatmul.mubr.msk.f32.gmra.mxu0 %vm731_vm0, %v309_v25 }
  0x87   : > { %688 = vperm.xlu0 %2906, %v402_v23   ;;  %683 = vperm.xlu1 %2907, %v401_v24   ;;  %v332_v24 = vld [vmem:[%s4839_s1 + $0x188] sm:$0xff] }
  0x88   : > { %1150 = vmatprep.mubr.f32.mxu0 %v2979_v5 }
  0x8a   : > { %2819 = vmatmul.mubr.msk.f32.gmra.mxu0 %vm731_vm0, %v310_v28 }
  0x8b   : > { %678 = vperm.xlu0 %2906, %v400_v26   ;;  %673 = vperm.xlu1 %2907, %v399_v27   ;;  %v333_v27 = vld [vmem:[%s4839_s1 + $0x190] sm:$0xff] }
  0x8c   : > { %1156 = vmatprep.mubr.f32.mxu0 %v2979_v5 }
  0x8e   : > { %2820 = vmatmul.mubr.msk.f32.gmra.mxu0 %vm731_vm0, %v311_v31 }
  0x8f   : > { %668 = vperm.xlu0 %2906, %v398_v29   ;;  %663 = vperm.xlu1 %2907, %v397_v30   ;;  %v334_v30 = vld [vmem:[%s4839_s1 + $0x198] sm:$0xff] }
  0x90   : > { %1162 = vmatprep.mubr.f32.mxu0 %v2979_v5 }
  0x92   : > { %2821 = vmatmul.mubr.msk.f32.gmra.mxu0 %vm731_vm0, %v312_v34 }
  0x93   : > { %658 = vperm.xlu0 %2906, %v396_v32   ;;  %653 = vperm.xlu1 %2907, %v395_v33   ;;  %v335_v33 = vld [vmem:[%s4839_s1 + $0x1a0] sm:$0xff] }
  0x94   : > { %1168 = vmatprep.mubr.f32.mxu0 %v2979_v5 }
  0x96   : > { %2822 = vmatmul.mubr.msk.f32.gmra.mxu0 %vm731_vm0, %v313_v37 }
  0x97   : > { %1866 = vperm.xlu0 %2906, %v1772_v35   ;;  %1861 = vperm.xlu1 %2907, %v1771_v36   ;;  %v336_v36 = vld [vmem:[%s4839_s1 + $0x1a8] sm:$0xff] }
  0x98   : > { %1174 = vmatprep.mubr.f32.mxu0 %v2979_v5 }
  0x9a   : > { %2823 = vmatmul.mubr.msk.f32.gmra.mxu0 %vm731_vm0, %v314_v40 }
  0x9b   : > { %1856 = vperm.xlu0 %2906, %v1770_v38   ;;  %1851 = vperm.xlu1 %2907, %v1769_v39   ;;  %v337_v39 = vld [vmem:[%s4839_s1 + $0x1b0] sm:$0xff] }
  0x9c   : > { %1180 = vmatprep.mubr.f32.mxu0 %v2979_v5 }
  0x9e   : > { %2824 = vmatmul.mubr.msk.f32.gmra.mxu0 %vm731_vm0, %v315_v43 }
  0x9f   : > { %1846 = vperm.xlu0 %2906, %v1768_v41   ;;  %1841 = vperm.xlu1 %2907, %v1767_v42   ;;  %v338_v42 = vld [vmem:[%s4839_s1 + $0x1b8] sm:$0xff] }
  0xa0   : > { %1186 = vmatprep.mubr.f32.mxu0 %v2979_v5 }
  0xa2   : > { %2825 = vmatmul.mubr.msk.f32.gmra.mxu0 %vm731_vm0, %v316_v46 }
  0xa3   : > { %1836 = vperm.xlu0 %2906, %v1766_v44   ;;  %1831 = vperm.xlu1 %2907, %v1765_v45   ;;  %v339_v45 = vld [vmem:[%s4839_s1 + $0x1c0] sm:$0xff] }
  0xa4   : > { %1192 = vmatprep.mubr.f32.mxu0 %v2979_v5 }
  0xa6   : > { %2826 = vmatmul.mubr.msk.f32.gmra.mxu0 %vm731_vm0, %v317_v49 }
  0xa7   : > { %1826 = vperm.xlu0 %2906, %v1764_v47   ;;  %1821 = vperm.xlu1 %2907, %v1763_v48   ;;  %v340_v48 = vld [vmem:[%s4839_s1 + $0x1c8] sm:$0xff] }
  0xa8   : > { %1198 = vmatprep.mubr.f32.mxu0 %v2979_v5 }
  0xaa   : > { %2827 = vmatmul.mubr.msk.f32.gmra.mxu0 %vm731_vm0, %v318_v52  ;;  %v341_v52 = vld [vmem:[%s4839_s1 + $0x1d0] sm:$0xff] }
  0xab   : > { %1816 = vperm.xlu0 %2906, %v1762_v50   ;;  %1811 = vperm.xlu1 %2907, %v1761_v51   ;;  %v1630_v50 = vld [vmem:[%s4841_s3 + $0x8] sm:$0xff] }
  0xac   : > { %1204 = vmatprep.mubr.f32.mxu0 %v2979_v5  ;;  %2013 = vmatprep.mubr.f32.mxu1 %v1630_v50 }
  0xae   : > { %2828 = vmatmul.mubr.msk.f32.gmra.mxu0 %vm731_vm0, %v319_v55  ;;  %v342_v55 = vld [vmem:[%s4839_s1 + $0x1d8] sm:$0xff] }
  0xaf   : > { %1806 = vperm.xlu0 %2906, %v1760_v53   ;;  %1801 = vperm.xlu1 %2907, %v1759_v54  }
  0xb0   : > { %1210 = vmatprep.mubr.f32.mxu0 %v2979_v5 }
  0xb2   : > { %2829 = vmatmul.mubr.msk.f32.gmra.mxu0 %vm731_vm0, %v320_v58 }
  0xb3   : > { %1796 = vperm.xlu0 %2906, %v1758_v56   ;;  %1791 = vperm.xlu1 %2907, %v1757_v57   ;;  %v489_v57 = vpop.permute.xlu0 %488 }
  0xb4   : > { %1216 = vmatprep.mubr.f32.mxu0 %v2979_v5 }
  0xb6   : > { %2830 = vmatmul.mubr.msk.f32.gmra.mxu0 %vm731_vm0, %v321_v61 }
  0xb7   : > { %1946 = vperm.xlu0 %2906, %v1788_v59   ;;  %1941 = vperm.xlu1 %2907, %v1787_v60   ;;  %v343_v59 = vld [vmem:[%s4839_s1 + $0x1e0] sm:$0xff]  ;;  %v479_v60 = vpop.permute.xlu1 %478 }
  0xb8   : > { %1222 = vmatprep.mubr.f32.mxu0 %v2979_v5 }
  0xba   : > { %2831 = vmatmul.mubr.msk.f32.gmra.mxu0 %vm731_vm0, %v322_v0  ;;  %v484_v0 = vpop.permute.xlu0 %483 }
  0xbb   : > { %1936 = vperm.xlu0 %2906, %v1786_v62   ;;  %1931 = vperm.xlu1 %2907, %v1785_v63   ;;  %v344_v63 = vld [vmem:[%s4839_s1 + $0x1e8] sm:$0xff] }
  0xbc   : > { %1228 = vmatprep.mubr.f32.mxu0 %v2979_v5 }
  0xbe   : > { %2832 = vmatmul.mubr.msk.f32.gmra.mxu0 %vm731_vm0, %v323_v3 }
  0xbf   : > { %1926 = vperm.xlu0 %2906, %v1784_v1   ;;  %1921 = vperm.xlu1 %2907, %v1783_v2   ;;  %v474_v2 = vpop.permute.xlu1 %473 }
  0xc0   : > { %1234 = vmatprep.mubr.f32.mxu0 %v2979_v5 }
  0xc2   : > { %2833 = vmatmul.mubr.msk.f32.gmra.mxu0 %vm731_vm0, %v324_v7  ;;  %v469_v7 = vpop.permute.xlu0 %468 }
  0xc3   : > { %1916 = vperm.xlu0 %2906, %v1782_v4   ;;  %1911 = vperm.xlu1 %2907, %v1781_v6   ;;  %v345_v4 = vld [vmem:[%s4839_s1 + $0x1f0] sm:$0xff] }
  0xc4   : > { %1240 = vmatprep.mubr.f32.mxu0 %v2979_v5 }
  0xc6   : > { %2834 = vmatmul.mubr.msk.f32.gmra.mxu0 %vm731_vm0, %v325_v10  ;;  %v464_v10 = vpop.permute.xlu1 %463 }
  0xc7   : > { %1906 = vperm.xlu0 %2906, %v1780_v8   ;;  %1901 = vperm.xlu1 %2907, %v1779_v9   ;;  %v346_v9 = vld [vmem:[%s4839_s1 + $0x1f8] sm:$0xff] }
  0xc8   : > { %1246 = vmatprep.mubr.f32.mxu0 %v2979_v5 }
  0xca   : > { %2835 = vmatmul.mubr.msk.f32.gmra.mxu0 %vm731_vm0, %v326_v13 }
  0xcb   : > { %1896 = vperm.xlu0 %2906, %v1778_v11   ;;  %1891 = vperm.xlu1 %2907, %v1777_v12  }
  0xcc   : > { %1252 = vmatprep.mubr.f32.mxu0 %v2979_v5 }
  0xce   : > { %2836 = vmatmul.mubr.msk.f32.gmra.mxu0 %vm731_vm0, %v327_v16 }
  0xcf   : > { %1886 = vperm.xlu0 %2906, %v1776_v14   ;;  %1881 = vperm.xlu1 %2907, %v1775_v15   ;;  %v459_v15 = vpop.permute.xlu0 %458 }
  0xd0   : > { %1258 = vmatprep.mubr.f32.mxu0 %v2979_v5 }
  0xd2   : > { %2837 = vmatmul.mubr.msk.f32.gmra.mxu0 %vm731_vm0, %v328_v19 }
  0xd3   : > { %1876 = vperm.xlu0 %2906, %v1774_v17   ;;  %1871 = vperm.xlu1 %2907, %v1773_v18   ;;  %v449_v50 = vpop.permute.xlu0 %448 }
  0xd4   : > { %1264 = vmatprep.mubr.f32.mxu0 %v2979_v5 }
  0xd6   : > { %2838 = vmatmul.mubr.msk.f32.gmra.mxu0 %vm731_vm0, %v329_v20  ;;  %v454_v20 = vpop.permute.xlu1 %453 }
  0xd7   : > { %1270 = vmatprep.mubr.f32.mxu0 %v2979_v5 }
  0xda   : > { %2839 = vmatmul.mubr.msk.f32.gmra.mxu0 %vm731_vm0, %v330_v21 }
  0xdb   : > { %1276 = vmatprep.mubr.f32.mxu0 %v2979_v5 }
  0xde   : > { %v3609_v23 = vpop.f32.mrf.mxu0  ;;  %2840 = vmatmul.mubr.msk.f32.gmra.mxu0 %vm731_vm0, %v331_v22 }
  0xdf   : > { %1282 = vmatprep.mubr.f32.mxu0 %v2979_v5 }
  0xe0   : > { %v3616_v25 = vpop.f32.mrf.mxu0 }
  0xe2   : > { %v3618_v26 = vpop.f32.mrf.mxu0  ;;  %2841 = vmatmul.mubr.msk.f32.gmra.mxu0 %vm731_vm0, %v332_v24 }
  0xe3   : > { %1288 = vmatprep.mubr.f32.mxu0 %v2979_v5 }
  0xe4   : > { %v3625_v28 = vpop.f32.mrf.mxu0 }
  0xe6   : > { %v3627_v29 = vpop.f32.mrf.mxu0  ;;  %2842 = vmatmul.mubr.msk.f32.gmra.mxu0 %vm731_vm0, %v333_v27 }
  0xe7   : > { %1294 = vmatprep.mubr.f32.mxu0 %v2979_v5 }
  0xe8   : > { %v3634_v31 = vpop.f32.mrf.mxu0 }
  0xea   : > { %v3636_v32 = vpop.f32.mrf.mxu0  ;;  %2843 = vmatmul.mubr.msk.f32.gmra.mxu0 %vm731_vm0, %v334_v30 }
  0xeb   : > { %1300 = vmatprep.mubr.f32.mxu0 %v2979_v5 }
  0xec   : > { %v3643_v34 = vpop.f32.mrf.mxu0 }
  0xee   : > { %v3645_v35 = vpop.f32.mrf.mxu0  ;;  %2844 = vmatmul.mubr.msk.f32.gmra.mxu0 %vm731_vm0, %v335_v33 }
  0xef   : > { %1306 = vmatprep.mubr.f32.mxu0 %v2979_v5 }
  0xf0   : > { %v3652_v37 = vpop.f32.mrf.mxu0 }
  0xf2   : > { %v3654_v38 = vpop.f32.mrf.mxu0  ;;  %2845 = vmatmul.mubr.msk.f32.gmra.mxu0 %vm731_vm0, %v336_v36 }
  0xf3   : > { %1312 = vmatprep.mubr.f32.mxu0 %v2979_v5 }
  0xf4   : > { %v3661_v40 = vpop.f32.mrf.mxu0 }
  0xf6   : > { %v3663_v41 = vpop.f32.mrf.mxu0  ;;  %2846 = vmatmul.mubr.msk.f32.gmra.mxu0 %vm731_vm0, %v337_v39 }
  0xf7   : > { %1318 = vmatprep.mubr.f32.mxu0 %v2979_v5 }
  0xf8   : > { %v3670_v43 = vpop.f32.mrf.mxu0 }
  0xfa   : > { %v3672_v44 = vpop.f32.mrf.mxu0  ;;  %2847 = vmatmul.mubr.msk.f32.gmra.mxu0 %vm731_vm0, %v338_v42 }
  0xfb   : > { %1324 = vmatprep.mubr.f32.mxu0 %v2979_v5 }
  0xfc   : > { %v3679_v46 = vpop.f32.mrf.mxu0 }
  0xfe   : > { %v3681_v47 = vpop.f32.mrf.mxu0  ;;  %2848 = vmatmul.mubr.msk.f32.gmra.mxu0 %vm731_vm0, %v339_v45 }
  0xff   : > { %1330 = vmatprep.mubr.f32.mxu0 %v2979_v5 }
 0x100   : > { %v3688_v49 = vpop.f32.mrf.mxu0 }
 0x102   : > { %v3693_v51 = vpop.f32.mrf.mxu0  ;;  %2849 = vmatmul.mubr.msk.f32.gmra.mxu0 %vm731_vm0, %v340_v48 }
 0x103   : > { %1336 = vmatprep.mubr.f32.mxu0 %v2979_v5 }
 0x104   : > { %v3700_v53 = vpop.f32.mrf.mxu0 }
 0x106   : > { %v3702_v54 = vpop.f32.mrf.mxu0  ;;  %2850 = vmatmul.mubr.msk.f32.gmra.mxu0 %vm731_vm0, %v341_v52 }
 0x107   : > { %1342 = vmatprep.mubr.f32.mxu0 %v2979_v5 }
 0x108   : > { %v1052_v56 = vpop.f32.mrf.mxu0 }
 0x10a   : > { %v1056_v58 = vpop.f32.mrf.mxu0  ;;  %2851 = vmatmul.mubr.msk.f32.gmra.mxu0 %vm731_vm0, %v342_v55 }
 0x10b   : > { %1348 = vmatprep.mubr.f32.mxu0 %v2979_v5  ;;  %v1057_v52 = vadd.f32 %v1056_v58, %v469_v7 }
 0x10c   : > { %v1058_v61 = vpop.f32.mrf.mxu0 }
 0x10d   : > { %v1059_v42 = vadd.f32 %v1058_v61, %v469_v7  ;;  %v1047_v61 = vadd.f32 %v3700_v53, %v459_v15  ;;  %v1045_v7 = vadd.f32 %v3693_v51, %v459_v15  ;;  %v1035_v51 = vadd.f32 %v3679_v46, %v449_v50 }
 0x10e   : > { %v1062_v62 = vpop.f32.mrf.mxu0  ;;  %2852 = vmatmul.mubr.msk.f32.gmra.mxu0 %vm731_vm0, %v343_v59 }
 0x10f   : > { %1354 = vmatprep.mubr.f32.mxu0 %v2979_v5  ;;  %v1063_v33 = vadd.f32 %v1062_v62, %v474_v2  ;;  %v1392_v15 = vmul.f32 0.2, %v1047_v61 }
 0x110   : > { %v1064_v1 = vpop.f32.mrf.mxu0 }
 0x111   : > { %v1065_v24 = vadd.f32 %v1064_v1, %v474_v2  ;;  %v444_v1 = vpop.permute.xlu1 %443  ;;  %v1397_v62 = vmul.f32 0.2, %v1063_v33 }
 0x112   : > { %v1068_v3 = vpop.f32.mrf.mxu0  ;;  %2853 = vmatmul.mubr.msk.f32.gmra.mxu0 %vm731_vm0, %v344_v63 }
 0x113   : > { %1360 = vmatprep.mubr.f32.mxu0 %v2979_v5  ;;  %v1069_v21 = vadd.f32 %v1068_v3, %v479_v60  ;;  %v1398_v63 = vmul.f32 0.2, %v1065_v24  ;;  %v1051_v3 = vadd.f32 %v3702_v54, %v464_v10  ;;  %v1525_v53 = vmax.f32 %v1063_v33, %v1397_v62 }
 0x114   : > { %v1070_v6 = vpop.f32.mrf.mxu0 }
 0x115   : > { %v1071_v18 = vadd.f32 %v1070_v6, %v479_v60  ;;  %v1399_v55 = vmul.f32 0.2, %v1069_v21  ;;  %v1053_v60 = vadd.f32 %v1052_v56, %v464_v10  ;;  %v1396_v6 = vmul.f32 0.2, %v1059_v42 }
 0x116   : > { %v1074_v8 = vpop.f32.mrf.mxu0  ;;  %2854 = vmatmul.mubr.msk.f32.gmra.mxu0 %vm731_vm0, %v345_v4  ;;  %v1526_v10 = vmax.f32 %v1065_v24, %v1398_v63 }
 0x117   : > { %1366 = vmatprep.mubr.f32.mxu0 %v2979_v5  ;;  %v1075_v16 = vadd.f32 %v1074_v8, %v484_v0  ;;  %v1400_v45 = vmul.f32 0.2, %v1071_v18  ;;  %v1395_v8 = vmul.f32 0.2, %v1057_v52  ;;  %v1527_v56 = vmax.f32 %v1069_v21, %v1399_v55 }
 0x118   : > { %v1076_v11 = vpop.f32.mrf.mxu0  ;;  %v1394_v54 = vmul.f32 0.2, %v1053_v60 }
 0x119   : > { %v1077_v13 = vadd.f32 %v1076_v11, %v484_v0  ;;  %v1401_v36 = vmul.f32 0.2, %v1075_v16  ;;  %v1528_v58 = vmax.f32 %v1071_v18, %v1400_v45  ;;  %v1041_v11 = vadd.f32 %v3688_v49, %v454_v20  ;;  %v434_v18 = vpop.permute.xlu1 %433 }
 0x11a   : > { %v1080_v12 = vpop.f32.mrf.mxu0  ;;  %2855 = vmatmul.mubr.msk.f32.gmra.mxu0 %vm731_vm0, %v346_v9  ;;  %v1391_v49 = vmul.f32 0.2, %v1045_v7  ;;  %v1523_v21 = vmax.f32 %v1057_v52, %v1395_v8  ;;  %v1522_v24 = vmax.f32 %v1053_v60, %v1394_v54  ;;  %v1015_v63 = vadd.f32 %v3645_v35, %v434_v18 }
 0x11b   : > { %v1081_v14 = vadd.f32 %v1080_v12, %v489_v57  ;;  %v1402_v27 = vmul.f32 0.2, %v1077_v13  ;;  %v1529_v2 = vmax.f32 %v1075_v16, %v1401_v36  ;;  %v439_v12 = vpop.permute.xlu0 %438 }
 0x11c   : > { %v1082_v17 = vpop.f32.mrf.mxu0  ;;  %v1023_v36 = vadd.f32 %v3661_v40, %v439_v12 }
 0x11d   : > { %v1083_v19 = vadd.f32 %v1082_v17, %v489_v57  ;;  %v1403_v22 = vmul.f32 0.2, %v1081_v14  ;;  %v1530_v0 = vmax.f32 %v1077_v13, %v1402_v27  ;;  %v1039_v13 = vadd.f32 %v3681_v47, %v454_v20  ;;  %v424_v60 = vpop.permute.xlu1 %423 }
 0x11e   : > { %v3730_v5 = vpop.f32.mrf.mxu0  ;;  %v1524_v17 = vmax.f32 %v1059_v42, %v1396_v6  ;;  %v1029_v47 = vadd.f32 %v3670_v43, %v444_v1  ;;  %v1390_v20 = vmul.f32 0.2, %v1041_v11  ;;  %v1027_v27 = vadd.f32 %v3663_v41, %v444_v1 }
 0x11f   : > { %v1404_v30 = vmul.f32 0.2, %v1083_v19  ;;  %v1531_v57 = vmax.f32 %v1081_v14, %v1403_v22  ;;  %v1393_v14 = vmul.f32 0.2, %v1051_v3  ;;  %v1520_v42 = vmax.f32 %v1047_v61, %v1392_v15  ;;  %v429_v45 = vpop.permute.xlu0 %428 }
 0x120   : > { %v3732_v39 = vpop.f32.mrf.mxu0  ;;  %v1519_v43 = vmax.f32 %v1045_v7, %v1391_v49  ;;  %v1017_v41 = vadd.f32 %v3652_v37, %v434_v18  ;;  %v1386_v55 = vmul.f32 0.2, %v1029_v47  ;;  %v1385_v40 = vmul.f32 0.2, %v1027_v27 }
 0x121   : > { %v1532_v48 = vmax.f32 %v1083_v19, %v1404_v30  ;;  %v1033_v19 = vadd.f32 %v3672_v44, %v449_v50  ;;  %v1389_v30 = vmul.f32 0.2, %v1039_v13  ;;  %v1521_v46 = vmax.f32 %v1051_v3, %v1393_v14 }
 0x122   : > { %v3734_v59 = vpop.f32.mrf.mxu0  ;;  %v1388_v44 = vmul.f32 0.2, %v1035_v51  ;;  %v1384_v3 = vmul.f32 0.2, %v1023_v36  ;;  %v1382_v35 = vmul.f32 0.2, %v1017_v41  ;;  %v1514_v7 = vmax.f32 %v1029_v47, %v1386_v55 }
 0x123   : > { %1949 = vmatprep.subr.mxu1 %v1532_v48  ;;  %v1021_v48 = vadd.f32 %v3654_v38, %v439_v12  ;;  %v1387_v50 = vmul.f32 0.2, %v1033_v19  ;;  %v1011_v38 = vadd.f32 %v3643_v34, %v429_v45  ;;  %v419_v8 = vpop.permute.xlu0 %418  ;;  %v1513_v34 = vmax.f32 %v1027_v27, %v1385_v40 }
 0x124   : > { %v3737_v4 = vpop.f32.mrf.mxu0  ;;  %1950 = vmatpush1.msra.mxu1 %v1531_v57  ;;  %v1518_v57 = vmax.f32 %v1041_v11, %v1390_v20  ;;  %v1516_v62 = vmax.f32 %v1035_v51, %v1388_v44  ;;  %v1381_v11 = vmul.f32 0.2, %v1015_v63  ;;  %v1512_v12 = vmax.f32 %v1023_v36, %v1384_v3 }
 0x125   : > { %1951 = vmatprep.subr.mxu1 %v1530_v0  ;;  %v1517_v0 = vmax.f32 %v1039_v13, %v1389_v30  ;;  %v1383_v61 = vmul.f32 0.2, %v1021_v48  ;;  %v1515_v37 = vmax.f32 %v1033_v19, %v1387_v50  ;;  %v414_v13 = vpop.permute.xlu1 %413  ;;  %v997_v14 = vadd.f32 %v3618_v26, %v419_v8 }
 0x126   : > { %v3741_v9 = vpop.f32.mrf.mxu0  ;;  %1952 = vmatpush1.msra.mxu1 %v1529_v2  ;;  %v1009_v2 = vadd.f32 %v3636_v32, %v429_v45  ;;  %v999_v32 = vadd.f32 %v3625_v28, %v419_v8  ;;  %v991_v18 = vadd.f32 %v3609_v23, %v414_v13  ;;  %v1509_v28 = vmax.f32 %v1015_v63, %v1381_v11 }
 0x127   : > { %1953 = vmatprep.subr.mxu1 %v1528_v58  ;;  %v1005_v58 = vadd.f32 %v3634_v31, %v424_v60  ;;  %v1375_v26 = vmul.f32 0.2, %v997_v14 }
 0x128   : > { %v3745_v16 = vpop.f32.mrf.mxu0  ;;  %1954 = vmatpush1.msra.mxu1 %v1527_v56  ;;  %v1003_v56 = vadd.f32 %v3627_v29, %v424_v60  ;;  %v1379_v31 = vmul.f32 0.2, %v1009_v2  ;;  %v993_v29 = vadd.f32 %v3616_v25, %v414_v13  ;;  %v1373_v30 = vmul.f32 0.2, %v991_v18  ;;  %v569_v60 = vpop.permute.xlu0 %568 }
 0x129   : > { %1955 = vmatprep.subr.mxu1 %v1526_v10  ;;  %v1380_v10 = vmul.f32 0.2, %v1011_v38  ;;  %v1378_v15 = vmul.f32 0.2, %v1005_v58  ;;  %v1503_v44 = vmax.f32 %v997_v14, %v1375_v26  ;;  %v564_v40 = vpop.permute.xlu1 %563 }
 0x12a   : > { %v3749_v22 = vpop.f32.mrf.mxu0  ;;  %1956 = vmatpush1.msra.mxu1 %v1525_v53  ;;  %v1511_v53 = vmax.f32 %v1021_v48, %v1383_v61  ;;  %v1377_v19 = vmul.f32 0.2, %v1003_v56  ;;  %v1507_v20 = vmax.f32 %v1009_v2, %v1379_v31  ;;  %v1374_v27 = vmul.f32 0.2, %v993_v29 }
 0x12b   : > { %1957 = vmatprep.subr.mxu1 %v1524_v17  ;;  %v1510_v17 = vmax.f32 %v1017_v41, %v1382_v35  ;;  %v1508_v47 = vmax.f32 %v1011_v38, %v1380_v10  ;;  %v1506_v25 = vmax.f32 %v1005_v58, %v1378_v15  ;;  %v1501_v48 = vmax.f32 %v991_v18, %v1373_v30 }
 0x12c   : > { %v3753_v33 = vpop.f32.mrf.mxu0  ;;  %1958 = vmatpush1.msra.mxu1 %v1523_v21  ;;  %v1376_v21 = vmul.f32 0.2, %v999_v32  ;;  %v1502_v45 = vmax.f32 %v993_v29, %v1374_v27  ;;  %v559_v3 = vpop.permute.xlu0 %558 }
 0x12d   : > { %1959 = vmatprep.subr.mxu1 %v1522_v24  ;;  %v554_v2 = vpop.permute.xlu1 %553 }
 0x12e   : > { %v3757_v52 = vpop.f32.mrf.mxu0  ;;  %1960 = vmatpush1.msra.mxu1 %v1521_v46  ;;  %v1505_v46 = vmax.f32 %v1003_v56, %v1377_v19  ;;  %v1504_v23 = vmax.f32 %v999_v32, %v1376_v21 }
 0x12f   : > { %1961 = vmatprep.subr.mxu1 %v1520_v42 }
 0x130   : > { %v3761_v1 = vpop.f32.mrf.mxu0  ;;  %1962 = vmatpush1.msra.mxu1 %v1519_v43  ;;  %v549_v58 = vpop.permute.xlu0 %548 }
 0x131   : > { %1963 = vmatprep.subr.mxu1 %v1518_v57 }
 0x132   : > { %v3765_v6 = vpop.f32.mrf.mxu0  ;;  %1964 = vmatpush1.msra.mxu1 %v1517_v0 }
 0x133   : > { %1965 = vmatprep.subr.mxu1 %v1516_v62 }
 0x134   : > { %v3769_v54 = vpop.f32.mrf.mxu0  ;;  %1966 = vmatpush1.msra.mxu1 %v1515_v37  ;;  %v539_v32 = vpop.permute.xlu0 %538 }
 0x135   : > { %1967 = vmatprep.subr.mxu1 %v1514_v7  ;;  %v544_v7 = vpop.permute.xlu1 %543 }
 0x136   : > { %v3773_v51 = vpop.f32.mrf.mxu0  ;;  %1968 = vmatpush1.msra.mxu1 %v1513_v34 }
 0x137   : > { %1969 = vmatprep.subr.mxu1 %v1512_v12 }
 0x138   : > { %v3777_v49 = vpop.f32.mrf.mxu0  ;;  %1970 = vmatpush1.msra.mxu1 %v1511_v53 }
 0x139   : > { %1971 = vmatprep.subr.mxu1 %v1510_v17  ;;  %v534_v31 = vpop.permute.xlu1 %533 }
 0x13a   : > { %v3779_v24 = vpop.f32.mrf.mxu0  ;;  %1972 = vmatpush1.msra.mxu1 %v1509_v28 }
 0x13b   : > { %1973 = vmatprep.subr.mxu1 %v1508_v47 }
 0x13c   : > { %v3781_v36 = vpop.f32.mrf.mxu0  ;;  %1974 = vmatpush1.msra.mxu1 %v1507_v20 }
 0x13d   : > { %1975 = vmatprep.subr.mxu1 %v1506_v25  ;;  %v529_v25 = vpop.permute.xlu0 %528 }
 0x13e   : > { %v3783_v42 = vpop.f32.mrf.mxu0  ;;  %1976 = vmatpush1.msra.mxu1 %v1505_v46 }
 0x13f   : > { %1977 = vmatprep.subr.mxu1 %v1504_v23 }
 0x140   : > { %v3785_v50 = vpop.f32.mrf.mxu0  ;;  %1978 = vmatpush1.msra.mxu1 %v1503_v44 }
 0x141   : > { %1979 = vmatprep.subr.mxu1 %v1502_v45 }
 0x142   : > { %v1140_v43 = vpop.f32.mrf.mxu0  ;;  %1980 = vmatpush1.msra.mxu1 %v1501_v48 }
 0x144   : > { %v1142_v41 = vpop.f32.mrf.mxu0 }
 0x146   : > { %v1146_v55 = vpop.f32.mrf.mxu0 }
 0x148   : > { %v1148_v57 = vpop.f32.mrf.mxu0 }
 0x149   : > { %v1149_v45 = vadd.f32 %v1148_v57, %v544_v7  ;;  %v1137_v57 = vadd.f32 %v3785_v50, %v534_v31 }
 0x14a   : > { %v1152_v63 = vpop.f32.mrf.mxu0 }
 0x14b   : > { %v1153_v30 = vadd.f32 %v1152_v63, %v549_v58  ;;  %v1141_v63 = vadd.f32 %v1140_v43, %v539_v32  ;;  %v1131_v43 = vadd.f32 %v3781_v36, %v529_v25 }
 0x14c   : > { %v1154_v0 = vpop.f32.mrf.mxu0 }
 0x14d   : > { %v1155_v26 = vadd.f32 %v1154_v0, %v549_v58  ;;  %v1143_v0 = vadd.f32 %v1142_v41, %v539_v32  ;;  %v1427_v58 = vmul.f32 0.2, %v1153_v30  ;;  %v1423_v50 = vmul.f32 0.2, %v1141_v63 }
 0x14e   : > { %v1158_v38 = vpop.f32.mrf.mxu0 }
 0x14f   : > { %v1159_v28 = vadd.f32 %v1158_v38, %v554_v2  ;;  %v1424_v32 = vmul.f32 0.2, %v1143_v0 }
 0x150   : > { %v1160_v62 = vpop.f32.mrf.mxu0 }
 0x151   : > { %v1161_v17 = vadd.f32 %v1160_v62, %v554_v2  ;;  %v1429_v62 = vmul.f32 0.2, %v1159_v28 }
 0x152   : > { %v1164_v61 = vpop.f32.mrf.mxu0 }
 0x153   : > { %v1165_v53 = vadd.f32 %v1164_v61, %v559_v3  ;;  %v1430_v48 = vmul.f32 0.2, %v1161_v17  ;;  %v1428_v61 = vmul.f32 0.2, %v1155_v26 }
 0x154   : > { %v1166_v37 = vpop.f32.mrf.mxu0 }
 0x155   : > { %v1167_v13 = vadd.f32 %v1166_v37, %v559_v3  ;;  %v1431_v46 = vmul.f32 0.2, %v1165_v53  ;;  %v1147_v3 = vadd.f32 %v1146_v55, %v544_v7  ;;  %v519_v55 = vpop.permute.xlu0 %518  ;;  %v1135_v7 = vadd.f32 %v3783_v42, %v534_v31 }
 0x156   : > { %v1170_v35 = vpop.f32.mrf.mxu0  ;;  %v1422_v31 = vmul.f32 0.2, %v1137_v57 }
 0x157   : > { %v1171_v10 = vadd.f32 %v1170_v35, %v564_v40  ;;  %v1432_v20 = vmul.f32 0.2, %v1167_v13  ;;  %v1559_v35 = vmax.f32 %v1165_v53, %v1431_v46  ;;  %v1555_v53 = vmax.f32 %v1153_v30, %v1427_v58 }
 0x158   : > { %v1172_v8 = vpop.f32.mrf.mxu0 }
 0x159   : > { %v1173_v11 = vadd.f32 %v1172_v8, %v564_v40  ;;  %v1433_v21 = vmul.f32 0.2, %v1171_v10  ;;  %v524_v40 = vpop.permute.xlu1 %523  ;;  %v1560_v37 = vmax.f32 %v1167_v13, %v1432_v20  ;;  %v509_v20 = vpop.permute.xlu0 %508 }
 0x15a   : > { %v1176_v56 = vpop.f32.mrf.mxu0  ;;  %v1125_v42 = vadd.f32 %v3777_v49, %v524_v40  ;;  %v1551_v49 = vmax.f32 %v1141_v63, %v1423_v50 }
 0x15b   : > { %v1177_v34 = vadd.f32 %v1176_v56, %v569_v60  ;;  %v1434_v18 = vmul.f32 0.2, %v1173_v11  ;;  %v1561_v38 = vmax.f32 %v1171_v10, %v1433_v21  ;;  %v1426_v56 = vmul.f32 0.2, %v1149_v45 }
 0x15c   : > { %v1178_v12 = vpop.f32.mrf.mxu0  ;;  %v1557_v10 = vmax.f32 %v1159_v28, %v1429_v62  ;;  %v1119_v21 = vadd.f32 %v3769_v54, %v519_v55  ;;  %v1418_v46 = vmul.f32 0.2, %v1125_v42 }
 0x15d   : > { %v1179_v14 = vadd.f32 %v1178_v12, %v569_v60  ;;  %v1435_v29 = vmul.f32 0.2, %v1177_v34  ;;  %v1562_v60 = vmax.f32 %v1173_v11, %v1434_v18  ;;  %v1558_v11 = vmax.f32 %v1161_v17, %v1430_v48  ;;  %v514_v13 = vpop.permute.xlu1 %513  ;;  %v499_v58 = vpop.permute.xlu0 %498 }
 0x15e   : > { %v3787_v15 = vpop.f32.mrf.mxu0  ;;  %v1556_v12 = vmax.f32 %v1155_v26, %v1428_v61  ;;  %v1554_v17 = vmax.f32 %v1149_v45, %v1426_v56  ;;  %v1123_v18 = vadd.f32 %v3773_v51, %v524_v40  ;;  %v1552_v26 = vmax.f32 %v1143_v0, %v1424_v32 }
 0x15f   : > { %v1436_v19 = vmul.f32 0.2, %v1179_v14  ;;  %v1563_v23 = vmax.f32 %v1177_v34, %v1435_v29  ;;  %v1425_v34 = vmul.f32 0.2, %v1147_v3  ;;  %v1113_v51 = vadd.f32 %v3761_v1, %v514_v13 }
 0x160   : > { %v3789_v47 = vpop.f32.mrf.mxu0  ;;  %v1111_v48 = vadd.f32 %v3757_v52, %v514_v13  ;;  %v1417_v54 = vmul.f32 0.2, %v1123_v18  ;;  %v1546_v63 = vmax.f32 %v1125_v42, %v1418_v46 }
 0x161   : > { %v1564_v27 = vmax.f32 %v1179_v14, %v1436_v19  ;;  %v1129_v14 = vadd.f32 %v3779_v24, %v529_v25  ;;  %v1421_v19 = vmul.f32 0.2, %v1135_v7  ;;  %v1553_v36 = vmax.f32 %v1147_v3, %v1425_v34  ;;  %v504_v45 = vpop.permute.xlu1 %503 }
 0x162   : > { %v3791_v44 = vpop.f32.mrf.mxu0  ;;  %v1420_v24 = vmul.f32 0.2, %v1131_v43  ;;  %v1416_v3 = vmul.f32 0.2, %v1119_v21  ;;  %v1414_v52 = vmul.f32 0.2, %v1113_v51  ;;  %v1093_v34 = vadd.f32 %v3734_v59, %v499_v58 }
 0x163   : > { %1981 = vmatprep.subr.mxu1 %v1564_v27  ;;  %v1117_v27 = vadd.f32 %v3765_v6, %v519_v55  ;;  %v1419_v25 = vmul.f32 0.2, %v1129_v14  ;;  %v1107_v6 = vadd.f32 %v3753_v33, %v509_v20  ;;  %v1545_v33 = vmax.f32 %v1123_v18, %v1417_v54 }
 0x164   : > { %v3793_v2 = vpop.f32.mrf.mxu0  ;;  %1982 = vmatpush2.msra.mxu1 %v1563_v23  ;;  %v1550_v23 = vmax.f32 %v1137_v57, %v1422_v31  ;;  %v1548_v62 = vmax.f32 %v1131_v43, %v1420_v24  ;;  %v1413_v57 = vmul.f32 0.2, %v1111_v48  ;;  %v1544_v55 = vmax.f32 %v1119_v21, %v1416_v3  ;;  %v1642_v3 = vld [vmem:[%s4841_s3 + $0x68] sm:$0xff] }
 0x165   : > { %1983 = vmatprep.subr.mxu1 %v1562_v60  ;;  %v1549_v60 = vmax.f32 %v1135_v7, %v1421_v19  ;;  %v1415_v0 = vmul.f32 0.2, %v1117_v27  ;;  %v1547_v1 = vmax.f32 %v1129_v14, %v1419_v25  ;;  %v494_v7 = vpop.permute.xlu1 %493  ;;  %v1407_v59 = vmul.f32 0.2, %v1093_v34 }
 0x166   : > { %v3795_v8 = vpop.f32.mrf.mxu0  ;;  %1984 = vmatpush2.msra.mxu1 %v1561_v38  ;;  %v1105_v38 = vadd.f32 %v3749_v22, %v509_v20  ;;  %v1095_v22 = vadd.f32 %v3737_v4, %v499_v58  ;;  %v1087_v13 = vadd.f32 %v3730_v5, %v494_v7  ;;  %v1541_v4 = vmax.f32 %v1111_v48, %v1413_v57  ;;  %v1638_v48 = vld [vmem:[%s4841_s3 + $0x48] sm:$0xff]  ;;  %v1645_v57 = vld [vmem:[%s4841_s3 + $0x80] sm:$0xff] }
 0x167   : > { %1985 = vmatprep.subr.mxu1 %v1560_v37  ;;  %v1101_v37 = vadd.f32 %v3745_v16, %v504_v45  ;;  %v1535_v24 = vmax.f32 %v1093_v34, %v1407_v59  ;;  %v1654_v34 = vld [vmem:[%s4841_s3 + $0xc8] sm:$0xff] }
 0x168   : > { %v3799_v41 = vpop.f32.mrf.mxu0  ;;  %1986 = vmatpush2.msra.mxu1 %v1559_v35  ;;  %v1099_v35 = vadd.f32 %v3741_v9, %v504_v45  ;;  %v1411_v16 = vmul.f32 0.2, %v1105_v38  ;;  %v1089_v9 = vadd.f32 %v3732_v39, %v494_v7  ;;  %v1405_v19 = vmul.f32 0.2, %v1087_v13  ;;  %v1633_v45 = vld [vmem:[%s4841_s3 + $0x20] sm:$0xff] }
 0x169   : > { %1987 = vmatprep.subr.mxu1 %v1558_v11  ;;  %v1412_v11 = vmul.f32 0.2, %v1107_v6  ;;  %v1410_v32 = vmul.f32 0.2, %v1101_v37  ;;  %v1649_v7 = vld [vmem:[%s4841_s3 + $0xa0] sm:$0xff] }
 0x16a   : > { %v3803_v29 = vpop.f32.mrf.mxu0  ;;  %1988 = vmatpush2.msra.mxu1 %v1557_v10  ;;  %v1543_v10 = vmax.f32 %v1117_v27, %v1415_v0  ;;  %v1409_v14 = vmul.f32 0.2, %v1099_v35  ;;  %v1539_v31 = vmax.f32 %v1105_v38, %v1411_v16  ;;  %v1406_v18 = vmul.f32 0.2, %v1089_v9  ;;  %v644_v0 = vpop.permute.xlu1 %643 }
 0x16b   : > { %1989 = vmatprep.subr.mxu1 %v1556_v12  ;;  %v1542_v12 = vmax.f32 %v1113_v51, %v1414_v52  ;;  %v1540_v42 = vmax.f32 %v1107_v6, %v1412_v11  ;;  %v1538_v39 = vmax.f32 %v1101_v37, %v1410_v32  ;;  %v1533_v27 = vmax.f32 %v1087_v13, %v1405_v19  ;;  %v1634_v51 = vld [vmem:[%s4841_s3 + $0x28] sm:$0xff]  ;;  %v1637_v6 = vld [vmem:[%s4841_s3 + $0x40] sm:$0xff] }
 0x16c   : > { %v3807_v28 = vpop.f32.mrf.mxu0  ;;  %1990 = vmatpush2.msra.mxu1 %v1555_v53  ;;  %v1408_v53 = vmul.f32 0.2, %v1095_v22  ;;  %v1534_v20 = vmax.f32 %v1089_v9, %v1406_v18  ;;  %v1641_v37 = vld [vmem:[%s4841_s3 + $0x60] sm:$0xff]  ;;  %v1646_v52 = vld [vmem:[%s4841_s3 + $0x88] sm:$0xff] }
 0x16d   : > { %1991 = vmatprep.subr.mxu1 %v1554_v17  ;;  %v1658_v13 = vld [vmem:[%s4841_s3 + $0xe8] sm:$0xff]  ;;  %v1657_v18 = vld [vmem:[%s4841_s3 + $0xe0] sm:$0xff] }
 0x16e   : > { %v3811_v30 = vpop.f32.mrf.mxu0  ;;  %1992 = vmatpush2.msra.mxu1 %v1553_v36  ;;  %v1537_v36 = vmax.f32 %v1099_v35, %v1409_v14  ;;  %v1536_v5 = vmax.f32 %v1095_v22, %v1408_v53  ;;  %v634_v22 = vpop.permute.xlu1 %633 }
 0x16f   : > { %1993 = vmatprep.subr.mxu1 %v1552_v26 }
 0x170   : > { %v3815_v40 = vpop.f32.mrf.mxu0  ;;  %1994 = vmatpush2.msra.mxu1 %v1551_v49  ;;  %v1629_v49 = vld [vmem:[%s4841_s3] sm:$0xff] }
 0x171   : > { %1995 = vmatprep.subr.mxu1 %v1550_v23 }
 0x172   : > { %v3819_v61 = vpop.f32.mrf.mxu0  ;;  %1996 = vmatpush2.msra.mxu1 %v1549_v60  ;;  %v624_v9 = vpop.permute.xlu1 %623 }
 0x173   : > { %1997 = vmatprep.subr.mxu1 %v1548_v62  ;;  %v649_v62 = vpop.permute.xlu0 %648 }
 0x174   : > { %v3823_v56 = vpop.f32.mrf.mxu0  ;;  %1998 = vmatpush2.msra.mxu1 %v1547_v1 }
 0x175   : > { %1999 = vmatprep.subr.mxu1 %v1546_v63 }
 0x176   : > { %v3827_v43 = vpop.f32.mrf.mxu0  ;;  %2000 = vmatpush2.msra.mxu1 %v1545_v33  ;;  %v1650_v33 = vld [vmem:[%s4841_s3 + $0xa8] sm:$0xff] }
 0x177   : > { %2001 = vmatprep.subr.mxu1 %v1544_v55  ;;  %v639_v58 = vpop.permute.xlu0 %638 }
 0x178   : > { %v3831_v50 = vpop.f32.mrf.mxu0  ;;  %2002 = vmatpush2.msra.mxu1 %v1543_v10 }
 0x179   : > { %2003 = vmatprep.subr.mxu1 %v1542_v12  ;;  %v1653_v12 = vld [vmem:[%s4841_s3 + $0xc0] sm:$0xff] }
 0x17a   : > { %v3833_v17 = vpop.f32.mrf.mxu0  ;;  %2004 = vmatpush2.msra.mxu1 %v1541_v4 }
 0x17b   : > { %2005 = vmatprep.subr.mxu1 %v1540_v42  ;;  %v629_v16 = vpop.permute.xlu0 %628 }
 0x17c   : > { %v3835_v21 = vpop.f32.mrf.mxu0  ;;  %2006 = vmatpush2.msra.mxu1 %v1539_v31 }
 0x17d   : > { %2007 = vmatprep.subr.mxu1 %v1538_v39 }
 0x17e   : > { %v3837_v26 = vpop.f32.mrf.mxu0  ;;  %2008 = vmatpush2.msra.mxu1 %v1537_v36  ;;  %v1662_v36 = vld [vmem:[%s4841_s3 + $0x108] sm:$0xff] }
 0x17f   : > { %2009 = vmatprep.subr.mxu1 %v1536_v5  ;;  %v619_v42 = vpop.permute.xlu0 %618  ;;  %v614_v5 = vpop.permute.xlu1 %613 }
 0x180   : > { %v3839_v25 = vpop.f32.mrf.mxu0  ;;  %2010 = vmatpush2.msra.mxu1 %v1535_v24 }
 0x181   : > { %2011 = vmatprep.subr.mxu1 %v1534_v20 }
 0x182   : > { %v3847_v46 = vpop.f32.mrf.mxu0  ;;  %2012 = vmatpush2.msra.mxu1 %v1533_v27 }
 0x183   : > { %2014 = vmatmul.mubr.f32.vlgmr.msra.gmra.mxu1 %v1629_v49 }
 0x184   : > { %v3849_v23 = vpop.f32.mrf.mxu0  ;;  %2019 = vmatprep.mubr.f32.mxu1 %v1634_v51 }
 0x186   : > { %v3857_v54 = vpop.f32.mrf.mxu0 }
 0x187   : > { %2020 = vmatmul.mubr.f32.gmra.mxu1 %v1633_v45 }
 0x188   : > { %v3859_v60 = vpop.f32.mrf.mxu0  ;;  %2025 = vmatprep.mubr.f32.mxu1 %v1638_v48 }
 0x18a   : > { %v1248_v38 = vpop.f32.mrf.mxu0 }
 0x18b   : > { %2026 = vmatmul.mubr.f32.gmra.mxu1 %v1637_v6 }
 0x18c   : > { %v1250_v1 = vpop.f32.mrf.mxu0  ;;  %2031 = vmatprep.mubr.f32.mxu1 %v1642_v3 }
 0x18e   : > { %v1254_v63 = vpop.f32.mrf.mxu0 }
 0x18f   : > { %2032 = vmatmul.mubr.f32.gmra.mxu1 %v1641_v37  ;;  %v1255_v48 = vadd.f32 %v1254_v63, %v634_v22 }
 0x190   : > { %v1256_v35 = vpop.f32.mrf.mxu0  ;;  %2037 = vmatprep.mubr.f32.mxu1 %v1646_v52 }
 0x191   : > { %v1257_v49 = vadd.f32 %v1256_v35, %v634_v22  ;;  %v609_v35 = vpop.permute.xlu0 %608  ;;  %v1245_v22 = vadd.f32 %v3859_v60, %v624_v9  ;;  %v1239_v60 = vadd.f32 %v3849_v23, %v619_v42 }
 0x192   : > { %v1260_v11 = vpop.f32.mrf.mxu0 }
 0x193   : > { %2038 = vmatmul.mubr.f32.gmra.mxu1 %v1645_v57  ;;  %v1261_v24 = vadd.f32 %v1260_v11, %v639_v58  ;;  %v1249_v57 = vadd.f32 %v1248_v38, %v629_v16  ;;  %v1665_v38 = vld [vmem:[%s4841_s3 + $0x120] sm:$0xff] }
 0x194   : > { %v1262_v55 = vpop.f32.mrf.mxu0  ;;  %2043 = vmatprep.mubr.f32.mxu1 %v1650_v33 }
 0x195   : > { %v1263_v39 = vadd.f32 %v1262_v55, %v639_v58  ;;  %v1666_v58 = vld [vmem:[%s4841_s3 + $0x128] sm:$0xff]  ;;  %v1463_v33 = vmul.f32 0.2, %v1261_v24  ;;  %v1462_v55 = vmul.f32 0.2, %v1257_v49  ;;  %v599_v23 = vpop.permute.xlu0 %598 }
 0x196   : > { %v1266_v10 = vpop.f32.mrf.mxu0 }
 0x197   : > { %2044 = vmatmul.mubr.f32.gmra.mxu1 %v1649_v7  ;;  %v1267_v59 = vadd.f32 %v1266_v10, %v644_v0  ;;  %v1464_v37 = vmul.f32 0.2, %v1263_v39  ;;  %v1461_v10 = vmul.f32 0.2, %v1255_v48 }
 0x198   : > { %v1268_v32 = vpop.f32.mrf.mxu0  ;;  %2049 = vmatprep.mubr.f32.mxu1 %v1654_v34  ;;  %v604_v34 = vpop.permute.xlu1 %603 }
 0x199   : > { %v1269_v4 = vadd.f32 %v1268_v32, %v644_v0  ;;  %v1465_v6 = vmul.f32 0.2, %v1267_v59  ;;  %v1251_v0 = vadd.f32 %v1250_v1, %v629_v16  ;;  %v3911_v1 = vadd.f32 %v3857_v54, %v624_v9  ;;  %v1670_v54 = vld [vmem:[%s4841_s3 + $0x148] sm:$0xff] }
 0x19a   : > { %v1272_v14 = vpop.f32.mrf.mxu0  ;;  %v1237_v9 = vadd.f32 %v3847_v46, %v619_v42  ;;  %v1227_v42 = vadd.f32 %v3835_v21, %v609_v35 }
 0x19b   : > { %v1273_v53 = vadd.f32 %v1272_v14, %v649_v62  ;;  %2050 = vmatmul.mubr.f32.gmra.mxu1 %v1653_v12  ;;  %v1466_v51 = vmul.f32 0.2, %v1269_v4  ;;  %v1593_v32 = vmax.f32 %v1267_v59, %v1465_v6  ;;  %v1460_v16 = vmul.f32 0.2, %v1251_v0 }
 0x19c   : > { %v1274_v31 = vpop.f32.mrf.mxu0  ;;  %2055 = vmatprep.mubr.f32.mxu1 %v1658_v13  ;;  %v1592_v13 = vmax.f32 %v1263_v39, %v1464_v37  ;;  %v1459_v14 = vmul.f32 0.2, %v1249_v57  ;;  %v3926_v59 = vadd.f32 %v3839_v25, %v614_v5  ;;  %v3929_v39 = vadd.f32 %v3837_v26, %v614_v5  ;;  %v1669_v25 = vld [vmem:[%s4841_s3 + $0x140] sm:$0xff]  ;;  %v1674_v26 = vld [vmem:[%s4841_s3 + $0x168] sm:$0xff]  ;;  %v594_v5 = vpop.permute.xlu1 %593 }
 0x19d   : > { %v1275_v19 = vadd.f32 %v1274_v31, %v649_v62  ;;  %v1467_v20 = vmul.f32 0.2, %v1273_v53  ;;  %v1661_v62 = vld [vmem:[%s4841_s3 + $0x100] sm:$0xff]  ;;  %v1594_v7 = vmax.f32 %v1269_v4, %v1466_v51  ;;  %v1591_v4 = vmax.f32 %v1261_v24, %v1463_v33  ;;  %v589_v33 = vpop.permute.xlu0 %588 }
 0x19e   : > { %v3897_v27 = vpop.f32.mrf.mxu0  ;;  %v1458_v31 = vmul.f32 0.2, %v1245_v22  ;;  %v1456_v24 = vmul.f32 0.2, %v1239_v60  ;;  %v1455_v51 = vmul.f32 0.2, %v1237_v9  ;;  %v1221_v6 = vadd.f32 %v3831_v50, %v604_v34 }
 0x19f   : > { %v1468_v45 = vmul.f32 0.2, %v1275_v19  ;;  %2056 = vmatmul.mubr.f32.gmra.mxu1 %v1657_v18  ;;  %v1595_v11 = vmax.f32 %v1273_v53, %v1467_v20  ;;  %v1590_v18 = vmax.f32 %v1257_v49, %v1462_v55  ;;  %v1588_v20 = vmax.f32 %v1251_v0, %v1460_v16  ;;  %v1673_v50 = vld [vmem:[%s4841_s3 + $0x160] sm:$0xff] }
 0x1a0   : > { %v3899_v3 = vpop.f32.mrf.mxu0  ;;  %2061 = vmatprep.mubr.f32.mxu1 %v1662_v36  ;;  %v1589_v36 = vmax.f32 %v1255_v48, %v1461_v10  ;;  %v1225_v49 = vadd.f32 %v3833_v17, %v609_v35  ;;  %v1586_v21 = vmax.f32 %v1245_v22, %v1458_v31  ;;  %v3947_v0 = vadd.f32 %v3827_v43, %v604_v34  ;;  %v1678_v43 = vld [vmem:[%s4841_s3 + $0x188] sm:$0xff]  ;;  %v584_v10 = vpop.permute.xlu1 %583 }
 0x1a1   : > { %v1596_v52 = vmax.f32 %v1275_v19, %v1468_v45  ;;  %v1457_v19 = vmul.f32 0.2, %v3911_v1  ;;  %v1587_v45 = vmax.f32 %v1249_v57, %v1459_v14  ;;  %v1453_v37 = vmul.f32 0.2, %v3929_v39 }
 0x1a2   : > { %v3907_v63 = vpop.f32.mrf.mxu0  ;;  %v1452_v35 = vmul.f32 0.2, %v1227_v42  ;;  %v1584_v57 = vmax.f32 %v1239_v60, %v1456_v24  ;;  %v1451_v22 = vmul.f32 0.2, %v1225_v49  ;;  %v1583_v55 = vmax.f32 %v1237_v9, %v1455_v51 }
 0x1a3   : > { %2062 = vmatmul.mubr.f32.gmra.mxu1 %v1661_v62  ;;  %2206 = vmatprep.subr.mxu1 %v1596_v52  ;;  %v1454_v62 = vmul.f32 0.2, %v3926_v59  ;;  %v1585_v52 = vmax.f32 %v3911_v1, %v1457_v19  ;;  %v1209_v34 = vadd.f32 %v3815_v40, %v594_v5  ;;  %v1450_v1 = vmul.f32 0.2, %v1221_v6  ;;  %v1677_v40 = vld [vmem:[%s4841_s3 + $0x180] sm:$0xff] }
 0x1a4   : > { %v3913_v12 = vpop.f32.mrf.mxu0  ;;  %2207 = vmatpush1.msra.mxu1 %v1595_v11  ;;  %2067 = vmatprep.mubr.f32.mxu1 %v1666_v58  ;;  %v1215_v58 = vadd.f32 %v3823_v56, %v599_v23  ;;  %v1213_v11 = vadd.f32 %v3819_v61, %v599_v23  ;;  %v1581_v60 = vmax.f32 %v3929_v39, %v1453_v37 }
 0x1a5   : > { %2208 = vmatprep.subr.mxu1 %v1594_v7  ;;  %v1582_v56 = vmax.f32 %v3926_v59, %v1454_v62  ;;  %v1203_v16 = vadd.f32 %v3807_v28, %v589_v33  ;;  %v1201_v9 = vadd.f32 %v3803_v29, %v589_v33  ;;  %v1197_v31 = vadd.f32 %v3799_v41, %v584_v10  ;;  %v579_v28 = vpop.permute.xlu0 %578  ;;  %v1681_v29 = vld [vmem:[%s4841_s3 + $0x1a0] sm:$0xff] }
 0x1a6   : > { %v3923_v53 = vpop.f32.mrf.mxu0  ;;  %2209 = vmatpush1.msra.mxu1 %v1593_v32  ;;  %v1207_v32 = vadd.f32 %v3811_v30, %v594_v5  ;;  %v1682_v30 = vld [vmem:[%s4841_s3 + $0x1a8] sm:$0xff]  ;;  %v1447_v14 = vmul.f32 0.2, %v1213_v11  ;;  %v1578_v23 = vmax.f32 %v1221_v6, %v1450_v1  ;;  %v1195_v39 = vadd.f32 %v3795_v8, %v584_v10 }
 0x1a7   : > { %2068 = vmatmul.mubr.f32.gmra.mxu1 %v1665_v38  ;;  %2210 = vmatprep.subr.mxu1 %v1592_v13  ;;  %v1449_v38 = vmul.f32 0.2, %v3947_v0  ;;  %v1448_v13 = vmul.f32 0.2, %v1215_v58  ;;  %v1191_v41 = vadd.f32 %v3793_v2, %v579_v28  ;;  %v1686_v8 = vld [vmem:[%s4841_s3 + $0x1c8] sm:$0xff] }
 0x1a8   : > { %v3932_v46 = vpop.f32.mrf.mxu0  ;;  %2211 = vmatpush1.msra.mxu1 %v1591_v4  ;;  %2073 = vmatprep.mubr.f32.mxu1 %v1670_v54  ;;  %v1580_v54 = vmax.f32 %v1227_v42, %v1452_v35  ;;  %v1579_v4 = vmax.f32 %v1225_v49, %v1451_v22  ;;  %v1445_v19 = vmul.f32 0.2, %v1207_v32  ;;  %v1444_v42 = vmul.f32 0.2, %v1203_v16  ;;  %v1694_v1 = vld [vmem:[%s4841_s3 + $0x208] sm:$0xff] }
 0x1a9   : > { %2212 = vmatprep.subr.mxu1 %v1590_v18  ;;  %v1446_v18 = vmul.f32 0.2, %v1209_v34  ;;  %v1576_v24 = vmax.f32 %v1215_v58, %v1448_v13  ;;  %v1443_v5 = vmul.f32 0.2, %v1201_v9  ;;  %v1575_v49 = vmax.f32 %v1213_v11, %v1447_v14 }
 0x1aa   : > { %v3942_v48 = vpop.f32.mrf.mxu0  ;;  %2213 = vmatpush1.msra.mxu1 %v1589_v36  ;;  %v1577_v36 = vmax.f32 %v3947_v0, %v1449_v38  ;;  %v1442_v6 = vmul.f32 0.2, %v1197_v31  ;;  %v1573_v0 = vmax.f32 %v1207_v32, %v1445_v19 }
 0x1ab   : > { %2074 = vmatmul.mubr.f32.gmra.mxu1 %v1669_v25  ;;  %2214 = vmatprep.subr.mxu1 %v1588_v20  ;;  %v574_v20 = vpop.permute.xlu1 %573  ;;  %v1574_v62 = vmax.f32 %v1209_v34, %v1446_v18  ;;  %v1571_v35 = vmax.f32 %v1201_v9, %v1443_v5  ;;  %v1702_v9 = vld [vmem:[%s4841_s3 + $0x248] sm:$0xff] }
 0x1ac   : > { %v3951_v17 = vpop.f32.mrf.mxu0  ;;  %2215 = vmatpush1.msra.mxu1 %v1587_v45  ;;  %2079 = vmatprep.mubr.f32.mxu1 %v1674_v26  ;;  %v1189_v26 = vadd.f32 %v3791_v44, %v579_v28  ;;  %v1185_v45 = vadd.f32 %v3789_v47, %v574_v20  ;;  %v1183_v2 = vadd.f32 %v3787_v15, %v574_v20  ;;  %v1685_v44 = vld [vmem:[%s4841_s3 + $0x1c0] sm:$0xff]  ;;  %v1690_v47 = vld [vmem:[%s4841_s3 + $0x1e8] sm:$0xff] }
 0x1ad   : > { %2216 = vmatprep.subr.mxu1 %v1586_v21  ;;  %v1441_v21 = vmul.f32 0.2, %v1195_v39  ;;  %v1706_v18 = vld [vmem:[%s4841_s3 + $0x268] sm:$0xff] }
 0x1ae   : > { %v3961_v7 = vpop.f32.mrf.mxu0  ;;  %2217 = vmatpush1.msra.mxu1 %v1585_v52  ;;  %v1440_v52 = vmul.f32 0.2, %v1191_v41  ;;  %v1439_v58 = vmul.f32 0.2, %v1189_v26  ;;  %v1437_v33 = vmul.f32 0.2, %v1183_v2 }
 0x1af   : > { %2080 = vmatmul.mubr.f32.gmra.mxu1 %v1673_v50  ;;  %2218 = vmatprep.subr.mxu1 %v1584_v57  ;;  %v1572_v50 = vmax.f32 %v1203_v16, %v1444_v42  ;;  %v1438_v57 = vmul.f32 0.2, %v1185_v45  ;;  %v1569_v11 = vmax.f32 %v1195_v39, %v1441_v21  ;;  %v1698_v16 = vld [vmem:[%s4841_s3 + $0x228] sm:$0xff]  ;;  %v724_v39 = vpop.permute.xlu1 %723 }
 0x1b0   : > { %v3968_v61 = vpop.f32.mrf.mxu0  ;;  %2219 = vmatpush1.msra.mxu1 %v1583_v55  ;;  %2085 = vmatprep.mubr.f32.mxu1 %v1678_v43  ;;  %v1570_v43 = vmax.f32 %v1197_v31, %v1442_v6  ;;  %v1689_v55 = vld [vmem:[%s4841_s3 + $0x1e0] sm:$0xff]  ;;  %v1568_v34 = vmax.f32 %v1191_v41, %v1440_v52  ;;  %v1565_v38 = vmax.f32 %v1183_v2, %v1437_v33  ;;  %v1714_v20 = vld [vmem:[%s4841_s3 + $0x2a8] sm:$0xff] }
 0x1b1   : > { %2220 = vmatprep.subr.mxu1 %v1582_v56  ;;  %v1567_v56 = vmax.f32 %v1189_v26, %v1439_v58  ;;  %v1566_v32 = vmax.f32 %v1185_v45, %v1438_v57  ;;  %v1701_v31 = vld [vmem:[%s4841_s3 + $0x240] sm:$0xff]  ;;  %v1718_v6 = vld [vmem:[%s4841_s3 + $0x2c8] sm:$0xff] }
 0x1b2   : > { %v3978_v59 = vpop.f32.mrf.mxu0  ;;  %2221 = vmatpush1.msra.mxu1 %v1581_v60  ;;  %v1713_v45 = vld [vmem:[%s4841_s3 + $0x2a0] sm:$0xff]  ;;  %v1722_v52 = vld [vmem:[%s4841_s3 + $0x2e8] sm:$0xff] }
 0x1b3   : > { %2086 = vmatmul.mubr.f32.gmra.mxu1 %v1677_v40  ;;  %2222 = vmatprep.subr.mxu1 %v1580_v54  ;;  %v1693_v40 = vld [vmem:[%s4841_s3 + $0x200] sm:$0xff]  ;;  %v714_v26 = vpop.permute.xlu1 %713 }
 0x1b4   : > { %v3983_v25 = vpop.f32.mrf.mxu0  ;;  %2223 = vmatpush1.msra.mxu1 %v1579_v4  ;;  %2091 = vmatprep.mubr.f32.mxu1 %v1682_v30  ;;  %v1697_v30 = vld [vmem:[%s4841_s3 + $0x220] sm:$0xff] }
 0x1b5   : > { %2224 = vmatprep.subr.mxu1 %v1578_v23  ;;  %v729_v23 = vpop.permute.xlu0 %728  ;;  %v1721_v33 = vld [vmem:[%s4841_s3 + $0x2e0] sm:$0xff] }
 0x1b6   : > { %v3993_v51 = vpop.f32.mrf.mxu0  ;;  %2225 = vmatpush1.msra.mxu1 %v1577_v36  ;;  %v1705_v36 = vld [vmem:[%s4841_s3 + $0x260] sm:$0xff] }
 0x1b7   : > { %2092 = vmatmul.mubr.f32.gmra.mxu1 %v1681_v29  ;;  %2226 = vmatprep.subr.mxu1 %v1576_v24  ;;  %v1710_v29 = vld [vmem:[%s4841_s3 + $0x288] sm:$0xff]  ;;  %v704_v21 = vpop.permute.xlu1 %703 }
 0x1b8   : > { %v3997_v37 = vpop.f32.mrf.mxu0  ;;  %2227 = vmatpush1.msra.mxu1 %v1575_v49  ;;  %2097 = vmatprep.mubr.f32.mxu1 %v1686_v8  ;;  %v1709_v8 = vld [vmem:[%s4841_s3 + $0x280] sm:$0xff] }
 0x1b9   : > { %2228 = vmatprep.subr.mxu1 %v1574_v62  ;;  %v719_v42 = vpop.permute.xlu0 %718 }
 0x1ba   : > { %v4005_v15 = vpop.f32.mrf.mxu0  ;;  %2229 = vmatpush1.msra.mxu1 %v1573_v0 }
 0x1bb   : > { %2098 = vmatmul.mubr.f32.gmra.mxu1 %v1685_v44  ;;  %2230 = vmatprep.subr.mxu1 %v1572_v50  ;;  %v1717_v44 = vld [vmem:[%s4841_s3 + $0x2c0] sm:$0xff] }
 0x1bc   : > { %v4007_v22 = vpop.f32.mrf.mxu0  ;;  %2231 = vmatpush1.msra.mxu1 %v1571_v35  ;;  %2103 = vmatprep.mubr.f32.mxu1 %v1690_v47 }
 0x1bd   : > { %2232 = vmatprep.subr.mxu1 %v1570_v43  ;;  %v709_v62 = vpop.permute.xlu0 %708 }
 0x1be   : > { %v4015_v10 = vpop.f32.mrf.mxu0  ;;  %2233 = vmatpush1.msra.mxu1 %v1569_v11 }
 0x1bf   : > { %2104 = vmatmul.mubr.f32.gmra.mxu1 %v1689_v55  ;;  %2234 = vmatprep.subr.mxu1 %v1568_v34  ;;  %v1726_v34 = vld [vmem:[%s4841_s3 + $0x308] sm:$0xff] }
 0x1c0   : > { %v4017_v60 = vpop.f32.mrf.mxu0  ;;  %2235 = vmatpush1.msra.mxu1 %v1567_v56  ;;  %2109 = vmatprep.mubr.f32.mxu1 %v1694_v1  ;;  %v694_v1 = vpop.permute.xlu1 %693 }
 0x1c1   : > { %2236 = vmatprep.subr.mxu1 %v1566_v32  ;;  %v699_v35 = vpop.permute.xlu0 %698 }
 0x1c2   : > { %v4025_v13 = vpop.f32.mrf.mxu0  ;;  %2237 = vmatpush1.msra.mxu1 %v1565_v38 }
 0x1c3   : > { %2110 = vmatmul.mubr.f32.gmra.mxu1 %v1693_v40 }
 0x1c4   : > { %v4027_v54 = vpop.f32.mrf.mxu0  ;;  %2115 = vmatprep.mubr.f32.mxu1 %v1698_v16 }
 0x1c6   : > { %v4035_v14 = vpop.f32.mrf.mxu0 }
 0x1c7   : > { %2116 = vmatmul.mubr.f32.gmra.mxu1 %v1697_v30 }
 0x1c8   : > { %v4037_v4 = vpop.f32.mrf.mxu0  ;;  %2121 = vmatprep.mubr.f32.mxu1 %v1702_v9 }
 0x1ca   : > { %v1344_v28 = vpop.f32.mrf.mxu0 }
 0x1cb   : > { %2122 = vmatmul.mubr.f32.gmra.mxu1 %v1701_v31  ;;  %v1725_v31 = vld [vmem:[%s4841_s3 + $0x300] sm:$0xff] }
 0x1cc   : > { %v1346_v19 = vpop.f32.mrf.mxu0  ;;  %2127 = vmatprep.mubr.f32.mxu1 %v1706_v18 }
 0x1cd   : > { %v1347_v18 = vadd.f32 %v1346_v19, %v709_v62 }
 0x1ce   : > { %v1350_v41 = vpop.f32.mrf.mxu0 }
 0x1cf   : > { %2128 = vmatmul.mubr.f32.gmra.mxu1 %v1705_v36  ;;  %v1351_v30 = vadd.f32 %v1350_v41, %v714_v26  ;;  %v1730_v36 = vld [vmem:[%s4841_s3 + $0x328] sm:$0xff] }
 0x1d0   : > { %v1352_v24 = vpop.f32.mrf.mxu0  ;;  %2133 = vmatprep.mubr.f32.mxu1 %v1710_v29  ;;  %v689_v29 = vpop.permute.xlu0 %688 }
 0x1d1   : > { %v1353_v38 = vadd.f32 %v1352_v24, %v714_v26  ;;  %v1493_v19 = vmul.f32 0.2, %v1351_v30 }
 0x1d2   : > { %v1356_v5 = vpop.f32.mrf.mxu0 }
 0x1d3   : > { %2134 = vmatmul.mubr.f32.gmra.mxu1 %v1709_v8  ;;  %v1357_v56 = vadd.f32 %v1356_v5, %v719_v42  ;;  %v1494_v41 = vmul.f32 0.2, %v1353_v38  ;;  %v684_v5 = vpop.permute.xlu1 %683 }
 0x1d4   : > { %v1358_v49 = vpop.f32.mrf.mxu0  ;;  %2139 = vmatprep.mubr.f32.mxu1 %v1714_v20  ;;  %v1341_v20 = vadd.f32 %v4037_v4, %v704_v21  ;;  %v1734_v4 = vld [vmem:[%s4841_s3 + $0x348] sm:$0xff] }
 0x1d5   : > { %v1359_v11 = vadd.f32 %v1358_v49, %v719_v42  ;;  %v1345_v42 = vadd.f32 %v1344_v28, %v709_v62  ;;  %v1495_v24 = vmul.f32 0.2, %v1357_v56  ;;  %v1339_v49 = vadd.f32 %v4035_v14, %v704_v21 }
 0x1d6   : > { %v1362_v2 = vpop.f32.mrf.mxu0  ;;  %v1335_v28 = vadd.f32 %v4027_v54, %v699_v35  ;;  %v1492_v62 = vmul.f32 0.2, %v1347_v18  ;;  %v1327_v54 = vadd.f32 %v4015_v10, %v694_v1  ;;  %v1321_v10 = vadd.f32 %v4005_v15, %v689_v29 }
 0x1d7   : > { %2140 = vmatmul.mubr.f32.gmra.mxu1 %v1713_v45  ;;  %v1363_v57 = vadd.f32 %v1362_v2, %v724_v39  ;;  %v1491_v14 = vmul.f32 0.2, %v1345_v42  ;;  %v1623_v21 = vmax.f32 %v1357_v56, %v1495_v24 }
 0x1d8   : > { %v1364_v0 = vpop.f32.mrf.mxu0  ;;  %2145 = vmatprep.mubr.f32.mxu1 %v1718_v6  ;;  %v1729_v6 = vld [vmem:[%s4841_s3 + $0x320] sm:$0xff] }
 0x1d9   : > { %v1365_v47 = vadd.f32 %v1364_v0, %v724_v39  ;;  %v1497_v9 = vmul.f32 0.2, %v1363_v57  ;;  %v1333_v0 = vadd.f32 %v4025_v13, %v699_v35  ;;  %v1733_v13 = vld [vmem:[%s4841_s3 + $0x340] sm:$0xff]  ;;  %v1323_v35 = vadd.f32 %v4007_v22, %v689_v29 }
 0x1da   : > { %v1368_v50 = vpop.f32.mrf.mxu0  ;;  %v1315_v22 = vadd.f32 %v3993_v51, %v684_v5 }
 0x1db   : > { %v1369_v58 = vadd.f32 %v1368_v50, %v729_v23  ;;  %2146 = vmatmul.mubr.f32.gmra.mxu1 %v1717_v44  ;;  %v1498_v40 = vmul.f32 0.2, %v1365_v47  ;;  %v1625_v45 = vmax.f32 %v1363_v57, %v1497_v9  ;;  %v1329_v44 = vadd.f32 %v4017_v60, %v694_v1  ;;  %v1738_v60 = vld [vmem:[%s4841_s3 + $0x368] sm:$0xff] }
 0x1dc   : > { %v1370_v43 = vpop.f32.mrf.mxu0  ;;  %2151 = vmatprep.mubr.f32.mxu1 %v1722_v52  ;;  %v1490_v52 = vmul.f32 0.2, %v1341_v20  ;;  %v1622_v50 = vmax.f32 %v1353_v38, %v1494_v41  ;;  %v1621_v57 = vmax.f32 %v1351_v30, %v1493_v19  ;;  %v1317_v1 = vadd.f32 %v3997_v37, %v684_v5  ;;  %v1742_v37 = vld [vmem:[%s4841_s3 + $0x388] sm:$0xff] }
 0x1dd   : > { %v1371_v55 = vadd.f32 %v1370_v43, %v729_v23  ;;  %v1499_v32 = vmul.f32 0.2, %v1369_v58  ;;  %v1496_v23 = vmul.f32 0.2, %v1359_v11  ;;  %v1626_v26 = vmax.f32 %v1365_v47, %v1498_v40  ;;  %v679_v47 = vpop.permute.xlu0 %678 }
 0x1de   : > { %v1488_v43 = vmul.f32 0.2, %v1335_v28  ;;  %v1486_v56 = vmul.f32 0.2, %v1329_v44  ;;  %v1485_v38 = vmul.f32 0.2, %v1327_v54  ;;  %v1311_v15 = vadd.f32 %v3983_v25, %v679_v47 }
 0x1df   : > { %v1500_v16 = vmul.f32 0.2, %v1371_v55  ;;  %2152 = vmatmul.mubr.f32.gmra.mxu1 %v1721_v33  ;;  %v1627_v8 = vmax.f32 %v1369_v58, %v1499_v32  ;;  %v1624_v2 = vmax.f32 %v1359_v11, %v1496_v23  ;;  %v1489_v58 = vmul.f32 0.2, %v1339_v49  ;;  %v674_v11 = vpop.permute.xlu1 %673 }
 0x1e0   : > { %2157 = vmatprep.mubr.f32.mxu1 %v1726_v34  ;;  %v1620_v33 = vmax.f32 %v1347_v18, %v1492_v62  ;;  %v1619_v34 = vmax.f32 %v1345_v42, %v1491_v14  ;;  %v1618_v32 = vmax.f32 %v1341_v20, %v1490_v52  ;;  %v1484_v30 = vmul.f32 0.2, %v1323_v35 }
 0x1e1   : > { %v1628_v39 = vmax.f32 %v1371_v55, %v1500_v16  ;;  %v1487_v55 = vmul.f32 0.2, %v1333_v0  ;;  %v1617_v40 = vmax.f32 %v1339_v49, %v1489_v58  ;;  %v1737_v16 = vld [vmem:[%s4841_s3 + $0x360] sm:$0xff]  ;;  %v1616_v9 = vmax.f32 %v1335_v28, %v1488_v43 }
 0x1e2   : > { %v1309_v51 = vadd.f32 %v3978_v59, %v679_v47  ;;  %v1483_v18 = vmul.f32 0.2, %v1321_v10  ;;  %v1614_v29 = vmax.f32 %v1329_v44, %v1486_v56  ;;  %v1303_v42 = vadd.f32 %v3961_v7, %v674_v11  ;;  %v1741_v59 = vld [vmem:[%s4841_s3 + $0x380] sm:$0xff] }
 0x1e3   : > { %2158 = vmatmul.mubr.f32.gmra.mxu1 %v1725_v31  ;;  %2238 = vmatprep.subr.mxu1 %v1628_v39  ;;  %v669_v31 = vpop.permute.xlu0 %668  ;;  %v1615_v23 = vmax.f32 %v1333_v0, %v1487_v55  ;;  %v1305_v39 = vadd.f32 %v3968_v61, %v674_v11  ;;  %v664_v25 = vpop.permute.xlu1 %663  ;;  %v1481_v24 = vmul.f32 0.2, %v1315_v22  ;;  %v1480_v41 = vmul.f32 0.2, %v1311_v15  ;;  %v1746_v61 = vld [vmem:[%s4841_s3 + $0x3a8] sm:$0xff]  ;;  %v1753_v55 = vld [vmem:[%s4841_s3 + $0x3e0] sm:$0xff] }
 0x1e4   : > { %2239 = vmatpush2.msra.mxu1 %v1627_v8  ;;  %2163 = vmatprep.mubr.f32.mxu1 %v1730_v36  ;;  %v1482_v36 = vmul.f32 0.2, %v1317_v1  ;;  %v1613_v8 = vmax.f32 %v1327_v54, %v1485_v38  ;;  %v1299_v20 = vadd.f32 %v3951_v17, %v669_v31  ;;  %v1297_v5 = vadd.f32 %v3942_v48, %v669_v31  ;;  %v1745_v48 = vld [vmem:[%s4841_s3 + $0x3a0] sm:$0xff]  ;;  %v1631_v38 = vld [vmem:[%s4841_s3 + $0x10] sm:$0xff]  ;;  %v1648_v31 = vld [vmem:[%s4841_s3 + $0x98] sm:$0xff] }
 0x1e5   : > { %2240 = vmatprep.subr.mxu1 %v1626_v26  ;;  %v1612_v26 = vmax.f32 %v1323_v35, %v1484_v30  ;;  %v1479_v7 = vmul.f32 0.2, %v1309_v51  ;;  %v1611_v49 = vmax.f32 %v1321_v10, %v1483_v18  ;;  %v1293_v19 = vadd.f32 %v3932_v46, %v664_v25  ;;  %v1750_v46 = vld [vmem:[%s4841_s3 + $0x3c8] sm:$0xff]  ;;  %v1639_v30 = vld [vmem:[%s4841_s3 + $0x50] sm:$0xff]  ;;  %v1652_v18 = vld [vmem:[%s4841_s3 + $0xb8] sm:$0xff] }
 0x1e6   : > { %2241 = vmatpush2.msra.mxu1 %v1625_v45  ;;  %v1478_v45 = vmul.f32 0.2, %v1305_v39  ;;  %v1291_v17 = vadd.f32 %v3923_v53, %v664_v25  ;;  %v1477_v62 = vmul.f32 0.2, %v1303_v42  ;;  %v1476_v0 = vmul.f32 0.2, %v1299_v20 }
 0x1e7   : > { %2164 = vmatmul.mubr.f32.gmra.mxu1 %v1729_v6  ;;  %2242 = vmatprep.subr.mxu1 %v1624_v2  ;;  %v1610_v6 = vmax.f32 %v1317_v1, %v1482_v36  ;;  %v659_v28 = vpop.permute.xlu0 %658  ;;  %v1609_v2 = vmax.f32 %v1315_v22, %v1481_v24  ;;  %v1608_v14 = vmax.f32 %v1311_v15, %v1480_v41  ;;  %v1475_v44 = vmul.f32 0.2, %v1297_v5  ;;  %v1632_v1 = vld [vmem:[%s4841_s3 + $0x18] sm:$0xff]  ;;  %v1655_v36 = vld [vmem:[%s4841_s3 + $0xd0] sm:$0xff] }
 0x1e8   : > { %2243 = vmatpush2.msra.mxu1 %v1623_v21  ;;  %2169 = vmatprep.mubr.f32.mxu1 %v1734_v4  ;;  %v1287_v4 = vadd.f32 %v3913_v12, %v659_v28  ;;  %v654_v21 = vpop.permute.xlu1 %653  ;;  %v1285_v53 = vadd.f32 %v3907_v63, %v659_v28  ;;  %v1607_v52 = vmax.f32 %v1309_v51, %v1479_v7  ;;  %v1474_v47 = vmul.f32 0.2, %v1293_v19  ;;  %v1640_v15 = vld [vmem:[%s4841_s3 + $0x58] sm:$0xff]  ;;  %v1647_v51 = vld [vmem:[%s4841_s3 + $0x90] sm:$0xff] }
 0x1e9   : > { %2244 = vmatprep.subr.mxu1 %v1622_v50  ;;  %v1281_v50 = vadd.f32 %v3899_v3, %v654_v21  ;;  %v1606_v54 = vmax.f32 %v1305_v39, %v1478_v45  ;;  %v1279_v12 = vadd.f32 %v3897_v27, %v654_v21  ;;  %v1473_v58 = vmul.f32 0.2, %v1291_v17  ;;  %v1754_v3 = vld [vmem:[%s4841_s3 + $0x3e8] sm:$0xff]  ;;  %v1656_v39 = vld [vmem:[%s4841_s3 + $0xd8] sm:$0xff]  ;;  %v1659_v25 = vld [vmem:[%s4841_s3 + $0xf0] sm:$0xff] }
 0x1ea   : > { %2245 = vmatpush2.msra.mxu1 %v1621_v57  ;;  %v1605_v57 = vmax.f32 %v1303_v42, %v1477_v62  ;;  %v1472_v63 = vmul.f32 0.2, %v1287_v4  ;;  %v1604_v35 = vmax.f32 %v1299_v20, %v1476_v0  ;;  %v1471_v43 = vmul.f32 0.2, %v1285_v53  ;;  %v1664_v42 = vld [vmem:[%s4841_s3 + $0x118] sm:$0xff]  ;;  %v1663_v24 = vld [vmem:[%s4841_s3 + $0x110] sm:$0xff] }
 0x1eb   : > { %2170 = vmatmul.mubr.f32.gmra.mxu1 %v1733_v13  ;;  %2246 = vmatprep.subr.mxu1 %v1620_v33  ;;  %v1749_v13 = vld [vmem:[%s4841_s3 + $0x3c0] sm:$0xff]  ;;  %v1603_v33 = vmax.f32 %v1297_v5, %v1475_v44  ;;  %v1602_v27 = vmax.f32 %v1293_v19, %v1474_v47  ;;  %v1469_v11 = vmul.f32 0.2, %v1279_v12  ;;  %v1601_v10 = vmax.f32 %v1291_v17, %v1473_v58  ;;  %v1672_v20 = vld [vmem:[%s4841_s3 + $0x158] sm:$0xff]  ;;  %v1671_v41 = vld [vmem:[%s4841_s3 + $0x150] sm:$0xff] }
 0x1ec   : > { %2247 = vmatpush2.msra.mxu1 %v1619_v34  ;;  %2175 = vmatprep.mubr.f32.mxu1 %v1738_v60  ;;  %v1470_v60 = vmul.f32 0.2, %v1281_v50  ;;  %v1600_v34 = vmax.f32 %v1287_v4, %v1472_v63  ;;  %v1599_v56 = vmax.f32 %v1285_v53, %v1471_v43  ;;  %v1680_v5 = vld [vmem:[%s4841_s3 + $0x198] sm:$0xff]  ;;  %v1679_v7 = vld [vmem:[%s4841_s3 + $0x190] sm:$0xff] }
 0x1ed   : > { %2248 = vmatprep.subr.mxu1 %v1618_v32  ;;  %v1597_v22 = vmax.f32 %v1279_v12, %v1469_v11  ;;  %v1683_v19 = vld [vmem:[%s4841_s3 + $0x1b0] sm:$0xff]  ;;  %v1688_v45 = vld [vmem:[%s4841_s3 + $0x1d8] sm:$0xff] }
 0x1ee   : > { %2249 = vmatpush2.msra.mxu1 %v1617_v40  ;;  %v1598_v32 = vmax.f32 %v1281_v50, %v1470_v60  ;;  %v1636_v40 = vld [vmem:[%s4841_s3 + $0x38] sm:$0xff]  ;;  %v1691_v17 = vld [vmem:[%s4841_s3 + $0x1f0] sm:$0xff] }
 0x1ef   : > { %2176 = vmatmul.mubr.f32.gmra.mxu1 %v1737_v16  ;;  %2250 = vmatprep.subr.mxu1 %v1616_v9  ;;  %v1635_v16 = vld [vmem:[%s4841_s3 + $0x30] sm:$0xff]  ;;  %v1644_v9 = vld [vmem:[%s4841_s3 + $0x78] sm:$0xff] }
 0x1f0   : > { %2251 = vmatpush2.msra.mxu1 %v1615_v23  ;;  %2181 = vmatprep.mubr.f32.mxu1 %v1742_v37  ;;  %v1643_v37 = vld [vmem:[%s4841_s3 + $0x70] sm:$0xff]  ;;  %v1692_v28 = vld [vmem:[%s4841_s3 + $0x1f8] sm:$0xff] }
 0x1f1   : > { %2252 = vmatprep.subr.mxu1 %v1614_v29  ;;  %v1651_v23 = vld [vmem:[%s4841_s3 + $0xb0] sm:$0xff]  ;;  %v1660_v29 = vld [vmem:[%s4841_s3 + $0xf8] sm:$0xff] }
 0x1f2   : > { %2253 = vmatpush2.msra.mxu1 %v1613_v8  ;;  %v1668_v8 = vld [vmem:[%s4841_s3 + $0x138] sm:$0xff]  ;;  %v1699_v0 = vld [vmem:[%s4841_s3 + $0x230] sm:$0xff] }
 0x1f3   : > { %2182 = vmatmul.mubr.f32.gmra.mxu1 %v1741_v59  ;;  %2254 = vmatprep.subr.mxu1 %v1612_v26  ;;  %v1667_v59 = vld [vmem:[%s4841_s3 + $0x130] sm:$0xff]  ;;  %v1676_v26 = vld [vmem:[%s4841_s3 + $0x178] sm:$0xff] }
 0x1f4   : > { %2255 = vmatpush2.msra.mxu1 %v1611_v49  ;;  %2187 = vmatprep.mubr.f32.mxu1 %v1746_v61  ;;  %v1675_v61 = vld [vmem:[%s4841_s3 + $0x170] sm:$0xff]  ;;  %v1684_v49 = vld [vmem:[%s4841_s3 + $0x1b8] sm:$0xff] }
 0x1f5   : > { %2256 = vmatprep.subr.mxu1 %v1610_v6  ;;  %v1687_v6 = vld [vmem:[%s4841_s3 + $0x1d0] sm:$0xff]  ;;  %v1696_v62 = vld [vmem:[%s4841_s3 + $0x218] sm:$0xff] }
 0x1f6   : > { %2257 = vmatpush2.msra.mxu1 %v1609_v2  ;;  %v1695_v2 = vld [vmem:[%s4841_s3 + $0x210] sm:$0xff]  ;;  %v1712_v12 = vld [vmem:[%s4841_s3 + $0x298] sm:$0xff] }
 0x1f7   : > { %2188 = vmatmul.mubr.f32.gmra.mxu1 %v1745_v48  ;;  %2258 = vmatprep.subr.mxu1 %v1608_v14  ;;  %v1700_v48 = vld [vmem:[%s4841_s3 + $0x238] sm:$0xff]  ;;  %v1703_v53 = vld [vmem:[%s4841_s3 + $0x250] sm:$0xff] }
 0x1f8   : > { %2259 = vmatpush2.msra.mxu1 %v1607_v52  ;;  %2193 = vmatprep.mubr.f32.mxu1 %v1750_v46  ;;  %v1704_v46 = vld [vmem:[%s4841_s3 + $0x258] sm:$0xff]  ;;  %v1707_v47 = vld [vmem:[%s4841_s3 + $0x270] sm:$0xff] }
 0x1f9   : > { %2260 = vmatprep.subr.mxu1 %v1606_v54  ;;  %v1708_v52 = vld [vmem:[%s4841_s3 + $0x278] sm:$0xff] }
 0x1fa   : > { %2261 = vmatpush2.msra.mxu1 %v1605_v57  ;;  %v1711_v57 = vld [vmem:[%s4841_s3 + $0x290] sm:$0xff]  ;;  %v1716_v63 = vld [vmem:[%s4841_s3 + $0x2b8] sm:$0xff] }
 0x1fb   : > { %2194 = vmatmul.mubr.f32.gmra.mxu1 %v1749_v13  ;;  %2262 = vmatprep.subr.mxu1 %v1604_v35 }
 0x1fc   : > { %2263 = vmatpush2.msra.mxu1 %v1603_v33  ;;  %2199 = vmatprep.mubr.f32.mxu1 %v1754_v3  ;;  %v1715_v3 = vld [vmem:[%s4841_s3 + $0x2b0] sm:$0xff]  ;;  %v1720_v33 = vld [vmem:[%s4841_s3 + $0x2d8] sm:$0xff] }
 0x1fd   : > { %2264 = vmatprep.subr.mxu1 %v1602_v27  ;;  %v1719_v27 = vld [vmem:[%s4841_s3 + $0x2d0] sm:$0xff] }
 0x1fe   : > { %2265 = vmatpush2.msra.mxu1 %v1601_v10  ;;  %v1724_v10 = vld [vmem:[%s4841_s3 + $0x2f8] sm:$0xff] }
 0x1ff   : > { %2200 = vmatmul.mubr.f32.gmra.mxu1 %v1753_v55  ;;  %2266 = vmatprep.subr.mxu1 %v1600_v34  ;;  %v1723_v34 = vld [vmem:[%s4841_s3 + $0x2f0] sm:$0xff] }
 0x200   : > { %2267 = vmatpush2.msra.mxu1 %v1599_v56  ;;  %2270 = vmatprep.mubr.f32.mxu1 %v1632_v1  ;;  %v1728_v56 = vld [vmem:[%s4841_s3 + $0x318] sm:$0xff] }
 0x201   : > { %2268 = vmatprep.subr.mxu1 %v1598_v32 }
 0x202   : > { %2269 = vmatpush2.msra.mxu1 %v1597_v22  ;;  %v1727_v22 = vld [vmem:[%s4841_s3 + $0x310] sm:$0xff] }
 0x203   : > { %2271 = vmatmul.mubr.f32.vlgmr.msra.gmra.mxu1 %v1631_v38 }
 0x204   : > { %2276 = vmatprep.mubr.f32.mxu1 %v1636_v40  ;;  %v1732_v40 = vld [vmem:[%s4841_s3 + $0x338] sm:$0xff] }
 0x207   : > { %2277 = vmatmul.mubr.f32.gmra.mxu1 %v1635_v16 }
 0x208   : > { %2282 = vmatprep.mubr.f32.mxu1 %v1640_v15  ;;  %v1731_v15 = vld [vmem:[%s4841_s3 + $0x330] sm:$0xff] }
 0x20b   : > { %2283 = vmatmul.mubr.f32.gmra.mxu1 %v1639_v30 }
 0x20c   : > { %2288 = vmatprep.mubr.f32.mxu1 %v1644_v9  ;;  %v1736_v9 = vld [vmem:[%s4841_s3 + $0x358] sm:$0xff] }
 0x20f   : > { %2289 = vmatmul.mubr.f32.gmra.mxu1 %v1643_v37 }
 0x210   : > { %2294 = vmatprep.mubr.f32.mxu1 %v1648_v31  ;;  %v1735_v31 = vld [vmem:[%s4841_s3 + $0x350] sm:$0xff] }
 0x213   : > { %2295 = vmatmul.mubr.f32.gmra.mxu1 %v1647_v51 }
 0x214   : > { %2300 = vmatprep.mubr.f32.mxu1 %v1652_v18  ;;  %v1740_v18 = vld [vmem:[%s4841_s3 + $0x378] sm:$0xff] }
 0x217   : > { %2301 = vmatmul.mubr.f32.gmra.mxu1 %v1651_v23 }
 0x218   : > { %2306 = vmatprep.mubr.f32.mxu1 %v1656_v39  ;;  %v1739_v39 = vld [vmem:[%s4841_s3 + $0x370] sm:$0xff] }
 0x21b   : > { %2307 = vmatmul.mubr.f32.gmra.mxu1 %v1655_v36 }
 0x21c   : > { %2312 = vmatprep.mubr.f32.mxu1 %v1660_v29  ;;  %v1744_v29 = vld [vmem:[%s4841_s3 + $0x398] sm:$0xff] }
 0x21f   : > { %2313 = vmatmul.mubr.f32.gmra.mxu1 %v1659_v25 }
 0x220   : > { %2318 = vmatprep.mubr.f32.mxu1 %v1664_v42  ;;  %v1743_v42 = vld [vmem:[%s4841_s3 + $0x390] sm:$0xff] }
 0x223   : > { %2319 = vmatmul.mubr.f32.gmra.mxu1 %v1663_v24 }
 0x224   : > { %2324 = vmatprep.mubr.f32.mxu1 %v1668_v8  ;;  %v1748_v8 = vld [vmem:[%s4841_s3 + $0x3b8] sm:$0xff] }
 0x227   : > { %2325 = vmatmul.mubr.f32.gmra.mxu1 %v1667_v59 }
 0x228   : > { %2330 = vmatprep.mubr.f32.mxu1 %v1672_v20  ;;  %v1747_v20 = vld [vmem:[%s4841_s3 + $0x3b0] sm:$0xff] }
 0x22b   : > { %2331 = vmatmul.mubr.f32.gmra.mxu1 %v1671_v41 }
 0x22c   : > { %2336 = vmatprep.mubr.f32.mxu1 %v1676_v26  ;;  %v1752_v26 = vld [vmem:[%s4841_s3 + $0x3d8] sm:$0xff] }
 0x22f   : > { %2337 = vmatmul.mubr.f32.gmra.mxu1 %v1675_v61 }
 0x230   : > { %2342 = vmatprep.mubr.f32.mxu1 %v1680_v5  ;;  %v1751_v5 = vld [vmem:[%s4841_s3 + $0x3d0] sm:$0xff] }
 0x233   : > { %2343 = vmatmul.mubr.f32.gmra.mxu1 %v1679_v7 }
 0x234   : > { %2348 = vmatprep.mubr.f32.mxu1 %v1684_v49  ;;  %v1756_v49 = vld [vmem:[%s4841_s3 + $0x3f8] sm:$0xff] }
 0x237   : > { %2349 = vmatmul.mubr.f32.gmra.mxu1 %v1683_v19 }
 0x238   : > { %2354 = vmatprep.mubr.f32.mxu1 %v1688_v45  ;;  %v1755_v45 = vld [vmem:[%s4841_s3 + $0x3f0] sm:$0xff] }
 0x23b   : > { %2355 = vmatmul.mubr.f32.gmra.mxu1 %v1687_v6 }
 0x23c   : > { %2360 = vmatprep.mubr.f32.mxu1 %v1692_v28 }
 0x23f   : > { %2361 = vmatmul.mubr.f32.gmra.mxu1 %v1691_v17 }
 0x240   : > { %2366 = vmatprep.mubr.f32.mxu1 %v1696_v62 }
 0x243   : > { %v4247_v4 = vpop.f32.mrf.mxu1  ;;  %2367 = vmatmul.mubr.f32.gmra.mxu1 %v1695_v2 }
 0x244   : > { %2372 = vmatprep.mubr.f32.mxu1 %v1700_v48 }
 0x245   : > { %v4252_v14 = vpop.f32.mrf.mxu1 }
 0x247   : > { %v4257_v21 = vpop.f32.mrf.mxu1  ;;  %2373 = vmatmul.mubr.f32.gmra.mxu1 %v1699_v0 }
 0x248   : > { %2378 = vmatprep.mubr.f32.mxu1 %v1704_v46 }
 0x249   : > { %v4262_v44 = vpop.f32.mrf.mxu1 }
 0x24b   : > { %v4267_v50 = vpop.f32.mrf.mxu1  ;;  %2379 = vmatmul.mubr.f32.gmra.mxu1 %v1703_v53 }
 0x24c   : > { %2384 = vmatprep.mubr.f32.mxu1 %v1708_v52 }
 0x24d   : > { %v4272_v54 = vpop.f32.mrf.mxu1 }
 0x24f   : > { %v4277_v58 = vpop.f32.mrf.mxu1  ;;  %2385 = vmatmul.mubr.f32.gmra.mxu1 %v1707_v47 }
 0x250   : > { %2390 = vmatprep.mubr.f32.mxu1 %v1712_v12 }
 0x251   : > { %v4282_v13 = vpop.f32.mrf.mxu1 }
 0x253   : > { %v4287_v35 = vpop.f32.mrf.mxu1  ;;  %2391 = vmatmul.mubr.f32.gmra.mxu1 %v1711_v57 }
 0x254   : > { %2396 = vmatprep.mubr.f32.mxu1 %v1716_v63  ;;  %v4418_v63 = vpop.permute.xlu1 %1861 }
 0x255   : > { %v4292_v43 = vpop.f32.mrf.mxu1 }
 0x257   : > { %v4297_v60 = vpop.f32.mrf.mxu1  ;;  %2397 = vmatmul.mubr.f32.gmra.mxu1 %v1715_v3 }
 0x258   : > { %2402 = vmatprep.mubr.f32.mxu1 %v1720_v33 }
 0x259   : > { %v4302_v11 = vpop.f32.mrf.mxu1 }
 0x25b   : > { %v4307_v55 = vpop.f32.mrf.mxu1  ;;  %2403 = vmatmul.mubr.f32.gmra.mxu1 %v1719_v27  ;;  %v4424_v27 = vpop.permute.xlu0 %1866 }
 0x25c   : > { %2408 = vmatprep.mubr.f32.mxu1 %v1724_v10 }
 0x25d   : > { %v4312_v1 = vpop.f32.mrf.mxu1 }
 0x25f   : > { %v4317_v32 = vpop.f32.mrf.mxu1  ;;  %2409 = vmatmul.mubr.f32.gmra.mxu1 %v1723_v34  ;;  %v4428_v34 = vpop.permute.xlu1 %1851 }
 0x260   : > { %2414 = vmatprep.mubr.f32.mxu1 %v1728_v56 }
 0x261   : > { %v4322_v38 = vpop.f32.mrf.mxu1 }
 0x263   : > { %v4327_v16 = vpop.f32.mrf.mxu1  ;;  %2415 = vmatmul.mubr.f32.gmra.mxu1 %v1727_v22 }
 0x264   : > { %2420 = vmatprep.mubr.f32.mxu1 %v1732_v40  ;;  %v4434_v40 = vpop.permute.xlu0 %1856 }
 0x265   : > { %v4332_v30 = vpop.f32.mrf.mxu1 }
 0x267   : > { %v4337_v37 = vpop.f32.mrf.mxu1  ;;  %2421 = vmatmul.mubr.f32.gmra.mxu1 %v1731_v15 }
 0x268   : > { %2426 = vmatprep.mubr.f32.mxu1 %v1736_v9  ;;  %v4438_v9 = vpop.permute.xlu1 %1841 }
 0x269   : > { %v4342_v51 = vpop.f32.mrf.mxu1 }
 0x26b   : > { %v4347_v23 = vpop.f32.mrf.mxu1  ;;  %2427 = vmatmul.mubr.f32.gmra.mxu1 %v1735_v31 }
 0x26c   : > { %2432 = vmatprep.mubr.f32.mxu1 %v1740_v18 }
 0x26d   : > { %v4352_v36 = vpop.f32.mrf.mxu1 }
 0x26f   : > { %v4357_v25 = vpop.f32.mrf.mxu1  ;;  %2433 = vmatmul.mubr.f32.gmra.mxu1 %v1739_v39  ;;  %v4444_v39 = vpop.permute.xlu0 %1846 }
 0x270   : > { %2438 = vmatprep.mubr.f32.mxu1 %v1744_v29 }
 0x271   : > { %v4362_v24 = vpop.f32.mrf.mxu1 }
 0x273   : > { %v4367_v59 = vpop.f32.mrf.mxu1  ;;  %2439 = vmatmul.mubr.f32.gmra.mxu1 %v1743_v42  ;;  %v4448_v42 = vpop.permute.xlu1 %1831 }
 0x274   : > { %2444 = vmatprep.mubr.f32.mxu1 %v1748_v8 }
 0x275   : > { %v4372_v41 = vpop.f32.mrf.mxu1 }
 0x277   : > { %v4377_v61 = vpop.f32.mrf.mxu1  ;;  %2445 = vmatmul.mubr.f32.gmra.mxu1 %v1747_v20 }
 0x278   : > { %2450 = vmatprep.mubr.f32.mxu1 %v1752_v26  ;;  %v4454_v26 = vpop.permute.xlu0 %1836 }
 0x279   : > { %v4382_v7 = vpop.f32.mrf.mxu1 }
 0x27b   : > { %v4387_v19 = vpop.f32.mrf.mxu1  ;;  %2451 = vmatmul.mubr.f32.gmra.mxu1 %v1751_v5 }
 0x27c   : > { %2456 = vmatprep.mubr.f32.mxu1 %v1756_v49  ;;  %v4458_v49 = vpop.permute.xlu1 %1821 }
 0x27d   : > { %v4392_v6 = vpop.f32.mrf.mxu1 }
 0x27f   : > { %v4394_v28 = vpop.f32.mrf.mxu1  ;;  %2457 = vmatmul.mubr.f32.gmra.mxu1 %v1755_v45 }
 0x281   : > { %v4396_v17 = vpop.f32.mrf.mxu1 }
 0x283   : > { %v4398_v62 = vpop.f32.mrf.mxu1 }
 0x285   : > { %v4400_v2 = vpop.f32.mrf.mxu1 }
 0x287   : > { %v4402_v48 = vpop.f32.mrf.mxu1 }
 0x289   : > { %v4404_v0 = vpop.f32.mrf.mxu1 }
 0x28a   : > { %4873 = vst [vmem:[#allocation6_spill] sm:$0xff] %v4404_v0 }
 0x28b   : > { %v4406_v46 = vpop.f32.mrf.mxu1 }
 0x28c   : > { %4874 = vst [vmem:[#allocation7_spill] sm:$0xff] %v4406_v46 }
 0x28d   : > { %v4408_v53 = vpop.f32.mrf.mxu1 }
 0x28e   : > { %4875 = vst [vmem:[#allocation8_spill] sm:$0xff] %v4408_v53 }
 0x28f   : > { %v4410_v52 = vpop.f32.mrf.mxu1 }
 0x290   : > { %4876 = vst [vmem:[#allocation9_spill] sm:$0xff] %v4410_v52 }
 0x291   : > { %v4412_v47 = vpop.f32.mrf.mxu1 }
 0x292   : > { %4877 = vst [vmem:[#allocation10_spill] sm:$0xff] %v4412_v47 }
 0x293   : > { %v4414_v12 = vpop.f32.mrf.mxu1 }
 0x294   : > { %4878 = vst [vmem:[#allocation11_spill] sm:$0xff] %v4414_v12 }
 0x295   : > { %v4416_v57 = vpop.f32.mrf.mxu1 }
 0x296   : > { %4879 = vst [vmem:[#allocation12_spill] sm:$0xff] %v4416_v57 }
 0x297   : > { %v4420_v3 = vpop.f32.mrf.mxu1 }
 0x298   : > { %4880 = vst [vmem:[#allocation13_spill] sm:$0xff] %v4420_v3 }
 0x299   : > { %v4422_v33 = vpop.f32.mrf.mxu1 }
 0x29a   : > { %4881 = vst [vmem:[#allocation14_spill] sm:$0xff] %v4422_v33  ;;  %v4464_v33 = vpop.permute.xlu0 %1826 }
 0x29b   : > { %v4426_v10 = vpop.f32.mrf.mxu1 }
 0x29c   : > { %4882 = vst [vmem:[#allocation15_spill] sm:$0xff] %v4426_v10 }
 0x29d   : > { %v4430_v56 = vpop.f32.mrf.mxu1 }
 0x29e   : > { %4883 = vst [vmem:[#allocation16_spill] sm:$0xff] %v4430_v56  ;;  %v1812_v56 = vpop.permute.xlu1 %1811 }
 0x29f   : > { %v4432_v22 = vpop.f32.mrf.mxu1 }
 0x2a0   : > { %4884 = vst [vmem:[#allocation17_spill] sm:$0xff] %v4432_v22 }
 0x2a1   : > { %v4436_v15 = vpop.f32.mrf.mxu1 }
 0x2a2   : > { %4885 = vst [vmem:[#allocation18_spill] sm:$0xff] %v4436_v15 }
 0x2a3   : > { %v4440_v31 = vpop.f32.mrf.mxu1 }
 0x2a4   : > { %4886 = vst [vmem:[#allocation19_spill] sm:$0xff] %v4440_v31  ;;  %v4472_v31 = vpop.permute.xlu0 %1816 }
 0x2a5   : > { %v4442_v18 = vpop.f32.mrf.mxu1 }
 0x2a6   : > { %4887 = vst [vmem:[#allocation20_spill] sm:$0xff] %v4442_v18 }
 0x2a7   : > { %v4446_v29 = vpop.f32.mrf.mxu1 }
 0x2a8   : > { %4888 = vst [vmem:[#allocation21_spill] sm:$0xff] %v4446_v29  ;;  %v1802_v29 = vpop.permute.xlu1 %1801 }
 0x2a9   : > { %v4450_v8 = vpop.f32.mrf.mxu1 }
 0x2aa   : > { %4889 = vst [vmem:[#allocation22_spill] sm:$0xff] %v4450_v8 }
 0x2ab   : > { %v4452_v20 = vpop.f32.mrf.mxu1 }
 0x2ac   : > { %4890 = vst [vmem:[#allocation23_spill] sm:$0xff] %v4452_v20 }
 0x2ad   : > { %v4456_v5 = vpop.f32.mrf.mxu1 }
 0x2ae   : > { %4891 = vst [vmem:[#allocation24_spill] sm:$0xff] %v4456_v5  ;;  %v1807_v5 = vpop.permute.xlu0 %1806 }
 0x2af   : > { %v4460_v45 = vpop.f32.mrf.mxu1 }
 0x2b0   : > { %4892 = vst [vmem:[#allocation25_spill] sm:$0xff] %v4460_v45 }
 0x2b1   : > { %v4462_v3 = vpop.f32.mrf.mxu1 }
 0x2b2   : > { %4893 = vst [vmem:[#allocation26_spill] sm:$0xff] %v4462_v3  ;;  %v1792_v3 = vpop.permute.xlu1 %1791  ;;  %v1797_v47 = vpop.permute.xlu0 %1796 }
 0x2b3   : > { %v4466_v10 = vpop.f32.mrf.mxu1  ;;  %v2022_v52 = vadd.f32 %v4257_v21, %v1797_v47  ;;  %v2024_v53 = vadd.f32 %v4262_v44, %v1797_v47  ;;  %v2034_v21 = vadd.f32 %v4277_v58, %v1807_v5  ;;  %v2036_v44 = vadd.f32 %v4282_v13, %v1807_v5 }
 0x2b4   : > { %4894 = vst [vmem:[#allocation27_spill] sm:$0xff] %v4466_v10  ;;  %v2016_v10 = vadd.f32 %v4247_v4, %v1792_v3 }
 0x2b5   : > { %v4468_v22 = vpop.f32.mrf.mxu1 }
 0x2b6   : > { %4895 = vst [vmem:[#allocation28_spill] sm:$0xff] %v4468_v22  ;;  %v4514_v58 = vpop.permute.xlu1 %1941 }
 0x2b7   : > { %v4470_v15 = vpop.f32.mrf.mxu1  ;;  %4912 = vst [vmem:[#allocation45_spill] sm:$0xff] %v4514_v58 }
 0x2b8   : > { %4896 = vst [vmem:[#allocation29_spill] sm:$0xff] %v4470_v15  ;;  %v2018_v15 = vadd.f32 %v4252_v14, %v1792_v3  ;;  %v2030_v14 = vadd.f32 %v4272_v54, %v1802_v29  ;;  %v2042_v54 = vadd.f32 %v4292_v43, %v1812_v56 }
 0x2b9   : > { %v4474_v18 = vpop.f32.mrf.mxu1 }
 0x2ba   : > { %4897 = vst [vmem:[#allocation30_spill] sm:$0xff] %v4474_v18 }
 0x2bb   : > { %v4476_v8 = vpop.f32.mrf.mxu1 }
 0x2bc   : > { %4898 = vst [vmem:[#allocation31_spill] sm:$0xff] %v4476_v8 }
 0x2bd   : > { %v4478_v20 = vpop.f32.mrf.mxu1 }
 0x2be   : > { %4899 = vst [vmem:[#allocation32_spill] sm:$0xff] %v4478_v20 }
 0x2bf   : > { %v4480_v45 = vpop.f32.mrf.mxu1 }
 0x2c0   : > { %4900 = vst [vmem:[#allocation33_spill] sm:$0xff] %v4480_v45 }
 0x2c1   : > { %v4482_v57 = vpop.f32.mrf.mxu1 }
 0x2c2   : > { %4901 = vst [vmem:[#allocation34_spill] sm:$0xff] %v4482_v57  ;;  %v2028_v57 = vadd.f32 %v4267_v50, %v1802_v29  ;;  %v2040_v50 = vadd.f32 %v4287_v35, %v1812_v56  ;;  %v4524_v35 = vpop.permute.xlu1 %1931  ;;  %v4848_v56 = vlaneseq }
 0x2c3   : > { %v2272_v22 = vpop.f32.mrf.mxu1  ;;  %4915 = vst [vmem:[#allocation48_spill] sm:$0xff] %v4524_v35 }
 0x2c4   : > { %v4486_v12 = vadd.f32 %v2272_v22, %v2016_v10 }
 0x2c5   : > { %v2274_v18 = vpop.f32.mrf.mxu1 }
 0x2c6   : > { %4902 = vst [vmem:[#allocation35_spill] sm:$0xff] %v4486_v12  ;;  %v4489_v8 = vadd.f32 %v2274_v18, %v2018_v15 }
 0x2c7   : > { %v2278_v20 = vpop.f32.mrf.mxu1 }
 0x2c8   : > { %4903 = vst [vmem:[#allocation36_spill] sm:$0xff] %v4489_v8  ;;  %v4492_v45 = vadd.f32 %v2278_v20, %v2022_v52  ;;  %v4520_v20 = vpop.permute.xlu0 %1946 }
 0x2c9   : > { %v2280_v46 = vpop.f32.mrf.mxu1  ;;  %4914 = vst [vmem:[#allocation47_spill] sm:$0xff] %v4520_v20 }
 0x2ca   : > { %4904 = vst [vmem:[#allocation37_spill] sm:$0xff] %v4492_v45  ;;  %v4495_v4 = vadd.f32 %v2280_v46, %v2024_v53 }
 0x2cb   : > { %v2284_v0 = vpop.f32.mrf.mxu1 }
 0x2cc   : > { %4905 = vst [vmem:[#allocation38_spill] sm:$0xff] %v4495_v4  ;;  %v4498_v3 = vadd.f32 %v2284_v0, %v2028_v57 }
 0x2cd   : > { %v2286_v10 = vpop.f32.mrf.mxu1 }
 0x2ce   : > { %4906 = vst [vmem:[#allocation39_spill] sm:$0xff] %v4498_v3  ;;  %v4501_v22 = vadd.f32 %v2286_v10, %v2030_v14  ;;  %v4530_v10 = vpop.permute.xlu0 %1936 }
 0x2cf   : > { %v2290_v15 = vpop.f32.mrf.mxu1  ;;  %4916 = vst [vmem:[#allocation49_spill] sm:$0xff] %v4530_v10 }
 0x2d0   : > { %4907 = vst [vmem:[#allocation40_spill] sm:$0xff] %v4501_v22  ;;  %v4504_v52 = vadd.f32 %v2290_v15, %v2034_v21  ;;  %v4535_v15 = vshrl.u32 %v4848_v56, 7 }
 0x2d1   : > { %v2292_v47 = vpop.f32.mrf.mxu1 }
 0x2d2   : > { %4908 = vst [vmem:[#allocation41_spill] sm:$0xff] %v4504_v52  ;;  %v4507_v46 = vadd.f32 %v2292_v47, %v2036_v44  ;;  %4917 = vst [vmem:[#allocation50_spill] sm:$0xff] %v4535_v15  ;;  %v4537_v44 = vpop.permute.xlu1 %1921  ;;  %v4550_v35 = vpop.permute.xlu0 %1926 }
 0x2d3   : > { %v2296_v53 = vpop.f32.mrf.mxu1  ;;  %4918 = vst [vmem:[#allocation51_spill] sm:$0xff] %v4537_v44  ;;  %4920 = vst [vmem:[#allocation53_spill] sm:$0xff] %v4550_v35 }
 0x2d4   : > { %4909 = vst [vmem:[#allocation42_spill] sm:$0xff] %v4507_v46  ;;  %v4510_v0 = vadd.f32 %v2296_v53, %v2040_v50  ;;  %v2601_v50 = vsub.s32 1, %v4535_v15  ;;  %v4545_v53 = vld [vmem:[%s4843_s5] sm:$0x3]  ;;  %v4588_v46 = vadd.f32 %v4312_v1, %v4458_v49  ;;  %v2102_v1 = vadd.f32 %v4392_v6, %v4418_v63 }
 0x2d5   : > { %v2298_v57 = vpop.f32.mrf.mxu1  ;;  %4919 = vst [vmem:[#allocation52_spill] sm:$0xff] %v4545_v53  ;;  %v2108_v6 = vadd.f32 %v4396_v17, %v4424_v27 }
 0x2d6   : > { %4910 = vst [vmem:[#allocation43_spill] sm:$0xff] %v4510_v0  ;;  %v4512_v18 = vadd.f32 %v2298_v57, %v2042_v54  ;;  %v2602_v57 = vrot.slane %v4545_v53, %v2601_v50  ;;  %v4554_v56 = vpop.permute.xlu1 %1911  ;;  %v4560_v15 = vpop.permute.xlu0 %1916 }
 0x2d7   : > { %v4516_v29 = vpop.f32.mrf.mxu1  ;;  %4921 = vst [vmem:[#allocation54_spill] sm:$0xff] %v4554_v56  ;;  %4922 = vst [vmem:[#allocation55_spill] sm:$0xff] %v4560_v15  ;;  %v4576_v15 = vadd.f32 %v4297_v60, %v4472_v31  ;;  %v4596_v60 = vadd.f32 %v4322_v38, %v4464_v33  ;;  %v2070_v38 = vadd.f32 %v4337_v37, %v4454_v26 }
 0x2d8   : > { %4911 = vst [vmem:[#allocation44_spill] sm:$0xff] %v4512_v18  ;;  %4913 = vst [vmem:[#allocation46_spill] sm:$0xff] %v4516_v29  ;;  %2669 = vmatprep.mubr.f32.mxu0 %v2602_v57  ;;  %v2078_v37 = vadd.f32 %v4352_v36, %v4438_v9 }
 0x2d9   : > { %v4518_v13 = vpop.f32.mrf.mxu1 }
 0x2da   : > { %v4564_v12 = vpop.permute.xlu1 %1901  ;;  %v4566_v50 = vpop.permute.xlu0 %1906 }
 0x2db   : > { %v4522_v5 = vpop.f32.mrf.mxu1  ;;  %4923 = vst [vmem:[#allocation56_spill] sm:$0xff] %v4564_v12  ;;  %4924 = vst [vmem:[#allocation57_spill] sm:$0xff] %v4566_v50  ;;  %v4580_v12 = vadd.f32 %v4302_v11, %v4472_v31  ;;  %v4584_v50 = vadd.f32 %v4307_v55, %v4458_v49  ;;  %v4602_v11 = vadd.f32 %v4327_v16, %v4448_v42 }
 0x2dc   : > { %v4606_v55 = vadd.f32 %v4332_v30, %v4448_v42  ;;  %v2076_v16 = vadd.f32 %v4347_v23, %v4438_v9  ;;  %v2100_v31 = vadd.f32 %v4387_v19, %v4418_v63  ;;  %v2096_v42 = vadd.f32 %v4382_v7, %v4434_v40 }
 0x2dd   : > { %v4526_v14 = vpop.f32.mrf.mxu1  ;;  %v2094_v23 = vadd.f32 %v4377_v61, %v4434_v40  ;;  %v2090_v7 = vadd.f32 %v4372_v41, %v4428_v34  ;;  %v2082_v41 = vadd.f32 %v4357_v25, %v4444_v39 }
 0x2de   : > { %v4568_v35 = vpop.permute.xlu1 %1891  ;;  %v4570_v56 = vpop.permute.xlu0 %1896 }
 0x2df   : > { %v4528_v43 = vpop.f32.mrf.mxu1  ;;  %4925 = vst [vmem:[#allocation58_spill] sm:$0xff] %v4570_v56  ;;  %v4592_v56 = vadd.f32 %v4317_v32, %v4464_v33  ;;  %v2106_v32 = vadd.f32 %v4394_v28, %v4424_v27  ;;  %v2072_v33 = vadd.f32 %v4342_v51, %v4454_v26  ;;  %v2084_v51 = vadd.f32 %v4362_v24, %v4444_v39 }
 0x2e1   : > { %v4532_v21 = vpop.f32.mrf.mxu1 }
 0x2e2   : > { %v4572_v22 = vpop.permute.xlu1 %1881  ;;  %v4598_v18 = vpop.permute.xlu0 %1886 }
 0x2e3   : > { %v4539_v47 = vpop.f32.mrf.mxu1 }
 0x2e5   : > { %v4547_v54 = vpop.f32.mrf.mxu1 }
 0x2e6   : > { %v1872_v29 = vpop.permute.xlu1 %1871 }
 0x2e7   : > { %v4552_v10 = vpop.f32.mrf.mxu1  ;;  %v2112_v26 = vadd.f32 %v4398_v62, %v1872_v29  ;;  %v2114_v36 = vadd.f32 %v4400_v2, %v1872_v29  ;;  %v4926_v29 = vld [vmem:[#allocation6_spill] sm:$0xff] }
 0x2e9   : > { %v4556_v44 = vpop.f32.mrf.mxu1 }
 0x2eb   : > { %v4558_v20 = vpop.f32.mrf.mxu1 }
 0x2ed   : > { %v4562_v58 = vpop.f32.mrf.mxu1 }
 0x2ef   : > { %v2338_v8 = vpop.f32.mrf.mxu1 }
 0x2f1   : > { %v2340_v45 = vpop.f32.mrf.mxu1 }
 0x2f3   : > { %v2344_v53 = vpop.f32.mrf.mxu1 }
 0x2f5   : > { %v2346_v57 = vpop.f32.mrf.mxu1 }
 0x2f7   : > { %v2350_v4 = vpop.f32.mrf.mxu1 }
 0x2f8   : > { %v2351_v9 = vadd.f32 %v2350_v4, %v2094_v23 }
 0x2f9   : > { %v2352_v3 = vpop.f32.mrf.mxu1 }
 0x2fa   : > { %v2353_v17 = vadd.f32 %v2352_v3, %v2096_v42  ;;  %v2489_v23 = vmul.f32 0.2, %v2351_v9 }
 0x2fb   : > { %v2356_v52 = vpop.f32.mrf.mxu1 }
 0x2fc   : > { %v2357_v19 = vadd.f32 %v2356_v52, %v2100_v31 }
 0x2fd   : > { %v2358_v0 = vpop.f32.mrf.mxu1 }
 0x2fe   : > { %v2359_v28 = vadd.f32 %v2358_v0, %v2102_v1  ;;  %v2088_v0 = vadd.f32 %v4367_v59, %v4428_v34  ;;  %v2491_v31 = vmul.f32 0.2, %v2357_v19  ;;  %v2341_v59 = vadd.f32 %v2340_v45, %v2084_v51 }
 0x2ff   : > { %v2362_v30 = vpop.f32.mrf.mxu1  ;;  %v2490_v34 = vmul.f32 0.2, %v2353_v17 }
 0x300   : > { %v2363_v49 = vadd.f32 %v2362_v30, %v2106_v32  ;;  %v1877_v32 = vpop.permute.xlu0 %1876  ;;  %v2347_v30 = vadd.f32 %v2346_v57, %v2090_v7  ;;  %v2492_v61 = vmul.f32 0.2, %v2359_v28  ;;  %v2345_v3 = vadd.f32 %v2344_v53, %v2088_v0 }
 0x301   : > { %v2364_v63 = vpop.f32.mrf.mxu1  ;;  %v2118_v62 = vadd.f32 %v4402_v48, %v1877_v32  ;;  %v2339_v57 = vadd.f32 %v2338_v8, %v2082_v41  ;;  %v4927_v48 = vld [vmem:[#allocation7_spill] sm:$0xff]  ;;  %v2333_v53 = vadd.f32 %v4558_v20, %v2076_v16  ;;  %v2329_v8 = vadd.f32 %v4556_v44, %v2072_v33  ;;  %v4929_v33 = vld [vmem:[#allocation9_spill] sm:$0xff] }
 0x302   : > { %v2365_v27 = vadd.f32 %v2364_v63, %v2108_v6  ;;  %v2493_v1 = vmul.f32 0.2, %v2363_v49  ;;  %v2120_v6 = vadd.f32 %v4926_v29, %v1877_v32  ;;  %v2556_v25 = vmax.f32 %v2359_v28, %v2492_v61 }
 0x303   : > { %v2368_v24 = vpop.f32.mrf.mxu1  ;;  %v2124_v45 = vadd.f32 %v4927_v48, %v4572_v22  ;;  %v2487_v51 = vmul.f32 0.2, %v2345_v3  ;;  %v2485_v32 = vmul.f32 0.2, %v2339_v57  ;;  %v2553_v61 = vmax.f32 %v2351_v9, %v2489_v23 }
 0x304   : > { %v2494_v40 = vmul.f32 0.2, %v2365_v27  ;;  %v4636_v52 = vadd.f32 %v2368_v24, %v2112_v26  ;;  %v2557_v63 = vmax.f32 %v2363_v49, %v2493_v1  ;;  %v2335_v26 = vadd.f32 %v4562_v58, %v2078_v37  ;;  %v4928_v58 = vld [vmem:[#allocation8_spill] sm:$0xff] }
 0x305   : > { %v2370_v42 = vpop.f32.mrf.mxu1  ;;  %v2488_v24 = vmul.f32 0.2, %v2347_v30  ;;  %v2486_v49 = vmul.f32 0.2, %v2341_v59  ;;  %v2126_v28 = vadd.f32 %v4928_v58, %v4572_v22  ;;  %v2327_v37 = vadd.f32 %v4552_v10, %v2070_v38 }
 0x306   : > { %v2558_v2 = vmax.f32 %v2365_v27, %v2494_v40  ;;  %v4641_v4 = vadd.f32 %v2370_v42, %v2114_v36  ;;  %v2555_v27 = vmax.f32 %v2357_v19, %v2491_v31  ;;  %v2554_v36 = vmax.f32 %v2353_v17, %v2490_v34 }
 0x307   : > { %v2374_v7 = vpop.f32.mrf.mxu1  ;;  %v2323_v20 = vadd.f32 %v4547_v54, %v4606_v55  ;;  %v2484_v16 = vmul.f32 0.2, %v2335_v26  ;;  %v2552_v19 = vmax.f32 %v2347_v30, %v2488_v24  ;;  %v2130_v17 = vadd.f32 %v4929_v33, %v4598_v18  ;;  %v4930_v30 = vld [vmem:[#allocation10_spill] sm:$0xff]  ;;  %v4937_v33 = vld [vmem:[#allocation41_spill] sm:$0xff] }
 0x308   : > { %v4645_v39 = vadd.f32 %v2374_v7, %v2118_v62  ;;  %2605 = vmatprep.subr.mxu0 %v2558_v2  ;;  %v2321_v22 = vadd.f32 %v4539_v47, %v4602_v11  ;;  %v2483_v41 = vmul.f32 0.2, %v2333_v53  ;;  %v2551_v10 = vmax.f32 %v2345_v3, %v2487_v51 }
 0x309   : > { %v2376_v0 = vpop.f32.mrf.mxu1  ;;  %2606 = vmatpush1.msra.mxu0 %v2557_v63  ;;  %v2317_v9 = vadd.f32 %v4532_v21, %v4596_v60  ;;  %v2482_v62 = vmul.f32 0.2, %v2329_v8  ;;  %v2550_v54 = vmax.f32 %v2341_v59, %v2486_v49  ;;  %v2132_v31 = vadd.f32 %v4930_v30, %v4598_v18  ;;  %v4931_v59 = vld [vmem:[#allocation11_spill] sm:$0xff]  ;;  %v4932_v63 = vld [vmem:[#allocation46_spill] sm:$0xff] }
 0x30a   : > { %v4651_v1 = vadd.f32 %v2376_v0, %v2120_v6  ;;  %2607 = vmatprep.subr.mxu0 %v2556_v25  ;;  %v2315_v42 = vadd.f32 %v4528_v43, %v4592_v56  ;;  %v2481_v34 = vmul.f32 0.2, %v2327_v37  ;;  %v2549_v47 = vmax.f32 %v2339_v57, %v2485_v32 }
 0x30b   : > { %v2380_v40 = vpop.f32.mrf.mxu1  ;;  %2608 = vmatpush1.msra.mxu0 %v2555_v27  ;;  %v2311_v3 = vadd.f32 %v4526_v14, %v4588_v46  ;;  %v2480_v2 = vmul.f32 0.2, %v2323_v20  ;;  %v2548_v21 = vmax.f32 %v2335_v26, %v2484_v16  ;;  %v2136_v29 = vadd.f32 %v4931_v59, %v4568_v35  ;;  %v4942_v59 = vld [vmem:[#allocation36_spill] sm:$0xff] }
 0x30c   : > { %v4658_v44 = vadd.f32 %v2380_v40, %v2124_v45  ;;  %2609 = vmatprep.subr.mxu0 %v2554_v36  ;;  %v2309_v18 = vadd.f32 %v4522_v5, %v4584_v50  ;;  %v2479_v6 = vmul.f32 0.2, %v2321_v22  ;;  %v2547_v43 = vmax.f32 %v2333_v53, %v2483_v41  ;;  %v4933_v5 = vld [vmem:[#allocation12_spill] sm:$0xff] }
 0x30d   : > { %v2382_v38 = vpop.f32.mrf.mxu1  ;;  %2610 = vmatpush1.msra.mxu0 %v2553_v61  ;;  %v2305_v57 = vadd.f32 %v4518_v13, %v4580_v12  ;;  %v2478_v23 = vmul.f32 0.2, %v2317_v9  ;;  %v2546_v46 = vmax.f32 %v2329_v8, %v2482_v62  ;;  %v2303_v7 = vadd.f32 %v4932_v63, %v4576_v15  ;;  %v4939_v62 = vld [vmem:[#allocation39_spill] sm:$0xff] }
 0x30e   : > { %v4666_v55 = vadd.f32 %v2382_v38, %v2126_v28  ;;  %2611 = vmatprep.subr.mxu0 %v2552_v19  ;;  %v2477_v26 = vmul.f32 0.2, %v2315_v42  ;;  %v2545_v24 = vmax.f32 %v2327_v37, %v2481_v34  ;;  %v2138_v50 = vadd.f32 %v4933_v5, %v4568_v35  ;;  %v4934_v35 = vld [vmem:[#allocation44_spill] sm:$0xff]  ;;  %v4935_v37 = vld [vmem:[#allocation43_spill] sm:$0xff] }
 0x30f   : > { %v2386_v11 = vpop.f32.mrf.mxu1  ;;  %2612 = vmatpush1.msra.mxu0 %v2551_v10  ;;  %v2476_v48 = vmul.f32 0.2, %v2311_v3  ;;  %v2544_v45 = vmax.f32 %v2323_v20, %v2480_v2  ;;  %v2475_v12 = vmul.f32 0.2, %v2309_v18  ;;  %v2543_v13 = vmax.f32 %v2321_v22, %v2479_v6  ;;  %v4936_v20 = vld [vmem:[#allocation42_spill] sm:$0xff]  ;;  %v4938_v10 = vld [vmem:[#allocation40_spill] sm:$0xff] }
 0x310   : > { %v4674_v60 = vadd.f32 %v2386_v11, %v2130_v17  ;;  %2613 = vmatprep.subr.mxu0 %v2550_v54  ;;  %v2474_v27 = vmul.f32 0.2, %v2305_v57  ;;  %v2542_v0 = vmax.f32 %v2317_v9, %v2478_v23  ;;  %v2473_v15 = vmul.f32 0.2, %v2303_v7  ;;  %v4941_v11 = vld [vmem:[#allocation37_spill] sm:$0xff]  ;;  %v4943_v6 = vld [vmem:[#allocation35_spill] sm:$0xff] }
 0x311   : > { %v2388_v56 = vpop.f32.mrf.mxu1  ;;  %2614 = vmatpush1.msra.mxu0 %v2549_v47  ;;  %v2541_v49 = vmax.f32 %v2315_v42, %v2477_v26  ;;  %v2472_v58 = vmul.f32 0.2, %v4934_v35  ;;  %v2540_v28 = vmax.f32 %v2311_v3, %v2476_v48  ;;  %v2471_v32 = vmul.f32 0.2, %v4935_v37  ;;  %v4940_v42 = vld [vmem:[#allocation38_spill] sm:$0xff] }
 0x312   : > { %v4682_v14 = vadd.f32 %v2388_v56, %v2132_v31  ;;  %2615 = vmatprep.subr.mxu0 %v2548_v21  ;;  %v2539_v61 = vmax.f32 %v2309_v18, %v2475_v12  ;;  %v2470_v16 = vmul.f32 0.2, %v4936_v20  ;;  %v2538_v19 = vmax.f32 %v2305_v57, %v2474_v27 }
 0x313   : > { %v2392_v25 = vpop.f32.mrf.mxu1  ;;  %2616 = vmatpush1.msra.mxu0 %v2547_v43  ;;  %v2469_v17 = vmul.f32 0.2, %v4937_v33  ;;  %v2537_v22 = vmax.f32 %v2303_v7, %v2473_v15  ;;  %v2468_v38 = vmul.f32 0.2, %v4938_v10  ;;  %v2536_v9 = vmax.f32 %v4934_v35, %v2472_v58  ;;  %v4944_v35 = vld [vmem:[#allocation45_spill] sm:$0xff]  ;;  %v4945_v58 = vld [vmem:[#allocation32_spill] sm:$0xff] }
 0x314   : > { %v4688_v53 = vadd.f32 %v2392_v25, %v2136_v29  ;;  %2617 = vmatprep.subr.mxu0 %v2546_v46  ;;  %v2467_v54 = vmul.f32 0.2, %v4939_v62  ;;  %v2535_v30 = vmax.f32 %v4935_v37, %v2471_v32  ;;  %v2466_v34 = vmul.f32 0.2, %v4940_v42  ;;  %v4946_v37 = vld [vmem:[#allocation47_spill] sm:$0xff]  ;;  %v4947_v32 = vld [vmem:[#allocation33_spill] sm:$0xff] }
 0x315   : > { %v2394_v51 = vpop.f32.mrf.mxu1  ;;  %2618 = vmatpush1.msra.mxu0 %v2545_v24  ;;  %v2534_v47 = vmax.f32 %v4936_v20, %v2470_v16  ;;  %v2465_v3 = vmul.f32 0.2, %v4941_v11  ;;  %v2533_v2 = vmax.f32 %v4937_v33, %v2469_v17  ;;  %v2464_v29 = vmul.f32 0.2, %v4942_v59  ;;  %v4948_v20 = vld [vmem:[#allocation31_spill] sm:$0xff]  ;;  %v4949_v33 = vld [vmem:[#allocation49_spill] sm:$0xff] }
 0x316   : > { %v4690_v8 = vadd.f32 %v2394_v51, %v2138_v50  ;;  %2619 = vmatprep.subr.mxu0 %v2544_v45  ;;  %v2532_v18 = vmax.f32 %v4938_v10, %v2468_v38  ;;  %v2463_v43 = vmul.f32 0.2, %v4943_v6  ;;  %v2531_v56 = vmax.f32 %v4939_v62, %v2467_v54  ;;  %v4950_v17 = vld [vmem:[#allocation30_spill] sm:$0xff]  ;;  %v4952_v54 = vld [vmem:[#allocation29_spill] sm:$0xff] }
 0x317   : > { %v4692_v36 = vpop.f32.mrf.mxu1  ;;  %2620 = vmatpush1.msra.mxu0 %v2543_v13  ;;  %v2530_v23 = vmax.f32 %v4940_v42, %v2466_v34  ;;  %v2529_v46 = vmax.f32 %v4941_v11, %v2465_v3  ;;  %v2528_v7 = vmax.f32 %v4942_v59, %v2464_v29  ;;  %v2196_v16 = vadd.f32 %v4948_v20, %v4944_v35  ;;  %v4951_v10 = vld [vmem:[#allocation34_spill] sm:$0xff]  ;;  %v4954_v11 = vld [vmem:[#allocation28_spill] sm:$0xff]  ;;  %v4955_v29 = vld [vmem:[#allocation27_spill] sm:$0xff] }
 0x318   : > { %2621 = vmatprep.subr.mxu0 %v2542_v0  ;;  %v2527_v26 = vmax.f32 %v4943_v6, %v2463_v43  ;;  %v2204_v38 = vadd.f32 %v4951_v10, %v4946_v37  ;;  %v4963_v10 = vld [vmem:[#allocation22_spill] sm:$0xff] }
 0x319   : > { %v4696_v40 = vpop.f32.mrf.mxu1  ;;  %2622 = vmatpush1.msra.mxu0 %v2541_v49 }
 0x31a   : > { %2623 = vmatprep.subr.mxu0 %v2540_v28  ;;  %v2198_v28 = vadd.f32 %v4945_v58, %v4944_v35  ;;  %v4958_v35 = vld [vmem:[#allocation25_spill] sm:$0xff] }
 0x31b   : > { %v4700_v41 = vpop.f32.mrf.mxu1  ;;  %2624 = vmatpush1.msra.mxu0 %v2539_v61  ;;  %v2202_v61 = vadd.f32 %v4947_v32, %v4946_v37  ;;  %v4959_v37 = vld [vmem:[#allocation51_spill] sm:$0xff]  ;;  %v4960_v32 = vld [vmem:[#allocation24_spill] sm:$0xff] }
 0x31c   : > { %2625 = vmatprep.subr.mxu0 %v2538_v19 }
 0x31d   : > { %v4706_v31 = vpop.f32.mrf.mxu1  ;;  %2626 = vmatpush1.msra.mxu0 %v2537_v22  ;;  %v2192_v22 = vadd.f32 %v4950_v17, %v4949_v33 }
 0x31e   : > { %2627 = vmatprep.subr.mxu0 %v2536_v9 }
 0x31f   : > { %v4712_v21 = vpop.f32.mrf.mxu1  ;;  %2628 = vmatpush1.msra.mxu0 %v2535_v30  ;;  %v2190_v30 = vadd.f32 %v4952_v54, %v4949_v33 }
 0x320   : > { %2629 = vmatprep.subr.mxu0 %v2534_v47  ;;  %v4953_v47 = vld [vmem:[#allocation48_spill] sm:$0xff] }
 0x321   : > { %v4718_v57 = vpop.f32.mrf.mxu1  ;;  %2630 = vmatpush1.msra.mxu0 %v2533_v2  ;;  %v2186_v3 = vadd.f32 %v4954_v11, %v4953_v47 }
 0x322   : > { %2631 = vmatprep.subr.mxu0 %v2532_v18  ;;  %v2184_v18 = vadd.f32 %v4955_v29, %v4953_v47  ;;  %v4966_v29 = vld [vmem:[#allocation20_spill] sm:$0xff] }
 0x323   : > { %v4722_v63 = vpop.f32.mrf.mxu1  ;;  %2632 = vmatpush1.msra.mxu0 %v2531_v56  ;;  %v4956_v56 = vld [vmem:[#allocation53_spill] sm:$0xff] }
 0x324   : > { %2633 = vmatprep.subr.mxu0 %v2530_v23  ;;  %v4957_v23 = vld [vmem:[#allocation26_spill] sm:$0xff] }
 0x325   : > { %v4726_v24 = vpop.f32.mrf.mxu1  ;;  %2634 = vmatpush1.msra.mxu0 %v2529_v46  ;;  %v2180_v46 = vadd.f32 %v4957_v23, %v4956_v56 }
 0x326   : > { %2635 = vmatprep.subr.mxu0 %v2528_v7 }
 0x327   : > { %v2422_v25 = vpop.f32.mrf.mxu1  ;;  %2636 = vmatpush1.msra.mxu0 %v2527_v26 }
 0x329   : > { %v2424_v5 = vpop.f32.mrf.mxu1 }
 0x32b   : > { %v2428_v50 = vpop.f32.mrf.mxu1 }
 0x32d   : > { %v2430_v48 = vpop.f32.mrf.mxu1 }
 0x32f   : > { %v2434_v45 = vpop.f32.mrf.mxu1 }
 0x331   : > { %v2436_v12 = vpop.f32.mrf.mxu1 }
 0x333   : > { %v2440_v13 = vpop.f32.mrf.mxu1 }
 0x334   : > { %v2441_v58 = vadd.f32 %v2440_v13, %v2184_v18  ;;  %v4964_v13 = vld [vmem:[#allocation21_spill] sm:$0xff] }
 0x335   : > { %v2442_v51 = vpop.f32.mrf.mxu1 }
 0x336   : > { %v2443_v7 = vadd.f32 %v2442_v51, %v2186_v3  ;;  %v4962_v51 = vld [vmem:[#allocation55_spill] sm:$0xff] }
 0x337   : > { %v2446_v27 = vpop.f32.mrf.mxu1  ;;  %v2166_v47 = vadd.f32 %v4964_v13, %v4962_v51 }
 0x338   : > { %v2447_v6 = vadd.f32 %v2446_v27, %v2190_v30  ;;  %v4961_v27 = vld [vmem:[#allocation23_spill] sm:$0xff]  ;;  %v2520_v30 = vmul.f32 0.2, %v2443_v7 }
 0x339   : > { %v2448_v0 = vpop.f32.mrf.mxu1  ;;  %v2423_v23 = vadd.f32 %v2422_v25, %v2166_v47  ;;  %v4971_v25 = vld [vmem:[#allocation56_spill] sm:$0xff] }
 0x33a   : > { %v2449_v2 = vadd.f32 %v2448_v0, %v2192_v22  ;;  %v2174_v0 = vadd.f32 %v4960_v32, %v4959_v37  ;;  %v2521_v17 = vmul.f32 0.2, %v2447_v6 }
 0x33b   : > { %v2452_v15 = vpop.f32.mrf.mxu1 }
 0x33c   : > { %v2453_v42 = vadd.f32 %v2452_v15, %v2196_v16  ;;  %v2178_v15 = vadd.f32 %v4958_v35, %v4956_v56  ;;  %v2522_v20 = vmul.f32 0.2, %v2449_v2  ;;  %v2431_v54 = vadd.f32 %v2430_v48, %v2174_v0  ;;  %v4972_v0 = vld [vmem:[#allocation16_spill] sm:$0xff] }
 0x33d   : > { %v2454_v49 = vpop.f32.mrf.mxu1 }
 0x33e   : > { %v2455_v9 = vadd.f32 %v2454_v49, %v2198_v28  ;;  %v2523_v28 = vmul.f32 0.2, %v2453_v42  ;;  %v2435_v33 = vadd.f32 %v2434_v45, %v2178_v15  ;;  %v2516_v35 = vmul.f32 0.2, %v2431_v54 }
 0x33f   : > { %v2458_v19 = vpop.f32.mrf.mxu1  ;;  %v2584_v15 = vmax.f32 %v2443_v7, %v2520_v30 }
 0x340   : > { %v2459_v62 = vadd.f32 %v2458_v19, %v2202_v61  ;;  %v2524_v26 = vmul.f32 0.2, %v2455_v9  ;;  %v2437_v61 = vadd.f32 %v2436_v12, %v2180_v46  ;;  %v2172_v19 = vadd.f32 %v4961_v27, %v4959_v37 }
 0x341   : > { %v2460_v34 = vpop.f32.mrf.mxu1  ;;  %v2519_v12 = vmul.f32 0.2, %v2441_v58  ;;  %v2587_v3 = vmax.f32 %v2453_v42, %v2523_v28  ;;  %v2585_v46 = vmax.f32 %v2447_v6, %v2521_v17  ;;  %v2150_v6 = vadd.f32 %v4972_v0, %v4971_v25 }
 0x342   : > { %v2461_v59 = vadd.f32 %v2460_v34, %v2204_v38  ;;  %v2525_v43 = vmul.f32 0.2, %v2459_v62  ;;  %v2168_v38 = vadd.f32 %v4963_v10, %v4962_v51  ;;  %v2588_v34 = vmax.f32 %v2455_v9, %v2524_v26  ;;  %v4968_v26 = vld [vmem:[#allocation57_spill] sm:$0xff]  ;;  %v4975_v51 = vld [vmem:[#allocation14_spill] sm:$0xff] }
 0x343   : > { %v2429_v11 = vadd.f32 %v2428_v50, %v2172_v19  ;;  %v2518_v56 = vmul.f32 0.2, %v2437_v61  ;;  %v2517_v9 = vmul.f32 0.2, %v2435_v33  ;;  %v2583_v32 = vmax.f32 %v2441_v58, %v2519_v12 }
 0x344   : > { %v2526_v49 = vmul.f32 0.2, %v2461_v59  ;;  %v2589_v22 = vmax.f32 %v2459_v62, %v2525_v43  ;;  %v2425_v45 = vadd.f32 %v2424_v5, %v2168_v38  ;;  %v2586_v62 = vmax.f32 %v2449_v2, %v2522_v20  ;;  %v4967_v43 = vld [vmem:[#allocation19_spill] sm:$0xff]  ;;  %v4970_v5 = vld [vmem:[#allocation17_spill] sm:$0xff] }
 0x345   : > { %v2154_v28 = vadd.f32 %v4970_v5, %v4968_v26  ;;  %v2515_v37 = vmul.f32 0.2, %v2429_v11  ;;  %v2582_v27 = vmax.f32 %v2437_v61, %v2518_v56  ;;  %v2513_v17 = vmul.f32 0.2, %v2423_v23 }
 0x346   : > { %v2590_v16 = vmax.f32 %v2461_v59, %v2526_v49  ;;  %v4965_v59 = vld [vmem:[#allocation54_spill] sm:$0xff]  ;;  %v2407_v10 = vadd.f32 %v4706_v31, %v2150_v6  ;;  %v2580_v30 = vmax.f32 %v2431_v54, %v2516_v35 }
 0x347   : > { %v2162_v18 = vadd.f32 %v4966_v29, %v4965_v59  ;;  %v2160_v48 = vadd.f32 %v4967_v43, %v4965_v59  ;;  %v4969_v49 = vld [vmem:[#allocation18_spill] sm:$0xff]  ;;  %v2411_v19 = vadd.f32 %v4712_v21, %v2154_v28  ;;  %v2579_v47 = vmax.f32 %v2429_v11, %v2515_v37 }
 0x348   : > { %2637 = vmatprep.subr.mxu0 %v2590_v16  ;;  %v2156_v50 = vadd.f32 %v4969_v49, %v4968_v26  ;;  %v2514_v16 = vmul.f32 0.2, %v2425_v45  ;;  %v2577_v31 = vmax.f32 %v2423_v23, %v2513_v17  ;;  %v2508_v54 = vmul.f32 0.2, %v2407_v10 }
 0x349   : > { %2638 = vmatpush2.msra.mxu0 %v2589_v22  ;;  %v2419_v42 = vadd.f32 %v4726_v24, %v2162_v18  ;;  %v2417_v2 = vadd.f32 %v4722_v63, %v2160_v48  ;;  %v4973_v24 = vld [vmem:[#allocation15_spill] sm:$0xff]  ;;  %v2581_v22 = vmax.f32 %v2435_v33, %v2517_v9  ;;  %v4974_v63 = vld [vmem:[#allocation58_spill] sm:$0xff]  ;;  %v2509_v59 = vmul.f32 0.2, %v2411_v19 }
 0x34a   : > { %2639 = vmatprep.subr.mxu0 %v2588_v34  ;;  %v2413_v20 = vadd.f32 %v4718_v57, %v2156_v50  ;;  %v2148_v7 = vadd.f32 %v4973_v24, %v4971_v25  ;;  %v2144_v58 = vadd.f32 %v4975_v51, %v4974_v63  ;;  %v4976_v57 = vld [vmem:[#allocation13_spill] sm:$0xff]  ;;  %v2578_v12 = vmax.f32 %v2425_v45, %v2514_v16 }
 0x34b   : > { %2640 = vmatpush2.msra.mxu0 %v2587_v3  ;;  %v2512_v38 = vmul.f32 0.2, %v2419_v42  ;;  %v2142_v61 = vadd.f32 %v4976_v57, %v4974_v63  ;;  %v2511_v13 = vmul.f32 0.2, %v2417_v2  ;;  %v2573_v43 = vmax.f32 %v2411_v19, %v2509_v59 }
 0x34c   : > { %2641 = vmatprep.subr.mxu0 %v2586_v62  ;;  %v2405_v34 = vadd.f32 %v4700_v41, %v2148_v7  ;;  %v2401_v21 = vadd.f32 %v4696_v40, %v2144_v58  ;;  %v2510_v33 = vmul.f32 0.2, %v2413_v20  ;;  %v2504_v40 = vmul.f32 0.2, %v4690_v8 }
 0x34d   : > { %2642 = vmatpush2.msra.mxu0 %v2585_v46  ;;  %v2399_v3 = vadd.f32 %v4692_v36, %v2142_v61  ;;  %v2576_v29 = vmax.f32 %v2419_v42, %v2512_v38  ;;  %v2575_v56 = vmax.f32 %v2417_v2, %v2511_v13  ;;  %v2572_v45 = vmax.f32 %v2407_v10, %v2508_v54 }
 0x34e   : > { %2643 = vmatprep.subr.mxu0 %v2584_v15  ;;  %v2507_v18 = vmul.f32 0.2, %v2405_v34  ;;  %v2506_v41 = vmul.f32 0.2, %v2401_v21  ;;  %v2574_v62 = vmax.f32 %v2413_v20, %v2510_v33  ;;  %v2503_v36 = vmul.f32 0.2, %v4688_v53 }
 0x34f   : > { %2644 = vmatpush2.msra.mxu0 %v2583_v32  ;;  %v2505_v11 = vmul.f32 0.2, %v2399_v3  ;;  %v2502_v23 = vmul.f32 0.2, %v4682_v14  ;;  %v2501_v46 = vmul.f32 0.2, %v4674_v60  ;;  %v2568_v50 = vmax.f32 %v4690_v8, %v2504_v40 }
 0x350   : > { %2645 = vmatprep.subr.mxu0 %v2582_v27  ;;  %v2571_v48 = vmax.f32 %v2405_v34, %v2507_v18  ;;  %v2570_v9 = vmax.f32 %v2401_v21, %v2506_v41  ;;  %v2500_v49 = vmul.f32 0.2, %v4666_v55  ;;  %v2499_v42 = vmul.f32 0.2, %v4658_v44  ;;  %v4977_v32 = vld [vmem:[#allocation50_spill] sm:$0xff]  ;;  %v4978_v20 = vld [vmem:[#allocation52_spill] sm:$0xff] }
 0x351   : > { %2646 = vmatpush2.msra.mxu0 %v2581_v22  ;;  %v2569_v26 = vmax.f32 %v2399_v3, %v2505_v11  ;;  %v2567_v35 = vmax.f32 %v4688_v53, %v2503_v36  ;;  %v2498_v15 = vmul.f32 0.2, %v4651_v1  ;;  %v2566_v5 = vmax.f32 %v4682_v14, %v2502_v23 }
 0x352   : > { %2647 = vmatprep.subr.mxu0 %v2580_v30  ;;  %v2497_v28 = vmul.f32 0.2, %v4645_v39  ;;  %v2565_v2 = vmax.f32 %v4674_v60, %v2501_v46  ;;  %v2496_v37 = vmul.f32 0.2, %v4641_v4  ;;  %v2564_v8 = vmax.f32 %v4666_v55, %v2500_v49 }
 0x353   : > { %2648 = vmatpush2.msra.mxu0 %v2579_v47  ;;  %v2597_v25 = vsub.s32 0, %v4977_v32  ;;  %v2495_v53 = vmul.f32 0.2, %v4636_v52  ;;  %v2563_v0 = vmax.f32 %v4658_v44, %v2499_v42  ;;  %v2562_v14 = vmax.f32 %v4651_v1, %v2498_v15 }
 0x354   : > { %2649 = vmatprep.subr.mxu0 %v2578_v12  ;;  %v2561_v6 = vmax.f32 %v4645_v39, %v2497_v28  ;;  %v2560_v60 = vmax.f32 %v4641_v4, %v2496_v37  ;;  %v2593_v44 = vstv %s2592_s9  ;;  %v2980_v63 = vmov 1966171168  }
 0x355   : > { %2650 = vmatpush2.msra.mxu0 %v2577_v31  ;;  %v2598_v16 = vrot.slane %v4978_v20, %v2597_v25  ;;  %v2559_v55 = vmax.f32 %v4636_v52, %v2495_v53  ;;  %v2692_v51 = vunpack.c.l.s4 %v2980_v63  ;;  %v4979_v34 = vlaneseq }
 0x356   : > { %2651 = vmatprep.subr.mxu0 %v2576_v29 }
 0x357   : > { %2652 = vmatpush2.msra.mxu0 %v2575_v56  ;;  %v2693_v58 = vunpack.c.0.s8 %v2692_v51  ;;  %vm2708_vm1 = vcmp.lt.s32.totalorder %v4979_v34, 256 }
 0x358   : > { %2653 = vmatprep.subr.mxu0 %v2574_v62 }
 0x359   : > { %2654 = vmatpush2.msra.mxu0 %v2573_v43  ;;  %v2696_v38 = vsub.s32 %v2693_v58, %v4977_v32 }
 0x35a   : > { %2655 = vmatprep.subr.mxu0 %v2572_v45 }
 0x35b   : > { %2656 = vmatpush2.msra.mxu0 %v2571_v48 }
 0x35c   : > { %2657 = vmatprep.subr.mxu0 %v2570_v9 }
 0x35d   : > { %2658 = vmatpush2.msra.mxu0 %v2569_v26 }
 0x35e   : > { %2659 = vmatprep.subr.mxu0 %v2568_v50 }
 0x35f   : > { %2660 = vmatpush2.msra.mxu0 %v2567_v35 }
 0x360   : > { %2661 = vmatprep.subr.mxu0 %v2566_v5 }
 0x361   : > { %2662 = vmatpush2.msra.mxu0 %v2565_v2 }
 0x362   : > { %2663 = vmatprep.subr.mxu0 %v2564_v8 }
 0x363   : > { %2664 = vmatpush2.msra.mxu0 %v2563_v0 }
 0x364   : > { %2665 = vmatprep.subr.mxu0 %v2562_v14 }
 0x365   : > { %2666 = vmatpush2.msra.mxu0 %v2561_v6 }
 0x366   : > { %2667 = vmatprep.subr.mxu0 %v2560_v60 }
 0x367   : > { %2668 = vmatpush2.msra.mxu0 %v2559_v55 }
 0x368   : > { %2670 = vmatmul.mubr.f32.vlgmr.msra.gmra.mxu0 %v2598_v16 }
 0x428   : > { %v2671_v27 = vpop.f32.mrf.mxu0 }
 0x429   : > { %v2672_v1 = vadd.f32 %v2671_v27, %v2593_v44 }
 0x42a   : > { %v2673_v24 = vpop.f32.mrf.mxu0 }
 0x42b   : > { %v2856_v7 = vmul.f32 -1.442695, %v2672_v1  ;;  %v2674_v39 = vadd.f32 %v2673_v24, %v2593_v44 }
 0x42d   : > { %2908 = vpow2.f32 %v2856_v7  ;;  %v2857_v19 = vmul.f32 -1.442695, %v2674_v39 }
 0x42f   : > { %2910 = vpow2.f32 %v2857_v19 }
 0x43a   : > { %v2909_v4 = vpop.eup %2908 }
 0x43b   : > { %v2682_v17 = vadd.f32 1.0, %v2909_v4 }
 0x43c   : > { %v2911_v22 = vpop.eup %2910 }
 0x43d   : > { %v2683_v52 = vadd.f32 1.0, %v2911_v22  ;;  %2912 = vrcp.f32 %v2682_v17 }
 0x43f   : > { %2914 = vrcp.f32 %v2683_v52 }
 0x44a   : > { %v2913_v10 = vpop.eup %2912 }
 0x44c   : > { %v2915_v30 = vpop.eup %2914 }
 0x44d   : > { %v2690_v57 = vcombine.low %v2913_v10, %v2915_v30 }
 0x44f   : > { %v2697_v61 = vrot.slane %v2690_v57, %v2696_v38 }
 0x451   : > { %v2704_v13 = vrot.slane %v2697_v61, %v2696_v38 }
 0x453   : > { %2710 = vst.msk [vmem:[%s273_s16] sm:$0x3] %vm2708_vm1, %v2704_v13 }
 0x454   : > { %2929 = shalt.err (!%p2926_p3)
}
 0x455   : > { %s2930_s25 = scalar_lea.hbm %s2724_s20, 32  ;;  %s2934_s10 = scalar_lea.hbm %s4845_s7, 64 }
 0x456   : > { %p2931_p4 = scmp.ne.s32.totalorder %s2724_s20, %s2930_s25  ;;  %p2935_p9 = scmp.lt.s32.totalorder %s2724_s20, %s4845_s7 }
 0x457   : > { %p2936_p10 = scmp.lt.s32.totalorder %s2934_s10, %s2930_s25 }
 0x458   : > { %p2932_p7 = pnand %p2931_p4, %p3063_p5 }
 0x459   : > { %p2937_p11 = por %p2936_p10, %p2935_p9 }
 0x45a   : > { %p2933_p8 = pneg %p2932_p7 }
 0x45c   : > { %p2938_p12 = pnand %p2937_p11, %p2933_p8 }
 0x45e   : > { %2941 = shalt.err (!%p2938_p12)
}
 0x45f   : > { %2864 = dma.vmem_to_hbm [thread:$0]  (%p3063_p5), %s2727_s17, 32, %s2724_s20, %s2712_s21  }
 0x460 PF: > { %p2870_p13 = scmp.ge.s32.totalorder %s2976_s29, 2  ;;  %s2738_s16 = sand.u32 1, %s2964_s26  }
 0x461   : > { %s2739_s18 = scalar_lea.sflag [#allocation4], %s2738_s16 }
 0x462   : > { %p2867_p0 = pnand %p2870_p13, %p3067_p6 }
 0x464   : > { %p2868_p1 = pneg %p2867_p0 }
 0x466   : > { %2959 = dma.done.wait (%p2868_p1), %s2739_s18, 32  }
 0x467   : > { %2961 = vsyncadd (%p2868_p1), %s2739_s18, 4294967264  ;;  %p18_p2 = scmp.ge.s32.totalorder %s3050_s8, 4   ;;  %s4980_s26 = smov %s2968_s27 }
 0x468   : > { %s4981_s27 = smov %s2972_s28  ;;  %s4982_s28 = smov %s3061_s11 }
 0x469   : > { %s4983_s29 = smov %s3050_s8  ;;  %20 = sbr.rel (!%p18_p2) target bundleno = 5 (0x5), region = 83 }
 0x46e   :  { %2744 = vsyncpa [#allocation4], 1 }
 0x46f   :  { %2746 = vsyncpa [#allocation4 + $0x1], 1 }

</bundles_post_ra>
